<compile_context>
chip_gen: v6e
topology: v6e:2x2x1
jax: 0.10.0
libtpu: 0.0.40
codegen_flags: <defaults>
</compile_context>

<pallas_src>
import jax
import jax.numpy as jnp
from jax import lax
from jax.experimental import pallas as pl
from jax.experimental.pallas import tpu as pltpu


# -----------------------------------------------------------------------------
# pure-JAX reference (mirrors the torch module; used for the correctness check)
# -----------------------------------------------------------------------------
def _lstm_cell(h, c, x, W, U, b):
    """Per-gate LSTM cell. W:(4,H,H) U:(4,E,H) b:(4,1,H); gate order f,i,o,c."""
    def gate(k):
        return (jnp.dot(h, W[k], preferred_element_type=jnp.float32)
                + jnp.dot(x, U[k], preferred_element_type=jnp.float32)
                + b[k])
    ft = jax.nn.sigmoid(gate(0))
    it = jax.nn.sigmoid(gate(1))
    ot = jax.nn.sigmoid(gate(2))
    ct_ = jnp.tanh(gate(3))
    c_new = ft * c + it * ct_
    h_new = ot * jnp.tanh(c_new)
    return h_new, c_new


def _encoder_layer_math(x, h0f, c0f, h0b, c0b, Wf, Uf, bf, Wb, Ub, bb, Wy, by):
    """x: (S, B, E_in) time-major.  Returns y:(S,B,E_out), h_last:(B,2H)."""
    S = x.shape[0]
    hf, cf = h0f, c0f
    hb, cb = h0b, c0b
    hf_all = [None] * S
    hb_all = [None] * S
    for j in range(S):
        hf, cf = _lstm_cell(hf, cf, x[j], Wf, Uf, bf)
        hf_all[j] = hf
        hb, cb = _lstm_cell(hb, cb, x[S - 1 - j], Wb, Ub, bb)
        hb_all[S - 1 - j] = hb
    ys = []
    for w in range(S):
        ht = jnp.concatenate([hf_all[w], hb_all[w]], axis=-1)          # (B, 2H)
        ys.append(jnp.dot(ht, Wy, preferred_element_type=jnp.float32) + by)
    y = jnp.stack(ys, axis=0)                                           # (S, B, E_out)
    # torch returns `ht` from the last `w` iteration of the last layer:
    # cat(fwd hidden after all steps, bwd hidden after its first step)
    h_last = jnp.concatenate([hf_all[S - 1], hb_all[S - 1]], axis=-1)   # (B, 2H)
    return y, h_last


def _decoder_math(enc_y, enc_h, tgt_emb,
                  Wsi, bsi, Wyi, byi, wa, ba,
                  Wd, Ud, bd, Wxh, bxh, Wc, bc):
    """enc_y:(B,S,D) enc_h:(B,D) tgt_emb:(B,S,D).
    Returns logits:(S,B,V) and attention weights:(S,B,S) (time-major)."""
    B, S, D = enc_y.shape
    y_proj = (jnp.dot(enc_y.reshape(B * S, D), Wyi,
                      preferred_element_type=jnp.float32) + byi).reshape(B, S, D)
    st = enc_h
    yt = tgt_emb[:, 0, :]                     # teacher forcing: tgt is provided
    logits_all, attn_all = [], []
    for i in range(S):
        s_proj = jnp.dot(st, Wsi, preferred_element_type=jnp.float32) + bsi   # (B,D)
        e = s_proj[:, None, :] + y_proj                                       # (B,S,D)
        scores = jnp.sum(e * wa[None, :, :], axis=-1) + ba                    # (B,S)
        scores = scores - jnp.max(scores, axis=-1, keepdims=True)
        expw = jnp.exp(scores)
        weights = expw / jnp.sum(expw, axis=-1, keepdims=True)                # (B,S)
        ct = jnp.sum(weights[:, :, None] * enc_y, axis=1)                     # (B,D)
        st, _ = _lstm_cell(st, ct, yt, Wd, Ud, bd)
        y_out = jnp.dot(st, Wxh, preferred_element_type=jnp.float32) + bxh    # (B,Y)
        logits = jnp.dot(y_out, Wc, preferred_element_type=jnp.float32) + bc  # (B,V)
        logits_all.append(logits)
        attn_all.append(weights)
        if i < S - 1:
            yt = tgt_emb[:, i + 1, :]         # teacher forcing
    return jnp.stack(logits_all, axis=0), jnp.stack(attn_all, axis=0)


# -----------------------------------------------------------------------------
# packed-gate LSTM cell used inside the Pallas kernels
# -----------------------------------------------------------------------------
def _packed_lstm_cell(h, c, x, wp, up, bp, H):
    """wp:(H_in,4H) up:(E,4H) bp:(1,4H); one matmul per operand, lane-sliced gates."""
    g = (jnp.dot(h, wp, preferred_element_type=jnp.float32)
         + jnp.dot(x, up, preferred_element_type=jnp.float32)
         + bp)
    ft = jax.nn.sigmoid(g[:, 0 * H:1 * H])
    it = jax.nn.sigmoid(g[:, 1 * H:2 * H])
    ot = jax.nn.sigmoid(g[:, 2 * H:3 * H])
    cb = jnp.tanh(g[:, 3 * H:4 * H])
    c_new = ft * c + it * cb
    h_new = ot * jnp.tanh(c_new)
    return h_new, c_new


# -----------------------------------------------------------------------------
# Pallas kernels (whole problem fits in VMEM; single grid point)
# -----------------------------------------------------------------------------
def _encoder_layer_kernel(x_ref, h0f_ref, c0f_ref, h0b_ref, c0b_ref,
                          wfp_ref, ufp_ref, bfp_ref,
                          wbp_ref, ubp_ref, bbp_ref,
                          wyf_ref, wyb_ref, by_ref,
                          y_ref, hlast_ref,
                          hf_all, hb_all):
    S, B, _ = x_ref.shape
    H = h0f_ref.shape[1]
    E_out = wyf_ref.shape[1]
    wfp = wfp_ref[...]; ufp = ufp_ref[...]; bfp = bfp_ref[...]
    wbp = wbp_ref[...]; ubp = ubp_ref[...]; bbp = bbp_ref[...]

    def body(j, carry):
        hf, cf, hb, cb = carry
        hf, cf = _packed_lstm_cell(hf, cf, x_ref[j], wfp, ufp, bfp, H)
        hb, cb = _packed_lstm_cell(hb, cb, x_ref[S - 1 - j], wbp, ubp, bbp, H)
        hf_all[j] = hf                   # per-step scratch stores bound liveness
        hb_all[S - 1 - j] = hb
        return hf, cf, hb, cb

    hf_fin, _, _, _ = lax.fori_loop(
        0, S, body,
        (h0f_ref[...], c0f_ref[...], h0b_ref[...], c0b_ref[...]),
        unroll=True)

    # y-projection batched over time: two matmuls total, no per-step concat.
    hf_flat = hf_all[...].reshape(S * B, H)
    hb_flat = hb_all[...].reshape(S * B, H)
    y = (jnp.dot(hf_flat, wyf_ref[...], preferred_element_type=jnp.float32)
         + jnp.dot(hb_flat, wyb_ref[...], preferred_element_type=jnp.float32)
         + by_ref[...])
    y_ref[...] = y.reshape(S, B, E_out)
    # torch: cat(fwd hidden after all steps, bwd hidden after its first step)
    hlast_ref[...] = jnp.concatenate([hf_fin, hb_all[S - 1]], axis=-1)


def _decoder_kernel(enc_y_ref, enc_h_ref, tgt_emb_ref,
                    wyi_f_ref, score_b_ref, w_fused_ref,
                    wdp_ref, udp_ref, bdp_ref,
                    wxh_ref, bxh_ref, wcp_ref, bcp_ref,
                    probs_ref, attn_ref,
                    st_all):
    B, S, D = enc_y_ref.shape
    enc_y = enc_y_ref[...]

    # Loop-invariant attention term, computed ONCE:
    #   sum((st@Wsi+bsi + enc_y@Wyi+byi)*wa, -1) + ba
    #     = st·(Wsi@wa^T)  +  enc_y·(Wyi@wa^T)  +  (bsi·wa + byi·wa + ba)
    y_scores = jnp.sum(enc_y * wyi_f_ref[...][None, :, :], axis=-1)      # (B,S)
    score_const = y_scores + score_b_ref[...]                            # (B,S)

    wdp = wdp_ref[...]; udp = udp_ref[...]; bdp = bdp_ref[...]
    w_fused = w_fused_ref[...]                                           # (1,D)

    def body(i, st):
        # attention: per-step work is one (B,) score + softmax + context
        s_sc = jnp.sum(st * w_fused, axis=-1, keepdims=True)             # (B,1)
        scores = s_sc + score_const                                      # (B,S)
        scores = scores - jnp.max(scores, axis=-1, keepdims=True)
        expw = jnp.exp(scores)
        inv = pl.reciprocal(jnp.sum(expw, axis=-1, keepdims=True), approx=True)
        weights = expw * inv                                             # (B,S)
        ct = jnp.sum(weights[:, :, None] * enc_y, axis=1)                # (B,D)
        yt = tgt_emb_ref[i]                                              # (B,D) teacher forcing
        st_new, _ = _packed_lstm_cell(st, ct, yt, wdp, udp, bdp, D)
        st_all[i] = st_new
        attn_ref[i] = weights
        return st_new

    lax.fori_loop(0, S, body, enc_h_ref[...], unroll=True)

    # hoisted output head + vocab classifier: two batched matmuls over S*B rows,
    # written to a lane-dense (S*B, Vpad) slab.
    st_flat = st_all[...].reshape(S * B, D)
    y_out = (jnp.dot(st_flat, wxh_ref[...], preferred_element_type=jnp.float32)
             + bxh_ref[...])
    logits = (jnp.dot(y_out, wcp_ref[...], preferred_element_type=jnp.float32)
              + bcp_ref[...])
    probs_ref[...] = logits


def _vmem_spec():
    return pl.BlockSpec(memory_space=pltpu.MemorySpace.VMEM)


# -----------------------------------------------------------------------------
# weight packing (plain JAX; constant-folded under jit)
# -----------------------------------------------------------------------------
def _pack_gates(w, u, b):
    """w:(4,Hin,H) u:(4,E,H) b:(4,1,H) -> (Hin,4H),(E,4H),(1,4H); order f,i,o,c."""
    H = w.shape[2]
    wp = jnp.transpose(w, (1, 0, 2)).reshape(w.shape[1], 4 * H)
    up = jnp.transpose(u, (1, 0, 2)).reshape(u.shape[1], 4 * H)
    bp = jnp.transpose(b, (1, 0, 2)).reshape(1, 4 * H)
    return wp, up, bp


def _pack_encoder_layer(layer):
    H = layer['h0f'].shape[1]
    wfp, ufp, bfp = _pack_gates(layer['wf'], layer['uf'], layer['bf'])
    wbp, ubp, bbp = _pack_gates(layer['wb'], layer['ub'], layer['bb'])
    return dict(wfp=wfp, ufp=ufp, bfp=bfp, wbp=wbp, ubp=ubp, bbp=bbp,
                wyf=layer['wy'][:H], wyb=layer['wy'][H:], by=layer['by'],
                h0f=layer['h0f'], c0f=layer['c0f'],
                h0b=layer['h0b'], c0b=layer['c0b'])


def _pack_decoder(dec, lane=128):
    wdp, udp, bdp = _pack_gates(dec['wd'], dec['ud'], dec['bd'])
    wa_t = dec['wa'].T                                           # (D,1)
    w_fused = jnp.dot(dec['wsi'], wa_t).reshape(1, -1)           # (1,D)
    wyi_f = jnp.dot(dec['wyi'], wa_t).reshape(1, -1)             # (1,D)
    score_b = (jnp.dot(dec['bsi'], wa_t) + jnp.dot(dec['byi'], wa_t)
               + dec['ba'])                                      # (1,1)
    V = dec['wc'].shape[1]
    Vp = max(lane, ((V + lane - 1) // lane) * lane)
    wcp = jnp.zeros((dec['wc'].shape[0], Vp), jnp.float32).at[:, :V].set(dec['wc'])
    bcp = jnp.zeros((1, Vp), jnp.float32).at[:, :V].set(dec['bc'])
    return dict(wdp=wdp, udp=udp, bdp=bdp,
                w_fused=w_fused, wyi_f=wyi_f, score_b=score_b,
                wxh=dec['wxh'], bxh=dec['bxh'], wcp=wcp, bcp=bcp, V=V, Vp=Vp)


# -----------------------------------------------------------------------------
# pallas_call wrappers
# -----------------------------------------------------------------------------
def encoder_layer_pallas(x, packed):
    S, B, _ = x.shape
    H = packed['h0f'].shape[1]
    E_out = packed['wyf'].shape[1]
    args = (x, packed['h0f'], packed['c0f'], packed['h0b'], packed['c0b'],
            packed['wfp'], packed['ufp'], packed['bfp'],
            packed['wbp'], packed['ubp'], packed['bbp'],
            packed['wyf'], packed['wyb'], packed['by'])
    return pl.pallas_call(
        _encoder_layer_kernel,
        out_shape=(jax.ShapeDtypeStruct((S, B, E_out), jnp.float32),
                   jax.ShapeDtypeStruct((B, 2 * H), jnp.float32)),
        in_specs=[_vmem_spec() for _ in args],
        out_specs=(_vmem_spec(), _vmem_spec()),
        scratch_shapes=[pltpu.VMEM((S, B, H), jnp.float32),
                        pltpu.VMEM((S, B, H), jnp.float32)],
    )(*args)


def decoder_pallas(enc_y, enc_h, tgt_emb_t, packed):
    B, S, D = enc_y.shape
    Vp = packed['Vp']
    args = (enc_y, enc_h, tgt_emb_t,
            packed['wyi_f'], packed['score_b'], packed['w_fused'],
            packed['wdp'], packed['udp'], packed['bdp'],
            packed['wxh'], packed['bxh'], packed['wcp'], packed['bcp'])
    return pl.pallas_call(
        _decoder_kernel,
        out_shape=(jax.ShapeDtypeStruct((S * B, Vp), jnp.float32),
                   jax.ShapeDtypeStruct((S, B, S), jnp.float32)),
        in_specs=[_vmem_spec() for _ in args],
        out_specs=(_vmem_spec(), _vmem_spec()),
        scratch_shapes=[pltpu.VMEM((S, B, D), jnp.float32)],
    )(*args)


# -----------------------------------------------------------------------------
# full model wrapper (embedding gathers / transposes are plain-JAX glue)
# -----------------------------------------------------------------------------
def seq2seq_forward(src, tgt, params, *, use_pallas=True):
    enc, dec = params['encoder'], params['decoder']
    src_emb = enc['embed'][src]                      # (B, S, E)  - gather glue
    x = jnp.transpose(src_emb, (1, 0, 2))            # (S, B, E)  time-major
    h_last = None
    for layer in enc['layers']:
        if use_pallas:
            x, h_last = encoder_layer_pallas(x, _pack_encoder_layer(layer))
        else:
            x, h_last = _encoder_layer_math(
                x, layer['h0f'], layer['c0f'], layer['h0b'], layer['c0b'],
                layer['wf'], layer['uf'], layer['bf'],
                layer['wb'], layer['ub'], layer['bb'],
                layer['wy'], layer['by'])
    enc_y = jnp.transpose(x, (1, 0, 2))              # (B, S, D)
    tgt_emb = dec['embed'][tgt]                      # (B, S, E == D)
    B, S, _ = enc_y.shape
    V = dec['wc'].shape[1]
    if use_pallas:
        packed = _pack_decoder(dec)
        tgt_emb_t = jnp.transpose(tgt_emb, (1, 0, 2))     # (S, B, D)
        probs_flat, attn_t = decoder_pallas(enc_y, h_last, tgt_emb_t, packed)
        probs = jnp.transpose(
            probs_flat.reshape(S, B, packed['Vp'])[:, :, :V], (1, 0, 2))
        attn = jnp.transpose(attn_t, (1, 0, 2))
    else:
        probs_t, attn_t = _decoder_math(
            enc_y, h_last, tgt_emb,
            dec['wsi'], dec['bsi'], dec['wyi'], dec['byi'], dec['wa'], dec['ba'],
            dec['wd'], dec['ud'], dec['bd'], dec['wxh'], dec['bxh'],
            dec['wc'], dec['bc'])
        probs = jnp.transpose(probs_t, (1, 0, 2))
        attn = jnp.transpose(attn_t, (1, 0, 2))
    # TODO(synk): tgt=None greedy path (argmax + in-loop embedding gather) is not
    # implemented; this kernel covers the teacher-forcing forward.
    return probs, attn


# -----------------------------------------------------------------------------
# deterministic parameter construction (synthetic; no checkpoint load)
# -----------------------------------------------------------------------------
def make_params(key, cfg, batch_size):
    h_dims = list(cfg['model']['encoder_h_dim'])
    x_dims = list(cfg['model']['encoder_x_dim']) + [2 * h_dims[-1]]
    embed_dim = cfg['model']['embed_dim']
    num_src = cfg['dataset']['num_src_vocab']
    num_tgt = cfg['dataset']['num_tgt_vocab']
    dec_y_dim = cfg['model']['decoder_y_dim']
    s_dim = 2 * h_dims[-1]

    keys = iter(jax.random.split(key, 256))
    nrm = lambda shape, s=0.1: jax.random.normal(next(keys), shape, jnp.float32) * s

    def kaiming(shape):  # deterministic stand-in for torch's per-forward
        fan_in = shape[1]  # kaiming_uniform_ hidden-state init
        bound = (6.0 / fan_in) ** 0.5
        return jax.random.uniform(next(keys), shape, jnp.float32, -bound, bound)

    enc_layers = []
    for i in range(cfg['model']['num_layers']):
        H, E_in, E_out = h_dims[i], x_dims[i], x_dims[i + 1]
        enc_layers.append(dict(
            wf=nrm((4, H, H)), uf=nrm((4, E_in, H)), bf=nrm((4, 1, H)),
            wb=nrm((4, H, H)), ub=nrm((4, E_in, H)), bb=nrm((4, 1, H)),
            wy=nrm((2 * H, E_out)), by=nrm((1, E_out)),
            h0f=kaiming((batch_size, H)), c0f=kaiming((batch_size, H)),
            h0b=kaiming((batch_size, H)), c0b=kaiming((batch_size, H)),
        ))
    encoder = dict(embed=nrm((num_src, embed_dim), 0.3), layers=enc_layers)

    decoder = dict(
        embed=nrm((num_tgt, embed_dim), 0.3),
        wsi=nrm((s_dim, s_dim)), bsi=nrm((1, s_dim)),
        wyi=nrm((s_dim, s_dim)), byi=nrm((1, s_dim)),
        wa=nrm((1, s_dim)), ba=nrm((1, 1)),
        wd=nrm((4, s_dim, s_dim)), ud=nrm((4, s_dim, s_dim)), bd=nrm((4, 1, s_dim)),
        wxh=nrm((s_dim, dec_y_dim)), bxh=nrm((1, dec_y_dim)),
        wc=nrm((dec_y_dim, num_tgt)), bc=nrm((1, num_tgt)),
    )
    return dict(encoder=encoder, decoder=decoder)


if __name__ == "__main__":
    # NOTE: the torch model implicitly requires embed_dim == 2*encoder_h_dim[-1]
    # (decoder LSTM input dim) and encoder_x_dim[0] == embed_dim.
    cfg = {
        'dataset': {'seq_len': 8, 'num_src_vocab': 50, 'num_tgt_vocab': 40},
        'model': {'num_layers': 1, 'encoder_h_dim': [16], 'encoder_x_dim': [32],
                  'embed_dim': 32, 'decoder_y_dim': 24},
    }
    B, S = 2, cfg['dataset']['seq_len']
    key = jax.random.PRNGKey(0)
    kp, ks, kt = jax.random.split(key, 3)
    params = make_params(kp, cfg, B)
    src = jax.random.randint(ks, (B, S), 0, cfg['dataset']['num_src_vocab'])
    tgt = jax.random.randint(kt, (B, S), 0, cfg['dataset']['num_tgt_vocab'])

    run_pallas = jax.jit(lambda s, t: seq2seq_forward(s, t, params, use_pallas=True))
    run_ref = jax.jit(lambda s, t: seq2seq_forward(s, t, params, use_pallas=False))

    probs, attn = jax.block_until_ready(run_pallas(src, tgt))
    probs_ref, attn_ref = jax.block_until_ready(run_ref(src, tgt))

    assert probs.shape == (B, S, cfg['dataset']['num_tgt_vocab'])
    assert attn.shape == (B, S, S)
    assert bool(jnp.all(jnp.isfinite(probs))) and bool(jnp.all(jnp.isfinite(attn)))
    assert bool(jnp.allclose(probs, probs_ref, atol=2e-2, rtol=2e-2))
    assert bool(jnp.allclose(attn, attn_ref, atol=2e-2, rtol=2e-2))
    print("KERNEL_OK")
</pallas_src>

<mosaic_0001>
module attributes {stable_mosaic.version = 11 : i64} {
  func.func @_encoder_layer_kernel(%arg0: memref<8x2x32xf32, #tpu.memory_space<vmem>>, %arg1: memref<2x16xf32, #tpu.memory_space<vmem>>, %arg2: memref<2x16xf32, #tpu.memory_space<vmem>>, %arg3: memref<2x16xf32, #tpu.memory_space<vmem>>, %arg4: memref<2x16xf32, #tpu.memory_space<vmem>>, %arg5: memref<16x64xf32, #tpu.memory_space<vmem>>, %arg6: memref<32x64xf32, #tpu.memory_space<vmem>>, %arg7: memref<1x64xf32, #tpu.memory_space<vmem>>, %arg8: memref<16x64xf32, #tpu.memory_space<vmem>>, %arg9: memref<32x64xf32, #tpu.memory_space<vmem>>, %arg10: memref<1x64xf32, #tpu.memory_space<vmem>>, %arg11: memref<16x32xf32, #tpu.memory_space<vmem>>, %arg12: memref<16x32xf32, #tpu.memory_space<vmem>>, %arg13: memref<1x32xf32, #tpu.memory_space<vmem>>, %arg14: memref<8x2x32xf32, #tpu.memory_space<vmem>>, %arg15: memref<2x32xf32, #tpu.memory_space<vmem>>, %arg16: memref<8x2x16xf32, #tpu.memory_space<vmem>>, %arg17: memref<8x2x16xf32, #tpu.memory_space<vmem>>) attributes {dimension_semantics = [], scalar_prefetch = 0 : i64, scratch_operands = 2 : i64, tpu.core_type = #tpu.core_type<tc>} {
    %c0 = arith.constant 0 : index
    %c0_0 = arith.constant 0 : index
    %0 = vector.load %arg5[%c0, %c0_0] : memref<16x64xf32, #tpu.memory_space<vmem>>, vector<16x64xf32>
    %c0_1 = arith.constant 0 : index
    %c0_2 = arith.constant 0 : index
    %1 = vector.load %arg6[%c0_1, %c0_2] : memref<32x64xf32, #tpu.memory_space<vmem>>, vector<32x64xf32>
    %c0_3 = arith.constant 0 : index
    %c0_4 = arith.constant 0 : index
    %2 = vector.load %arg7[%c0_3, %c0_4] : memref<1x64xf32, #tpu.memory_space<vmem>>, vector<1x64xf32>
    %c0_5 = arith.constant 0 : index
    %c0_6 = arith.constant 0 : index
    %3 = vector.load %arg8[%c0_5, %c0_6] : memref<16x64xf32, #tpu.memory_space<vmem>>, vector<16x64xf32>
    %c0_7 = arith.constant 0 : index
    %c0_8 = arith.constant 0 : index
    %4 = vector.load %arg9[%c0_7, %c0_8] : memref<32x64xf32, #tpu.memory_space<vmem>>, vector<32x64xf32>
    %c0_9 = arith.constant 0 : index
    %c0_10 = arith.constant 0 : index
    %5 = vector.load %arg10[%c0_9, %c0_10] : memref<1x64xf32, #tpu.memory_space<vmem>>, vector<1x64xf32>
    %c0_11 = arith.constant 0 : index
    %c0_12 = arith.constant 0 : index
    %6 = vector.load %arg1[%c0_11, %c0_12] : memref<2x16xf32, #tpu.memory_space<vmem>>, vector<2x16xf32>
    %c0_13 = arith.constant 0 : index
    %c0_14 = arith.constant 0 : index
    %7 = vector.load %arg2[%c0_13, %c0_14] : memref<2x16xf32, #tpu.memory_space<vmem>>, vector<2x16xf32>
    %c0_15 = arith.constant 0 : index
    %c0_16 = arith.constant 0 : index
    %8 = vector.load %arg3[%c0_15, %c0_16] : memref<2x16xf32, #tpu.memory_space<vmem>>, vector<2x16xf32>
    %c0_17 = arith.constant 0 : index
    %c0_18 = arith.constant 0 : index
    %9 = vector.load %arg4[%c0_17, %c0_18] : memref<2x16xf32, #tpu.memory_space<vmem>>, vector<2x16xf32>
    %c0_i32 = arith.constant 0 : i32
    %10 = arith.index_cast %c0_i32 : i32 to index
    %c0_19 = arith.constant 0 : index
    %c0_20 = arith.constant 0 : index
    %11 = vector.load %arg0[%10, %c0_19, %c0_20] : memref<8x2x32xf32, #tpu.memory_space<vmem>>, vector<1x2x32xf32>
    %12 = vector.shape_cast %11 : vector<1x2x32xf32> to vector<2x32xf32>
    %cst = arith.constant dense<0.000000e+00> : vector<2x64xf32>
    %13 = tpu.matmul %6, %0, %cst {dimension_numbers = #tpu.dot_dimension_numbers<[1], [0], [0], [1], [0, 0, 1, 1], [], []>} : vector<2x16xf32>, vector<16x64xf32>, vector<2x64xf32> -> vector<2x64xf32>
    %cst_21 = arith.constant dense<0.000000e+00> : vector<2x64xf32>
    %14 = tpu.matmul %12, %1, %cst_21 {dimension_numbers = #tpu.dot_dimension_numbers<[1], [0], [0], [1], [0, 0, 1, 1], [], []>} : vector<2x32xf32>, vector<32x64xf32>, vector<2x64xf32> -> vector<2x64xf32>
    %15 = arith.addf %13, %14 : vector<2x64xf32>
    %16 = vector.broadcast %2 : vector<1x64xf32> to vector<2x64xf32>
    %17 = arith.addf %15, %16 : vector<2x64xf32>
    %18 = vector.extract_strided_slice %17 {offsets = [0, 0], sizes = [2, 16], strides = [1, 1]} : vector<2x64xf32> to vector<2x16xf32>
    %19 = arith.negf %18 : vector<2x16xf32>
    %20 = math.exp %19 : vector<2x16xf32>
    %cst_22 = arith.constant 1.000000e+00 : f32
    %21 = vector.broadcast %cst_22 : f32 to vector<2x16xf32>
    %22 = arith.addf %21, %20 : vector<2x16xf32>
    %23 = arith.divf %21, %22 : vector<2x16xf32>
    %24 = vector.extract_strided_slice %17 {offsets = [0, 16], sizes = [2, 16], strides = [1, 1]} : vector<2x64xf32> to vector<2x16xf32>
    %25 = arith.negf %24 : vector<2x16xf32>
    %26 = math.exp %25 : vector<2x16xf32>
    %cst_23 = arith.constant 1.000000e+00 : f32
    %27 = vector.broadcast %cst_23 : f32 to vector<2x16xf32>
    %28 = arith.addf %27, %26 : vector<2x16xf32>
    %29 = arith.divf %27, %28 : vector<2x16xf32>
    %30 = vector.extract_strided_slice %17 {offsets = [0, 32], sizes = [2, 16], strides = [1, 1]} : vector<2x64xf32> to vector<2x16xf32>
    %31 = arith.negf %30 : vector<2x16xf32>
    %32 = math.exp %31 : vector<2x16xf32>
    %cst_24 = arith.constant 1.000000e+00 : f32
    %33 = vector.broadcast %cst_24 : f32 to vector<2x16xf32>
    %34 = arith.addf %33, %32 : vector<2x16xf32>
    %35 = arith.divf %33, %34 : vector<2x16xf32>
    %36 = vector.extract_strided_slice %17 {offsets = [0, 48], sizes = [2, 16], strides = [1, 1]} : vector<2x64xf32> to vector<2x16xf32>
    %37 = math.tanh %36 : vector<2x16xf32>
    %38 = arith.mulf %23, %7 : vector<2x16xf32>
    %39 = arith.mulf %29, %37 : vector<2x16xf32>
    %40 = arith.addf %38, %39 : vector<2x16xf32>
    %41 = math.tanh %40 : vector<2x16xf32>
    %42 = arith.mulf %35, %41 : vector<2x16xf32>
    %c7_i32 = arith.constant 7 : i32
    %43 = arith.subi %c7_i32, %c0_i32 : i32
    %44 = arith.index_cast %43 : i32 to index
    %c0_25 = arith.constant 0 : index
    %c0_26 = arith.constant 0 : index
    %45 = vector.load %arg0[%44, %c0_25, %c0_26] : memref<8x2x32xf32, #tpu.memory_space<vmem>>, vector<1x2x32xf32>
    %46 = vector.shape_cast %45 : vector<1x2x32xf32> to vector<2x32xf32>
    %cst_27 = arith.constant dense<0.000000e+00> : vector<2x64xf32>
    %47 = tpu.matmul %8, %3, %cst_27 {dimension_numbers = #tpu.dot_dimension_numbers<[1], [0], [0], [1], [0, 0, 1, 1], [], []>} : vector<2x16xf32>, vector<16x64xf32>, vector<2x64xf32> -> vector<2x64xf32>
    %cst_28 = arith.constant dense<0.000000e+00> : vector<2x64xf32>
    %48 = tpu.matmul %46, %4, %cst_28 {dimension_numbers = #tpu.dot_dimension_numbers<[1], [0], [0], [1], [0, 0, 1, 1], [], []>} : vector<2x32xf32>, vector<32x64xf32>, vector<2x64xf32> -> vector<2x64xf32>
    %49 = arith.addf %47, %48 : vector<2x64xf32>
    %50 = vector.broadcast %5 : vector<1x64xf32> to vector<2x64xf32>
    %51 = arith.addf %49, %50 : vector<2x64xf32>
    %52 = vector.extract_strided_slice %51 {offsets = [0, 0], sizes = [2, 16], strides = [1, 1]} : vector<2x64xf32> to vector<2x16xf32>
    %53 = arith.negf %52 : vector<2x16xf32>
    %54 = math.exp %53 : vector<2x16xf32>
    %cst_29 = arith.constant 1.000000e+00 : f32
    %55 = vector.broadcast %cst_29 : f32 to vector<2x16xf32>
    %56 = arith.addf %55, %54 : vector<2x16xf32>
    %57 = arith.divf %55, %56 : vector<2x16xf32>
    %58 = vector.extract_strided_slice %51 {offsets = [0, 16], sizes = [2, 16], strides = [1, 1]} : vector<2x64xf32> to vector<2x16xf32>
    %59 = arith.negf %58 : vector<2x16xf32>
    %60 = math.exp %59 : vector<2x16xf32>
    %cst_30 = arith.constant 1.000000e+00 : f32
    %61 = vector.broadcast %cst_30 : f32 to vector<2x16xf32>
    %62 = arith.addf %61, %60 : vector<2x16xf32>
    %63 = arith.divf %61, %62 : vector<2x16xf32>
    %64 = vector.extract_strided_slice %51 {offsets = [0, 32], sizes = [2, 16], strides = [1, 1]} : vector<2x64xf32> to vector<2x16xf32>
    %65 = arith.negf %64 : vector<2x16xf32>
    %66 = math.exp %65 : vector<2x16xf32>
    %cst_31 = arith.constant 1.000000e+00 : f32
    %67 = vector.broadcast %cst_31 : f32 to vector<2x16xf32>
    %68 = arith.addf %67, %66 : vector<2x16xf32>
    %69 = arith.divf %67, %68 : vector<2x16xf32>
    %70 = vector.extract_strided_slice %51 {offsets = [0, 48], sizes = [2, 16], strides = [1, 1]} : vector<2x64xf32> to vector<2x16xf32>
    %71 = math.tanh %70 : vector<2x16xf32>
    %72 = arith.mulf %57, %9 : vector<2x16xf32>
    %73 = arith.mulf %63, %71 : vector<2x16xf32>
    %74 = arith.addf %72, %73 : vector<2x16xf32>
    %75 = math.tanh %74 : vector<2x16xf32>
    %76 = arith.mulf %69, %75 : vector<2x16xf32>
    %77 = arith.index_cast %c0_i32 : i32 to index
    %c0_32 = arith.constant 0 : index
    %c0_33 = arith.constant 0 : index
    %78 = vector.load %arg16[%77, %c0_32, %c0_33] : memref<8x2x16xf32, #tpu.memory_space<vmem>>, vector<1x2x16xf32>
    %79 = vector.shape_cast %78 : vector<1x2x16xf32> to vector<2x16xf32>
    %80 = vector.shape_cast %42 : vector<2x16xf32> to vector<1x2x16xf32>
    tpu.vector_store %arg16[%77, %c0_32, %c0_33], %80 {strides = array<i32>} : memref<8x2x16xf32, #tpu.memory_space<vmem>>, vector<1x2x16xf32>,
    %c7_i32_34 = arith.constant 7 : i32
    %81 = arith.subi %c7_i32_34, %c0_i32 : i32
    %82 = arith.index_cast %81 : i32 to index
    %c0_35 = arith.constant 0 : index
    %c0_36 = arith.constant 0 : index
    %83 = vector.load %arg17[%82, %c0_35, %c0_36] : memref<8x2x16xf32, #tpu.memory_space<vmem>>, vector<1x2x16xf32>
    %84 = vector.shape_cast %83 : vector<1x2x16xf32> to vector<2x16xf32>
    %85 = vector.shape_cast %76 : vector<2x16xf32> to vector<1x2x16xf32>
    tpu.vector_store %arg17[%82, %c0_35, %c0_36], %85 {strides = array<i32>} : memref<8x2x16xf32, #tpu.memory_space<vmem>>, vector<1x2x16xf32>,
    %c1_i32 = arith.constant 1 : i32
    %86 = arith.index_cast %c1_i32 : i32 to index
    %c0_37 = arith.constant 0 : index
    %c0_38 = arith.constant 0 : index
    %87 = vector.load %arg0[%86, %c0_37, %c0_38] : memref<8x2x32xf32, #tpu.memory_space<vmem>>, vector<1x2x32xf32>
    %88 = vector.shape_cast %87 : vector<1x2x32xf32> to vector<2x32xf32>
    %cst_39 = arith.constant dense<0.000000e+00> : vector<2x64xf32>
    %89 = tpu.matmul %42, %0, %cst_39 {dimension_numbers = #tpu.dot_dimension_numbers<[1], [0], [0], [1], [0, 0, 1, 1], [], []>} : vector<2x16xf32>, vector<16x64xf32>, vector<2x64xf32> -> vector<2x64xf32>
    %cst_40 = arith.constant dense<0.000000e+00> : vector<2x64xf32>
    %90 = tpu.matmul %88, %1, %cst_40 {dimension_numbers = #tpu.dot_dimension_numbers<[1], [0], [0], [1], [0, 0, 1, 1], [], []>} : vector<2x32xf32>, vector<32x64xf32>, vector<2x64xf32> -> vector<2x64xf32>
    %91 = arith.addf %89, %90 : vector<2x64xf32>
    %92 = vector.broadcast %2 : vector<1x64xf32> to vector<2x64xf32>
    %93 = arith.addf %91, %92 : vector<2x64xf32>
    %94 = vector.extract_strided_slice %93 {offsets = [0, 0], sizes = [2, 16], strides = [1, 1]} : vector<2x64xf32> to vector<2x16xf32>
    %95 = arith.negf %94 : vector<2x16xf32>
    %96 = math.exp %95 : vector<2x16xf32>
    %cst_41 = arith.constant 1.000000e+00 : f32
    %97 = vector.broadcast %cst_41 : f32 to vector<2x16xf32>
    %98 = arith.addf %97, %96 : vector<2x16xf32>
    %99 = arith.divf %97, %98 : vector<2x16xf32>
    %100 = vector.extract_strided_slice %93 {offsets = [0, 16], sizes = [2, 16], strides = [1, 1]} : vector<2x64xf32> to vector<2x16xf32>
    %101 = arith.negf %100 : vector<2x16xf32>
    %102 = math.exp %101 : vector<2x16xf32>
    %cst_42 = arith.constant 1.000000e+00 : f32
    %103 = vector.broadcast %cst_42 : f32 to vector<2x16xf32>
    %104 = arith.addf %103, %102 : vector<2x16xf32>
    %105 = arith.divf %103, %104 : vector<2x16xf32>
    %106 = vector.extract_strided_slice %93 {offsets = [0, 32], sizes = [2, 16], strides = [1, 1]} : vector<2x64xf32> to vector<2x16xf32>
    %107 = arith.negf %106 : vector<2x16xf32>
    %108 = math.exp %107 : vector<2x16xf32>
    %cst_43 = arith.constant 1.000000e+00 : f32
    %109 = vector.broadcast %cst_43 : f32 to vector<2x16xf32>
    %110 = arith.addf %109, %108 : vector<2x16xf32>
    %111 = arith.divf %109, %110 : vector<2x16xf32>
    %112 = vector.extract_strided_slice %93 {offsets = [0, 48], sizes = [2, 16], strides = [1, 1]} : vector<2x64xf32> to vector<2x16xf32>
    %113 = math.tanh %112 : vector<2x16xf32>
    %114 = arith.mulf %99, %40 : vector<2x16xf32>
    %115 = arith.mulf %105, %113 : vector<2x16xf32>
    %116 = arith.addf %114, %115 : vector<2x16xf32>
    %117 = math.tanh %116 : vector<2x16xf32>
    %118 = arith.mulf %111, %117 : vector<2x16xf32>
    %c7_i32_44 = arith.constant 7 : i32
    %119 = arith.subi %c7_i32_44, %c1_i32 : i32
    %120 = arith.index_cast %119 : i32 to index
    %c0_45 = arith.constant 0 : index
    %c0_46 = arith.constant 0 : index
    %121 = vector.load %arg0[%120, %c0_45, %c0_46] : memref<8x2x32xf32, #tpu.memory_space<vmem>>, vector<1x2x32xf32>
    %122 = vector.shape_cast %121 : vector<1x2x32xf32> to vector<2x32xf32>
    %cst_47 = arith.constant dense<0.000000e+00> : vector<2x64xf32>
    %123 = tpu.matmul %76, %3, %cst_47 {dimension_numbers = #tpu.dot_dimension_numbers<[1], [0], [0], [1], [0, 0, 1, 1], [], []>} : vector<2x16xf32>, vector<16x64xf32>, vector<2x64xf32> -> vector<2x64xf32>
    %cst_48 = arith.constant dense<0.000000e+00> : vector<2x64xf32>
    %124 = tpu.matmul %122, %4, %cst_48 {dimension_numbers = #tpu.dot_dimension_numbers<[1], [0], [0], [1], [0, 0, 1, 1], [], []>} : vector<2x32xf32>, vector<32x64xf32>, vector<2x64xf32> -> vector<2x64xf32>
    %125 = arith.addf %123, %124 : vector<2x64xf32>
    %126 = vector.broadcast %5 : vector<1x64xf32> to vector<2x64xf32>
    %127 = arith.addf %125, %126 : vector<2x64xf32>
    %128 = vector.extract_strided_slice %127 {offsets = [0, 0], sizes = [2, 16], strides = [1, 1]} : vector<2x64xf32> to vector<2x16xf32>
    %129 = arith.negf %128 : vector<2x16xf32>
    %130 = math.exp %129 : vector<2x16xf32>
    %cst_49 = arith.constant 1.000000e+00 : f32
    %131 = vector.broadcast %cst_49 : f32 to vector<2x16xf32>
    %132 = arith.addf %131, %130 : vector<2x16xf32>
    %133 = arith.divf %131, %132 : vector<2x16xf32>
    %134 = vector.extract_strided_slice %127 {offsets = [0, 16], sizes = [2, 16], strides = [1, 1]} : vector<2x64xf32> to vector<2x16xf32>
    %135 = arith.negf %134 : vector<2x16xf32>
    %136 = math.exp %135 : vector<2x16xf32>
    %cst_50 = arith.constant 1.000000e+00 : f32
    %137 = vector.broadcast %cst_50 : f32 to vector<2x16xf32>
    %138 = arith.addf %137, %136 : vector<2x16xf32>
    %139 = arith.divf %137, %138 : vector<2x16xf32>
    %140 = vector.extract_strided_slice %127 {offsets = [0, 32], sizes = [2, 16], strides = [1, 1]} : vector<2x64xf32> to vector<2x16xf32>
    %141 = arith.negf %140 : vector<2x16xf32>
    %142 = math.exp %141 : vector<2x16xf32>
    %cst_51 = arith.constant 1.000000e+00 : f32
    %143 = vector.broadcast %cst_51 : f32 to vector<2x16xf32>
    %144 = arith.addf %143, %142 : vector<2x16xf32>
    %145 = arith.divf %143, %144 : vector<2x16xf32>
    %146 = vector.extract_strided_slice %127 {offsets = [0, 48], sizes = [2, 16], strides = [1, 1]} : vector<2x64xf32> to vector<2x16xf32>
    %147 = math.tanh %146 : vector<2x16xf32>
    %148 = arith.mulf %133, %74 : vector<2x16xf32>
    %149 = arith.mulf %139, %147 : vector<2x16xf32>
    %150 = arith.addf %148, %149 : vector<2x16xf32>
    %151 = math.tanh %150 : vector<2x16xf32>
    %152 = arith.mulf %145, %151 : vector<2x16xf32>
    %153 = arith.index_cast %c1_i32 : i32 to index
    %c0_52 = arith.constant 0 : index
    %c0_53 = arith.constant 0 : index
    %154 = vector.load %arg16[%153, %c0_52, %c0_53] : memref<8x2x16xf32, #tpu.memory_space<vmem>>, vector<1x2x16xf32>
    %155 = vector.shape_cast %154 : vector<1x2x16xf32> to vector<2x16xf32>
    %156 = vector.shape_cast %118 : vector<2x16xf32> to vector<1x2x16xf32>
    tpu.vector_store %arg16[%153, %c0_52, %c0_53], %156 {strides = array<i32>} : memref<8x2x16xf32, #tpu.memory_space<vmem>>, vector<1x2x16xf32>,
    %c7_i32_54 = arith.constant 7 : i32
    %157 = arith.subi %c7_i32_54, %c1_i32 : i32
    %158 = arith.index_cast %157 : i32 to index
    %c0_55 = arith.constant 0 : index
    %c0_56 = arith.constant 0 : index
    %159 = vector.load %arg17[%158, %c0_55, %c0_56] : memref<8x2x16xf32, #tpu.memory_space<vmem>>, vector<1x2x16xf32>
    %160 = vector.shape_cast %159 : vector<1x2x16xf32> to vector<2x16xf32>
    %161 = vector.shape_cast %152 : vector<2x16xf32> to vector<1x2x16xf32>
    tpu.vector_store %arg17[%158, %c0_55, %c0_56], %161 {strides = array<i32>} : memref<8x2x16xf32, #tpu.memory_space<vmem>>, vector<1x2x16xf32>,
    %c2_i32 = arith.constant 2 : i32
    %162 = arith.index_cast %c2_i32 : i32 to index
    %c0_57 = arith.constant 0 : index
    %c0_58 = arith.constant 0 : index
    %163 = vector.load %arg0[%162, %c0_57, %c0_58] : memref<8x2x32xf32, #tpu.memory_space<vmem>>, vector<1x2x32xf32>
    %164 = vector.shape_cast %163 : vector<1x2x32xf32> to vector<2x32xf32>
    %cst_59 = arith.constant dense<0.000000e+00> : vector<2x64xf32>
    %165 = tpu.matmul %118, %0, %cst_59 {dimension_numbers = #tpu.dot_dimension_numbers<[1], [0], [0], [1], [0, 0, 1, 1], [], []>} : vector<2x16xf32>, vector<16x64xf32>, vector<2x64xf32> -> vector<2x64xf32>
    %cst_60 = arith.constant dense<0.000000e+00> : vector<2x64xf32>
    %166 = tpu.matmul %164, %1, %cst_60 {dimension_numbers = #tpu.dot_dimension_numbers<[1], [0], [0], [1], [0, 0, 1, 1], [], []>} : vector<2x32xf32>, vector<32x64xf32>, vector<2x64xf32> -> vector<2x64xf32>
    %167 = arith.addf %165, %166 : vector<2x64xf32>
    %168 = vector.broadcast %2 : vector<1x64xf32> to vector<2x64xf32>
    %169 = arith.addf %167, %168 : vector<2x64xf32>
    %170 = vector.extract_strided_slice %169 {offsets = [0, 0], sizes = [2, 16], strides = [1, 1]} : vector<2x64xf32> to vector<2x16xf32>
    %171 = arith.negf %170 : vector<2x16xf32>
    %172 = math.exp %171 : vector<2x16xf32>
    %cst_61 = arith.constant 1.000000e+00 : f32
    %173 = vector.broadcast %cst_61 : f32 to vector<2x16xf32>
    %174 = arith.addf %173, %172 : vector<2x16xf32>
    %175 = arith.divf %173, %174 : vector<2x16xf32>
    %176 = vector.extract_strided_slice %169 {offsets = [0, 16], sizes = [2, 16], strides = [1, 1]} : vector<2x64xf32> to vector<2x16xf32>
    %177 = arith.negf %176 : vector<2x16xf32>
    %178 = math.exp %177 : vector<2x16xf32>
    %cst_62 = arith.constant 1.000000e+00 : f32
    %179 = vector.broadcast %cst_62 : f32 to vector<2x16xf32>
    %180 = arith.addf %179, %178 : vector<2x16xf32>
    %181 = arith.divf %179, %180 : vector<2x16xf32>
    %182 = vector.extract_strided_slice %169 {offsets = [0, 32], sizes = [2, 16], strides = [1, 1]} : vector<2x64xf32> to vector<2x16xf32>
    %183 = arith.negf %182 : vector<2x16xf32>
    %184 = math.exp %183 : vector<2x16xf32>
    %cst_63 = arith.constant 1.000000e+00 : f32
    %185 = vector.broadcast %cst_63 : f32 to vector<2x16xf32>
    %186 = arith.addf %185, %184 : vector<2x16xf32>
    %187 = arith.divf %185, %186 : vector<2x16xf32>
    %188 = vector.extract_strided_slice %169 {offsets = [0, 48], sizes = [2, 16], strides = [1, 1]} : vector<2x64xf32> to vector<2x16xf32>
    %189 = math.tanh %188 : vector<2x16xf32>
    %190 = arith.mulf %175, %116 : vector<2x16xf32>
    %191 = arith.mulf %181, %189 : vector<2x16xf32>
    %192 = arith.addf %190, %191 : vector<2x16xf32>
    %193 = math.tanh %192 : vector<2x16xf32>
    %194 = arith.mulf %187, %193 : vector<2x16xf32>
    %c7_i32_64 = arith.constant 7 : i32
    %195 = arith.subi %c7_i32_64, %c2_i32 : i32
    %196 = arith.index_cast %195 : i32 to index
    %c0_65 = arith.constant 0 : index
    %c0_66 = arith.constant 0 : index
    %197 = vector.load %arg0[%196, %c0_65, %c0_66] : memref<8x2x32xf32, #tpu.memory_space<vmem>>, vector<1x2x32xf32>
    %198 = vector.shape_cast %197 : vector<1x2x32xf32> to vector<2x32xf32>
    %cst_67 = arith.constant dense<0.000000e+00> : vector<2x64xf32>
    %199 = tpu.matmul %152, %3, %cst_67 {dimension_numbers = #tpu.dot_dimension_numbers<[1], [0], [0], [1], [0, 0, 1, 1], [], []>} : vector<2x16xf32>, vector<16x64xf32>, vector<2x64xf32> -> vector<2x64xf32>
    %cst_68 = arith.constant dense<0.000000e+00> : vector<2x64xf32>
    %200 = tpu.matmul %198, %4, %cst_68 {dimension_numbers = #tpu.dot_dimension_numbers<[1], [0], [0], [1], [0, 0, 1, 1], [], []>} : vector<2x32xf32>, vector<32x64xf32>, vector<2x64xf32> -> vector<2x64xf32>
    %201 = arith.addf %199, %200 : vector<2x64xf32>
    %202 = vector.broadcast %5 : vector<1x64xf32> to vector<2x64xf32>
    %203 = arith.addf %201, %202 : vector<2x64xf32>
    %204 = vector.extract_strided_slice %203 {offsets = [0, 0], sizes = [2, 16], strides = [1, 1]} : vector<2x64xf32> to vector<2x16xf32>
    %205 = arith.negf %204 : vector<2x16xf32>
    %206 = math.exp %205 : vector<2x16xf32>
    %cst_69 = arith.constant 1.000000e+00 : f32
    %207 = vector.broadcast %cst_69 : f32 to vector<2x16xf32>
    %208 = arith.addf %207, %206 : vector<2x16xf32>
    %209 = arith.divf %207, %208 : vector<2x16xf32>
    %210 = vector.extract_strided_slice %203 {offsets = [0, 16], sizes = [2, 16], strides = [1, 1]} : vector<2x64xf32> to vector<2x16xf32>
    %211 = arith.negf %210 : vector<2x16xf32>
    %212 = math.exp %211 : vector<2x16xf32>
    %cst_70 = arith.constant 1.000000e+00 : f32
    %213 = vector.broadcast %cst_70 : f32 to vector<2x16xf32>
    %214 = arith.addf %213, %212 : vector<2x16xf32>
    %215 = arith.divf %213, %214 : vector<2x16xf32>
    %216 = vector.extract_strided_slice %203 {offsets = [0, 32], sizes = [2, 16], strides = [1, 1]} : vector<2x64xf32> to vector<2x16xf32>
    %217 = arith.negf %216 : vector<2x16xf32>
    %218 = math.exp %217 : vector<2x16xf32>
    %cst_71 = arith.constant 1.000000e+00 : f32
    %219 = vector.broadcast %cst_71 : f32 to vector<2x16xf32>
    %220 = arith.addf %219, %218 : vector<2x16xf32>
    %221 = arith.divf %219, %220 : vector<2x16xf32>
    %222 = vector.extract_strided_slice %203 {offsets = [0, 48], sizes = [2, 16], strides = [1, 1]} : vector<2x64xf32> to vector<2x16xf32>
    %223 = math.tanh %222 : vector<2x16xf32>
    %224 = arith.mulf %209, %150 : vector<2x16xf32>
    %225 = arith.mulf %215, %223 : vector<2x16xf32>
    %226 = arith.addf %224, %225 : vector<2x16xf32>
    %227 = math.tanh %226 : vector<2x16xf32>
    %228 = arith.mulf %221, %227 : vector<2x16xf32>
    %229 = arith.index_cast %c2_i32 : i32 to index
    %c0_72 = arith.constant 0 : index
    %c0_73 = arith.constant 0 : index
    %230 = vector.load %arg16[%229, %c0_72, %c0_73] : memref<8x2x16xf32, #tpu.memory_space<vmem>>, vector<1x2x16xf32>
    %231 = vector.shape_cast %230 : vector<1x2x16xf32> to vector<2x16xf32>
    %232 = vector.shape_cast %194 : vector<2x16xf32> to vector<1x2x16xf32>
    tpu.vector_store %arg16[%229, %c0_72, %c0_73], %232 {strides = array<i32>} : memref<8x2x16xf32, #tpu.memory_space<vmem>>, vector<1x2x16xf32>,
    %c7_i32_74 = arith.constant 7 : i32
    %233 = arith.subi %c7_i32_74, %c2_i32 : i32
    %234 = arith.index_cast %233 : i32 to index
    %c0_75 = arith.constant 0 : index
    %c0_76 = arith.constant 0 : index
    %235 = vector.load %arg17[%234, %c0_75, %c0_76] : memref<8x2x16xf32, #tpu.memory_space<vmem>>, vector<1x2x16xf32>
    %236 = vector.shape_cast %235 : vector<1x2x16xf32> to vector<2x16xf32>
    %237 = vector.shape_cast %228 : vector<2x16xf32> to vector<1x2x16xf32>
    tpu.vector_store %arg17[%234, %c0_75, %c0_76], %237 {strides = array<i32>} : memref<8x2x16xf32, #tpu.memory_space<vmem>>, vector<1x2x16xf32>,
    %c3_i32 = arith.constant 3 : i32
    %238 = arith.index_cast %c3_i32 : i32 to index
    %c0_77 = arith.constant 0 : index
    %c0_78 = arith.constant 0 : index
    %239 = vector.load %arg0[%238, %c0_77, %c0_78] : memref<8x2x32xf32, #tpu.memory_space<vmem>>, vector<1x2x32xf32>
    %240 = vector.shape_cast %239 : vector<1x2x32xf32> to vector<2x32xf32>
    %cst_79 = arith.constant dense<0.000000e+00> : vector<2x64xf32>
    %241 = tpu.matmul %194, %0, %cst_79 {dimension_numbers = #tpu.dot_dimension_numbers<[1], [0], [0], [1], [0, 0, 1, 1], [], []>} : vector<2x16xf32>, vector<16x64xf32>, vector<2x64xf32> -> vector<2x64xf32>
    %cst_80 = arith.constant dense<0.000000e+00> : vector<2x64xf32>
    %242 = tpu.matmul %240, %1, %cst_80 {dimension_numbers = #tpu.dot_dimension_numbers<[1], [0], [0], [1], [0, 0, 1, 1], [], []>} : vector<2x32xf32>, vector<32x64xf32>, vector<2x64xf32> -> vector<2x64xf32>
    %243 = arith.addf %241, %242 : vector<2x64xf32>
    %244 = vector.broadcast %2 : vector<1x64xf32> to vector<2x64xf32>
    %245 = arith.addf %243, %244 : vector<2x64xf32>
    %246 = vector.extract_strided_slice %245 {offsets = [0, 0], sizes = [2, 16], strides = [1, 1]} : vector<2x64xf32> to vector<2x16xf32>
    %247 = arith.negf %246 : vector<2x16xf32>
    %248 = math.exp %247 : vector<2x16xf32>
    %cst_81 = arith.constant 1.000000e+00 : f32
    %249 = vector.broadcast %cst_81 : f32 to vector<2x16xf32>
    %250 = arith.addf %249, %248 : vector<2x16xf32>
    %251 = arith.divf %249, %250 : vector<2x16xf32>
    %252 = vector.extract_strided_slice %245 {offsets = [0, 16], sizes = [2, 16], strides = [1, 1]} : vector<2x64xf32> to vector<2x16xf32>
    %253 = arith.negf %252 : vector<2x16xf32>
    %254 = math.exp %253 : vector<2x16xf32>
    %cst_82 = arith.constant 1.000000e+00 : f32
    %255 = vector.broadcast %cst_82 : f32 to vector<2x16xf32>
    %256 = arith.addf %255, %254 : vector<2x16xf32>
    %257 = arith.divf %255, %256 : vector<2x16xf32>
    %258 = vector.extract_strided_slice %245 {offsets = [0, 32], sizes = [2, 16], strides = [1, 1]} : vector<2x64xf32> to vector<2x16xf32>
    %259 = arith.negf %258 : vector<2x16xf32>
    %260 = math.exp %259 : vector<2x16xf32>
    %cst_83 = arith.constant 1.000000e+00 : f32
    %261 = vector.broadcast %cst_83 : f32 to vector<2x16xf32>
    %262 = arith.addf %261, %260 : vector<2x16xf32>
    %263 = arith.divf %261, %262 : vector<2x16xf32>
    %264 = vector.extract_strided_slice %245 {offsets = [0, 48], sizes = [2, 16], strides = [1, 1]} : vector<2x64xf32> to vector<2x16xf32>
    %265 = math.tanh %264 : vector<2x16xf32>
    %266 = arith.mulf %251, %192 : vector<2x16xf32>
    %267 = arith.mulf %257, %265 : vector<2x16xf32>
    %268 = arith.addf %266, %267 : vector<2x16xf32>
    %269 = math.tanh %268 : vector<2x16xf32>
    %270 = arith.mulf %263, %269 : vector<2x16xf32>
    %c7_i32_84 = arith.constant 7 : i32
    %271 = arith.subi %c7_i32_84, %c3_i32 : i32
    %272 = arith.index_cast %271 : i32 to index
    %c0_85 = arith.constant 0 : index
    %c0_86 = arith.constant 0 : index
    %273 = vector.load %arg0[%272, %c0_85, %c0_86] : memref<8x2x32xf32, #tpu.memory_space<vmem>>, vector<1x2x32xf32>
    %274 = vector.shape_cast %273 : vector<1x2x32xf32> to vector<2x32xf32>
    %cst_87 = arith.constant dense<0.000000e+00> : vector<2x64xf32>
    %275 = tpu.matmul %228, %3, %cst_87 {dimension_numbers = #tpu.dot_dimension_numbers<[1], [0], [0], [1], [0, 0, 1, 1], [], []>} : vector<2x16xf32>, vector<16x64xf32>, vector<2x64xf32> -> vector<2x64xf32>
    %cst_88 = arith.constant dense<0.000000e+00> : vector<2x64xf32>
    %276 = tpu.matmul %274, %4, %cst_88 {dimension_numbers = #tpu.dot_dimension_numbers<[1], [0], [0], [1], [0, 0, 1, 1], [], []>} : vector<2x32xf32>, vector<32x64xf32>, vector<2x64xf32> -> vector<2x64xf32>
    %277 = arith.addf %275, %276 : vector<2x64xf32>
    %278 = vector.broadcast %5 : vector<1x64xf32> to vector<2x64xf32>
    %279 = arith.addf %277, %278 : vector<2x64xf32>
    %280 = vector.extract_strided_slice %279 {offsets = [0, 0], sizes = [2, 16], strides = [1, 1]} : vector<2x64xf32> to vector<2x16xf32>
    %281 = arith.negf %280 : vector<2x16xf32>
    %282 = math.exp %281 : vector<2x16xf32>
    %cst_89 = arith.constant 1.000000e+00 : f32
    %283 = vector.broadcast %cst_89 : f32 to vector<2x16xf32>
    %284 = arith.addf %283, %282 : vector<2x16xf32>
    %285 = arith.divf %283, %284 : vector<2x16xf32>
    %286 = vector.extract_strided_slice %279 {offsets = [0, 16], sizes = [2, 16], strides = [1, 1]} : vector<2x64xf32> to vector<2x16xf32>
    %287 = arith.negf %286 : vector<2x16xf32>
    %288 = math.exp %287 : vector<2x16xf32>
    %cst_90 = arith.constant 1.000000e+00 : f32
    %289 = vector.broadcast %cst_90 : f32 to vector<2x16xf32>
    %290 = arith.addf %289, %288 : vector<2x16xf32>
    %291 = arith.divf %289, %290 : vector<2x16xf32>
    %292 = vector.extract_strided_slice %279 {offsets = [0, 32], sizes = [2, 16], strides = [1, 1]} : vector<2x64xf32> to vector<2x16xf32>
    %293 = arith.negf %292 : vector<2x16xf32>
    %294 = math.exp %293 : vector<2x16xf32>
    %cst_91 = arith.constant 1.000000e+00 : f32
    %295 = vector.broadcast %cst_91 : f32 to vector<2x16xf32>
    %296 = arith.addf %295, %294 : vector<2x16xf32>
    %297 = arith.divf %295, %296 : vector<2x16xf32>
    %298 = vector.extract_strided_slice %279 {offsets = [0, 48], sizes = [2, 16], strides = [1, 1]} : vector<2x64xf32> to vector<2x16xf32>
    %299 = math.tanh %298 : vector<2x16xf32>
    %300 = arith.mulf %285, %226 : vector<2x16xf32>
    %301 = arith.mulf %291, %299 : vector<2x16xf32>
    %302 = arith.addf %300, %301 : vector<2x16xf32>
    %303 = math.tanh %302 : vector<2x16xf32>
    %304 = arith.mulf %297, %303 : vector<2x16xf32>
    %305 = arith.index_cast %c3_i32 : i32 to index
    %c0_92 = arith.constant 0 : index
    %c0_93 = arith.constant 0 : index
    %306 = vector.load %arg16[%305, %c0_92, %c0_93] : memref<8x2x16xf32, #tpu.memory_space<vmem>>, vector<1x2x16xf32>
    %307 = vector.shape_cast %306 : vector<1x2x16xf32> to vector<2x16xf32>
    %308 = vector.shape_cast %270 : vector<2x16xf32> to vector<1x2x16xf32>
    tpu.vector_store %arg16[%305, %c0_92, %c0_93], %308 {strides = array<i32>} : memref<8x2x16xf32, #tpu.memory_space<vmem>>, vector<1x2x16xf32>,
    %c7_i32_94 = arith.constant 7 : i32
    %309 = arith.subi %c7_i32_94, %c3_i32 : i32
    %310 = arith.index_cast %309 : i32 to index
    %c0_95 = arith.constant 0 : index
    %c0_96 = arith.constant 0 : index
    %311 = vector.load %arg17[%310, %c0_95, %c0_96] : memref<8x2x16xf32, #tpu.memory_space<vmem>>, vector<1x2x16xf32>
    %312 = vector.shape_cast %311 : vector<1x2x16xf32> to vector<2x16xf32>
    %313 = vector.shape_cast %304 : vector<2x16xf32> to vector<1x2x16xf32>
    tpu.vector_store %arg17[%310, %c0_95, %c0_96], %313 {strides = array<i32>} : memref<8x2x16xf32, #tpu.memory_space<vmem>>, vector<1x2x16xf32>,
    %c4_i32 = arith.constant 4 : i32
    %314 = arith.index_cast %c4_i32 : i32 to index
    %c0_97 = arith.constant 0 : index
    %c0_98 = arith.constant 0 : index
    %315 = vector.load %arg0[%314, %c0_97, %c0_98] : memref<8x2x32xf32, #tpu.memory_space<vmem>>, vector<1x2x32xf32>
    %316 = vector.shape_cast %315 : vector<1x2x32xf32> to vector<2x32xf32>
    %cst_99 = arith.constant dense<0.000000e+00> : vector<2x64xf32>
    %317 = tpu.matmul %270, %0, %cst_99 {dimension_numbers = #tpu.dot_dimension_numbers<[1], [0], [0], [1], [0, 0, 1, 1], [], []>} : vector<2x16xf32>, vector<16x64xf32>, vector<2x64xf32> -> vector<2x64xf32>
    %cst_100 = arith.constant dense<0.000000e+00> : vector<2x64xf32>
    %318 = tpu.matmul %316, %1, %cst_100 {dimension_numbers = #tpu.dot_dimension_numbers<[1], [0], [0], [1], [0, 0, 1, 1], [], []>} : vector<2x32xf32>, vector<32x64xf32>, vector<2x64xf32> -> vector<2x64xf32>
    %319 = arith.addf %317, %318 : vector<2x64xf32>
    %320 = vector.broadcast %2 : vector<1x64xf32> to vector<2x64xf32>
    %321 = arith.addf %319, %320 : vector<2x64xf32>
    %322 = vector.extract_strided_slice %321 {offsets = [0, 0], sizes = [2, 16], strides = [1, 1]} : vector<2x64xf32> to vector<2x16xf32>
    %323 = arith.negf %322 : vector<2x16xf32>
    %324 = math.exp %323 : vector<2x16xf32>
    %cst_101 = arith.constant 1.000000e+00 : f32
    %325 = vector.broadcast %cst_101 : f32 to vector<2x16xf32>
    %326 = arith.addf %325, %324 : vector<2x16xf32>
    %327 = arith.divf %325, %326 : vector<2x16xf32>
    %328 = vector.extract_strided_slice %321 {offsets = [0, 16], sizes = [2, 16], strides = [1, 1]} : vector<2x64xf32> to vector<2x16xf32>
    %329 = arith.negf %328 : vector<2x16xf32>
    %330 = math.exp %329 : vector<2x16xf32>
    %cst_102 = arith.constant 1.000000e+00 : f32
    %331 = vector.broadcast %cst_102 : f32 to vector<2x16xf32>
    %332 = arith.addf %331, %330 : vector<2x16xf32>
    %333 = arith.divf %331, %332 : vector<2x16xf32>
    %334 = vector.extract_strided_slice %321 {offsets = [0, 32], sizes = [2, 16], strides = [1, 1]} : vector<2x64xf32> to vector<2x16xf32>
    %335 = arith.negf %334 : vector<2x16xf32>
    %336 = math.exp %335 : vector<2x16xf32>
    %cst_103 = arith.constant 1.000000e+00 : f32
    %337 = vector.broadcast %cst_103 : f32 to vector<2x16xf32>
    %338 = arith.addf %337, %336 : vector<2x16xf32>
    %339 = arith.divf %337, %338 : vector<2x16xf32>
    %340 = vector.extract_strided_slice %321 {offsets = [0, 48], sizes = [2, 16], strides = [1, 1]} : vector<2x64xf32> to vector<2x16xf32>
    %341 = math.tanh %340 : vector<2x16xf32>
    %342 = arith.mulf %327, %268 : vector<2x16xf32>
    %343 = arith.mulf %333, %341 : vector<2x16xf32>
    %344 = arith.addf %342, %343 : vector<2x16xf32>
    %345 = math.tanh %344 : vector<2x16xf32>
    %346 = arith.mulf %339, %345 : vector<2x16xf32>
    %c7_i32_104 = arith.constant 7 : i32
    %347 = arith.subi %c7_i32_104, %c4_i32 : i32
    %348 = arith.index_cast %347 : i32 to index
    %c0_105 = arith.constant 0 : index
    %c0_106 = arith.constant 0 : index
    %349 = vector.load %arg0[%348, %c0_105, %c0_106] : memref<8x2x32xf32, #tpu.memory_space<vmem>>, vector<1x2x32xf32>
    %350 = vector.shape_cast %349 : vector<1x2x32xf32> to vector<2x32xf32>
    %cst_107 = arith.constant dense<0.000000e+00> : vector<2x64xf32>
    %351 = tpu.matmul %304, %3, %cst_107 {dimension_numbers = #tpu.dot_dimension_numbers<[1], [0], [0], [1], [0, 0, 1, 1], [], []>} : vector<2x16xf32>, vector<16x64xf32>, vector<2x64xf32> -> vector<2x64xf32>
    %cst_108 = arith.constant dense<0.000000e+00> : vector<2x64xf32>
    %352 = tpu.matmul %350, %4, %cst_108 {dimension_numbers = #tpu.dot_dimension_numbers<[1], [0], [0], [1], [0, 0, 1, 1], [], []>} : vector<2x32xf32>, vector<32x64xf32>, vector<2x64xf32> -> vector<2x64xf32>
    %353 = arith.addf %351, %352 : vector<2x64xf32>
    %354 = vector.broadcast %5 : vector<1x64xf32> to vector<2x64xf32>
    %355 = arith.addf %353, %354 : vector<2x64xf32>
    %356 = vector.extract_strided_slice %355 {offsets = [0, 0], sizes = [2, 16], strides = [1, 1]} : vector<2x64xf32> to vector<2x16xf32>
    %357 = arith.negf %356 : vector<2x16xf32>
    %358 = math.exp %357 : vector<2x16xf32>
    %cst_109 = arith.constant 1.000000e+00 : f32
    %359 = vector.broadcast %cst_109 : f32 to vector<2x16xf32>
    %360 = arith.addf %359, %358 : vector<2x16xf32>
    %361 = arith.divf %359, %360 : vector<2x16xf32>
    %362 = vector.extract_strided_slice %355 {offsets = [0, 16], sizes = [2, 16], strides = [1, 1]} : vector<2x64xf32> to vector<2x16xf32>
    %363 = arith.negf %362 : vector<2x16xf32>
    %364 = math.exp %363 : vector<2x16xf32>
    %cst_110 = arith.constant 1.000000e+00 : f32
    %365 = vector.broadcast %cst_110 : f32 to vector<2x16xf32>
    %366 = arith.addf %365, %364 : vector<2x16xf32>
    %367 = arith.divf %365, %366 : vector<2x16xf32>
    %368 = vector.extract_strided_slice %355 {offsets = [0, 32], sizes = [2, 16], strides = [1, 1]} : vector<2x64xf32> to vector<2x16xf32>
    %369 = arith.negf %368 : vector<2x16xf32>
    %370 = math.exp %369 : vector<2x16xf32>
    %cst_111 = arith.constant 1.000000e+00 : f32
    %371 = vector.broadcast %cst_111 : f32 to vector<2x16xf32>
    %372 = arith.addf %371, %370 : vector<2x16xf32>
    %373 = arith.divf %371, %372 : vector<2x16xf32>
    %374 = vector.extract_strided_slice %355 {offsets = [0, 48], sizes = [2, 16], strides = [1, 1]} : vector<2x64xf32> to vector<2x16xf32>
    %375 = math.tanh %374 : vector<2x16xf32>
    %376 = arith.mulf %361, %302 : vector<2x16xf32>
    %377 = arith.mulf %367, %375 : vector<2x16xf32>
    %378 = arith.addf %376, %377 : vector<2x16xf32>
    %379 = math.tanh %378 : vector<2x16xf32>
    %380 = arith.mulf %373, %379 : vector<2x16xf32>
    %381 = arith.index_cast %c4_i32 : i32 to index
    %c0_112 = arith.constant 0 : index
    %c0_113 = arith.constant 0 : index
    %382 = vector.load %arg16[%381, %c0_112, %c0_113] : memref<8x2x16xf32, #tpu.memory_space<vmem>>, vector<1x2x16xf32>
    %383 = vector.shape_cast %382 : vector<1x2x16xf32> to vector<2x16xf32>
    %384 = vector.shape_cast %346 : vector<2x16xf32> to vector<1x2x16xf32>
    tpu.vector_store %arg16[%381, %c0_112, %c0_113], %384 {strides = array<i32>} : memref<8x2x16xf32, #tpu.memory_space<vmem>>, vector<1x2x16xf32>,
    %c7_i32_114 = arith.constant 7 : i32
    %385 = arith.subi %c7_i32_114, %c4_i32 : i32
    %386 = arith.index_cast %385 : i32 to index
    %c0_115 = arith.constant 0 : index
    %c0_116 = arith.constant 0 : index
    %387 = vector.load %arg17[%386, %c0_115, %c0_116] : memref<8x2x16xf32, #tpu.memory_space<vmem>>, vector<1x2x16xf32>
    %388 = vector.shape_cast %387 : vector<1x2x16xf32> to vector<2x16xf32>
    %389 = vector.shape_cast %380 : vector<2x16xf32> to vector<1x2x16xf32>
    tpu.vector_store %arg17[%386, %c0_115, %c0_116], %389 {strides = array<i32>} : memref<8x2x16xf32, #tpu.memory_space<vmem>>, vector<1x2x16xf32>,
    %c5_i32 = arith.constant 5 : i32
    %390 = arith.index_cast %c5_i32 : i32 to index
    %c0_117 = arith.constant 0 : index
    %c0_118 = arith.constant 0 : index
    %391 = vector.load %arg0[%390, %c0_117, %c0_118] : memref<8x2x32xf32, #tpu.memory_space<vmem>>, vector<1x2x32xf32>
    %392 = vector.shape_cast %391 : vector<1x2x32xf32> to vector<2x32xf32>
    %cst_119 = arith.constant dense<0.000000e+00> : vector<2x64xf32>
    %393 = tpu.matmul %346, %0, %cst_119 {dimension_numbers = #tpu.dot_dimension_numbers<[1], [0], [0], [1], [0, 0, 1, 1], [], []>} : vector<2x16xf32>, vector<16x64xf32>, vector<2x64xf32> -> vector<2x64xf32>
    %cst_120 = arith.constant dense<0.000000e+00> : vector<2x64xf32>
    %394 = tpu.matmul %392, %1, %cst_120 {dimension_numbers = #tpu.dot_dimension_numbers<[1], [0], [0], [1], [0, 0, 1, 1], [], []>} : vector<2x32xf32>, vector<32x64xf32>, vector<2x64xf32> -> vector<2x64xf32>
    %395 = arith.addf %393, %394 : vector<2x64xf32>
    %396 = vector.broadcast %2 : vector<1x64xf32> to vector<2x64xf32>
    %397 = arith.addf %395, %396 : vector<2x64xf32>
    %398 = vector.extract_strided_slice %397 {offsets = [0, 0], sizes = [2, 16], strides = [1, 1]} : vector<2x64xf32> to vector<2x16xf32>
    %399 = arith.negf %398 : vector<2x16xf32>
    %400 = math.exp %399 : vector<2x16xf32>
    %cst_121 = arith.constant 1.000000e+00 : f32
    %401 = vector.broadcast %cst_121 : f32 to vector<2x16xf32>
    %402 = arith.addf %401, %400 : vector<2x16xf32>
    %403 = arith.divf %401, %402 : vector<2x16xf32>
    %404 = vector.extract_strided_slice %397 {offsets = [0, 16], sizes = [2, 16], strides = [1, 1]} : vector<2x64xf32> to vector<2x16xf32>
    %405 = arith.negf %404 : vector<2x16xf32>
    %406 = math.exp %405 : vector<2x16xf32>
    %cst_122 = arith.constant 1.000000e+00 : f32
    %407 = vector.broadcast %cst_122 : f32 to vector<2x16xf32>
    %408 = arith.addf %407, %406 : vector<2x16xf32>
    %409 = arith.divf %407, %408 : vector<2x16xf32>
    %410 = vector.extract_strided_slice %397 {offsets = [0, 32], sizes = [2, 16], strides = [1, 1]} : vector<2x64xf32> to vector<2x16xf32>
    %411 = arith.negf %410 : vector<2x16xf32>
    %412 = math.exp %411 : vector<2x16xf32>
    %cst_123 = arith.constant 1.000000e+00 : f32
    %413 = vector.broadcast %cst_123 : f32 to vector<2x16xf32>
    %414 = arith.addf %413, %412 : vector<2x16xf32>
    %415 = arith.divf %413, %414 : vector<2x16xf32>
    %416 = vector.extract_strided_slice %397 {offsets = [0, 48], sizes = [2, 16], strides = [1, 1]} : vector<2x64xf32> to vector<2x16xf32>
    %417 = math.tanh %416 : vector<2x16xf32>
    %418 = arith.mulf %403, %344 : vector<2x16xf32>
    %419 = arith.mulf %409, %417 : vector<2x16xf32>
    %420 = arith.addf %418, %419 : vector<2x16xf32>
    %421 = math.tanh %420 : vector<2x16xf32>
    %422 = arith.mulf %415, %421 : vector<2x16xf32>
    %c7_i32_124 = arith.constant 7 : i32
    %423 = arith.subi %c7_i32_124, %c5_i32 : i32
    %424 = arith.index_cast %423 : i32 to index
    %c0_125 = arith.constant 0 : index
    %c0_126 = arith.constant 0 : index
    %425 = vector.load %arg0[%424, %c0_125, %c0_126] : memref<8x2x32xf32, #tpu.memory_space<vmem>>, vector<1x2x32xf32>
    %426 = vector.shape_cast %425 : vector<1x2x32xf32> to vector<2x32xf32>
    %cst_127 = arith.constant dense<0.000000e+00> : vector<2x64xf32>
    %427 = tpu.matmul %380, %3, %cst_127 {dimension_numbers = #tpu.dot_dimension_numbers<[1], [0], [0], [1], [0, 0, 1, 1], [], []>} : vector<2x16xf32>, vector<16x64xf32>, vector<2x64xf32> -> vector<2x64xf32>
    %cst_128 = arith.constant dense<0.000000e+00> : vector<2x64xf32>
    %428 = tpu.matmul %426, %4, %cst_128 {dimension_numbers = #tpu.dot_dimension_numbers<[1], [0], [0], [1], [0, 0, 1, 1], [], []>} : vector<2x32xf32>, vector<32x64xf32>, vector<2x64xf32> -> vector<2x64xf32>
    %429 = arith.addf %427, %428 : vector<2x64xf32>
    %430 = vector.broadcast %5 : vector<1x64xf32> to vector<2x64xf32>
    %431 = arith.addf %429, %430 : vector<2x64xf32>
    %432 = vector.extract_strided_slice %431 {offsets = [0, 0], sizes = [2, 16], strides = [1, 1]} : vector<2x64xf32> to vector<2x16xf32>
    %433 = arith.negf %432 : vector<2x16xf32>
    %434 = math.exp %433 : vector<2x16xf32>
    %cst_129 = arith.constant 1.000000e+00 : f32
    %435 = vector.broadcast %cst_129 : f32 to vector<2x16xf32>
    %436 = arith.addf %435, %434 : vector<2x16xf32>
    %437 = arith.divf %435, %436 : vector<2x16xf32>
    %438 = vector.extract_strided_slice %431 {offsets = [0, 16], sizes = [2, 16], strides = [1, 1]} : vector<2x64xf32> to vector<2x16xf32>
    %439 = arith.negf %438 : vector<2x16xf32>
    %440 = math.exp %439 : vector<2x16xf32>
    %cst_130 = arith.constant 1.000000e+00 : f32
    %441 = vector.broadcast %cst_130 : f32 to vector<2x16xf32>
    %442 = arith.addf %441, %440 : vector<2x16xf32>
    %443 = arith.divf %441, %442 : vector<2x16xf32>
    %444 = vector.extract_strided_slice %431 {offsets = [0, 32], sizes = [2, 16], strides = [1, 1]} : vector<2x64xf32> to vector<2x16xf32>
    %445 = arith.negf %444 : vector<2x16xf32>
    %446 = math.exp %445 : vector<2x16xf32>
    %cst_131 = arith.constant 1.000000e+00 : f32
    %447 = vector.broadcast %cst_131 : f32 to vector<2x16xf32>
    %448 = arith.addf %447, %446 : vector<2x16xf32>
    %449 = arith.divf %447, %448 : vector<2x16xf32>
    %450 = vector.extract_strided_slice %431 {offsets = [0, 48], sizes = [2, 16], strides = [1, 1]} : vector<2x64xf32> to vector<2x16xf32>
    %451 = math.tanh %450 : vector<2x16xf32>
    %452 = arith.mulf %437, %378 : vector<2x16xf32>
    %453 = arith.mulf %443, %451 : vector<2x16xf32>
    %454 = arith.addf %452, %453 : vector<2x16xf32>
    %455 = math.tanh %454 : vector<2x16xf32>
    %456 = arith.mulf %449, %455 : vector<2x16xf32>
    %457 = arith.index_cast %c5_i32 : i32 to index
    %c0_132 = arith.constant 0 : index
    %c0_133 = arith.constant 0 : index
    %458 = vector.load %arg16[%457, %c0_132, %c0_133] : memref<8x2x16xf32, #tpu.memory_space<vmem>>, vector<1x2x16xf32>
    %459 = vector.shape_cast %458 : vector<1x2x16xf32> to vector<2x16xf32>
    %460 = vector.shape_cast %422 : vector<2x16xf32> to vector<1x2x16xf32>
    tpu.vector_store %arg16[%457, %c0_132, %c0_133], %460 {strides = array<i32>} : memref<8x2x16xf32, #tpu.memory_space<vmem>>, vector<1x2x16xf32>,
    %c7_i32_134 = arith.constant 7 : i32
    %461 = arith.subi %c7_i32_134, %c5_i32 : i32
    %462 = arith.index_cast %461 : i32 to index
    %c0_135 = arith.constant 0 : index
    %c0_136 = arith.constant 0 : index
    %463 = vector.load %arg17[%462, %c0_135, %c0_136] : memref<8x2x16xf32, #tpu.memory_space<vmem>>, vector<1x2x16xf32>
    %464 = vector.shape_cast %463 : vector<1x2x16xf32> to vector<2x16xf32>
    %465 = vector.shape_cast %456 : vector<2x16xf32> to vector<1x2x16xf32>
    tpu.vector_store %arg17[%462, %c0_135, %c0_136], %465 {strides = array<i32>} : memref<8x2x16xf32, #tpu.memory_space<vmem>>, vector<1x2x16xf32>,
    %c6_i32 = arith.constant 6 : i32
    %466 = arith.index_cast %c6_i32 : i32 to index
    %c0_137 = arith.constant 0 : index
    %c0_138 = arith.constant 0 : index
    %467 = vector.load %arg0[%466, %c0_137, %c0_138] : memref<8x2x32xf32, #tpu.memory_space<vmem>>, vector<1x2x32xf32>
    %468 = vector.shape_cast %467 : vector<1x2x32xf32> to vector<2x32xf32>
    %cst_139 = arith.constant dense<0.000000e+00> : vector<2x64xf32>
    %469 = tpu.matmul %422, %0, %cst_139 {dimension_numbers = #tpu.dot_dimension_numbers<[1], [0], [0], [1], [0, 0, 1, 1], [], []>} : vector<2x16xf32>, vector<16x64xf32>, vector<2x64xf32> -> vector<2x64xf32>
    %cst_140 = arith.constant dense<0.000000e+00> : vector<2x64xf32>
    %470 = tpu.matmul %468, %1, %cst_140 {dimension_numbers = #tpu.dot_dimension_numbers<[1], [0], [0], [1], [0, 0, 1, 1], [], []>} : vector<2x32xf32>, vector<32x64xf32>, vector<2x64xf32> -> vector<2x64xf32>
    %471 = arith.addf %469, %470 : vector<2x64xf32>
    %472 = vector.broadcast %2 : vector<1x64xf32> to vector<2x64xf32>
    %473 = arith.addf %471, %472 : vector<2x64xf32>
    %474 = vector.extract_strided_slice %473 {offsets = [0, 0], sizes = [2, 16], strides = [1, 1]} : vector<2x64xf32> to vector<2x16xf32>
    %475 = arith.negf %474 : vector<2x16xf32>
    %476 = math.exp %475 : vector<2x16xf32>
    %cst_141 = arith.constant 1.000000e+00 : f32
    %477 = vector.broadcast %cst_141 : f32 to vector<2x16xf32>
    %478 = arith.addf %477, %476 : vector<2x16xf32>
    %479 = arith.divf %477, %478 : vector<2x16xf32>
    %480 = vector.extract_strided_slice %473 {offsets = [0, 16], sizes = [2, 16], strides = [1, 1]} : vector<2x64xf32> to vector<2x16xf32>
    %481 = arith.negf %480 : vector<2x16xf32>
    %482 = math.exp %481 : vector<2x16xf32>
    %cst_142 = arith.constant 1.000000e+00 : f32
    %483 = vector.broadcast %cst_142 : f32 to vector<2x16xf32>
    %484 = arith.addf %483, %482 : vector<2x16xf32>
    %485 = arith.divf %483, %484 : vector<2x16xf32>
    %486 = vector.extract_strided_slice %473 {offsets = [0, 32], sizes = [2, 16], strides = [1, 1]} : vector<2x64xf32> to vector<2x16xf32>
    %487 = arith.negf %486 : vector<2x16xf32>
    %488 = math.exp %487 : vector<2x16xf32>
    %cst_143 = arith.constant 1.000000e+00 : f32
    %489 = vector.broadcast %cst_143 : f32 to vector<2x16xf32>
    %490 = arith.addf %489, %488 : vector<2x16xf32>
    %491 = arith.divf %489, %490 : vector<2x16xf32>
    %492 = vector.extract_strided_slice %473 {offsets = [0, 48], sizes = [2, 16], strides = [1, 1]} : vector<2x64xf32> to vector<2x16xf32>
    %493 = math.tanh %492 : vector<2x16xf32>
    %494 = arith.mulf %479, %420 : vector<2x16xf32>
    %495 = arith.mulf %485, %493 : vector<2x16xf32>
    %496 = arith.addf %494, %495 : vector<2x16xf32>
    %497 = math.tanh %496 : vector<2x16xf32>
    %498 = arith.mulf %491, %497 : vector<2x16xf32>
    %c7_i32_144 = arith.constant 7 : i32
    %499 = arith.subi %c7_i32_144, %c6_i32 : i32
    %500 = arith.index_cast %499 : i32 to index
    %c0_145 = arith.constant 0 : index
    %c0_146 = arith.constant 0 : index
    %501 = vector.load %arg0[%500, %c0_145, %c0_146] : memref<8x2x32xf32, #tpu.memory_space<vmem>>, vector<1x2x32xf32>
    %502 = vector.shape_cast %501 : vector<1x2x32xf32> to vector<2x32xf32>
    %cst_147 = arith.constant dense<0.000000e+00> : vector<2x64xf32>
    %503 = tpu.matmul %456, %3, %cst_147 {dimension_numbers = #tpu.dot_dimension_numbers<[1], [0], [0], [1], [0, 0, 1, 1], [], []>} : vector<2x16xf32>, vector<16x64xf32>, vector<2x64xf32> -> vector<2x64xf32>
    %cst_148 = arith.constant dense<0.000000e+00> : vector<2x64xf32>
    %504 = tpu.matmul %502, %4, %cst_148 {dimension_numbers = #tpu.dot_dimension_numbers<[1], [0], [0], [1], [0, 0, 1, 1], [], []>} : vector<2x32xf32>, vector<32x64xf32>, vector<2x64xf32> -> vector<2x64xf32>
    %505 = arith.addf %503, %504 : vector<2x64xf32>
    %506 = vector.broadcast %5 : vector<1x64xf32> to vector<2x64xf32>
    %507 = arith.addf %505, %506 : vector<2x64xf32>
    %508 = vector.extract_strided_slice %507 {offsets = [0, 0], sizes = [2, 16], strides = [1, 1]} : vector<2x64xf32> to vector<2x16xf32>
    %509 = arith.negf %508 : vector<2x16xf32>
    %510 = math.exp %509 : vector<2x16xf32>
    %cst_149 = arith.constant 1.000000e+00 : f32
    %511 = vector.broadcast %cst_149 : f32 to vector<2x16xf32>
    %512 = arith.addf %511, %510 : vector<2x16xf32>
    %513 = arith.divf %511, %512 : vector<2x16xf32>
    %514 = vector.extract_strided_slice %507 {offsets = [0, 16], sizes = [2, 16], strides = [1, 1]} : vector<2x64xf32> to vector<2x16xf32>
    %515 = arith.negf %514 : vector<2x16xf32>
    %516 = math.exp %515 : vector<2x16xf32>
    %cst_150 = arith.constant 1.000000e+00 : f32
    %517 = vector.broadcast %cst_150 : f32 to vector<2x16xf32>
    %518 = arith.addf %517, %516 : vector<2x16xf32>
    %519 = arith.divf %517, %518 : vector<2x16xf32>
    %520 = vector.extract_strided_slice %507 {offsets = [0, 32], sizes = [2, 16], strides = [1, 1]} : vector<2x64xf32> to vector<2x16xf32>
    %521 = arith.negf %520 : vector<2x16xf32>
    %522 = math.exp %521 : vector<2x16xf32>
    %cst_151 = arith.constant 1.000000e+00 : f32
    %523 = vector.broadcast %cst_151 : f32 to vector<2x16xf32>
    %524 = arith.addf %523, %522 : vector<2x16xf32>
    %525 = arith.divf %523, %524 : vector<2x16xf32>
    %526 = vector.extract_strided_slice %507 {offsets = [0, 48], sizes = [2, 16], strides = [1, 1]} : vector<2x64xf32> to vector<2x16xf32>
    %527 = math.tanh %526 : vector<2x16xf32>
    %528 = arith.mulf %513, %454 : vector<2x16xf32>
    %529 = arith.mulf %519, %527 : vector<2x16xf32>
    %530 = arith.addf %528, %529 : vector<2x16xf32>
    %531 = math.tanh %530 : vector<2x16xf32>
    %532 = arith.mulf %525, %531 : vector<2x16xf32>
    %533 = arith.index_cast %c6_i32 : i32 to index
    %c0_152 = arith.constant 0 : index
    %c0_153 = arith.constant 0 : index
    %534 = vector.load %arg16[%533, %c0_152, %c0_153] : memref<8x2x16xf32, #tpu.memory_space<vmem>>, vector<1x2x16xf32>
    %535 = vector.shape_cast %534 : vector<1x2x16xf32> to vector<2x16xf32>
    %536 = vector.shape_cast %498 : vector<2x16xf32> to vector<1x2x16xf32>
    tpu.vector_store %arg16[%533, %c0_152, %c0_153], %536 {strides = array<i32>} : memref<8x2x16xf32, #tpu.memory_space<vmem>>, vector<1x2x16xf32>,
    %c7_i32_154 = arith.constant 7 : i32
    %537 = arith.subi %c7_i32_154, %c6_i32 : i32
    %538 = arith.index_cast %537 : i32 to index
    %c0_155 = arith.constant 0 : index
    %c0_156 = arith.constant 0 : index
    %539 = vector.load %arg17[%538, %c0_155, %c0_156] : memref<8x2x16xf32, #tpu.memory_space<vmem>>, vector<1x2x16xf32>
    %540 = vector.shape_cast %539 : vector<1x2x16xf32> to vector<2x16xf32>
    %541 = vector.shape_cast %532 : vector<2x16xf32> to vector<1x2x16xf32>
    tpu.vector_store %arg17[%538, %c0_155, %c0_156], %541 {strides = array<i32>} : memref<8x2x16xf32, #tpu.memory_space<vmem>>, vector<1x2x16xf32>,
    %c7_i32_157 = arith.constant 7 : i32
    %542 = arith.index_cast %c7_i32_157 : i32 to index
    %c0_158 = arith.constant 0 : index
    %c0_159 = arith.constant 0 : index
    %543 = vector.load %arg0[%542, %c0_158, %c0_159] : memref<8x2x32xf32, #tpu.memory_space<vmem>>, vector<1x2x32xf32>
    %544 = vector.shape_cast %543 : vector<1x2x32xf32> to vector<2x32xf32>
    %cst_160 = arith.constant dense<0.000000e+00> : vector<2x64xf32>
    %545 = tpu.matmul %498, %0, %cst_160 {dimension_numbers = #tpu.dot_dimension_numbers<[1], [0], [0], [1], [0, 0, 1, 1], [], []>} : vector<2x16xf32>, vector<16x64xf32>, vector<2x64xf32> -> vector<2x64xf32>
    %cst_161 = arith.constant dense<0.000000e+00> : vector<2x64xf32>
    %546 = tpu.matmul %544, %1, %cst_161 {dimension_numbers = #tpu.dot_dimension_numbers<[1], [0], [0], [1], [0, 0, 1, 1], [], []>} : vector<2x32xf32>, vector<32x64xf32>, vector<2x64xf32> -> vector<2x64xf32>
    %547 = arith.addf %545, %546 : vector<2x64xf32>
    %548 = vector.broadcast %2 : vector<1x64xf32> to vector<2x64xf32>
    %549 = arith.addf %547, %548 : vector<2x64xf32>
    %550 = vector.extract_strided_slice %549 {offsets = [0, 0], sizes = [2, 16], strides = [1, 1]} : vector<2x64xf32> to vector<2x16xf32>
    %551 = arith.negf %550 : vector<2x16xf32>
    %552 = math.exp %551 : vector<2x16xf32>
    %cst_162 = arith.constant 1.000000e+00 : f32
    %553 = vector.broadcast %cst_162 : f32 to vector<2x16xf32>
    %554 = arith.addf %553, %552 : vector<2x16xf32>
    %555 = arith.divf %553, %554 : vector<2x16xf32>
    %556 = vector.extract_strided_slice %549 {offsets = [0, 16], sizes = [2, 16], strides = [1, 1]} : vector<2x64xf32> to vector<2x16xf32>
    %557 = arith.negf %556 : vector<2x16xf32>
    %558 = math.exp %557 : vector<2x16xf32>
    %cst_163 = arith.constant 1.000000e+00 : f32
    %559 = vector.broadcast %cst_163 : f32 to vector<2x16xf32>
    %560 = arith.addf %559, %558 : vector<2x16xf32>
    %561 = arith.divf %559, %560 : vector<2x16xf32>
    %562 = vector.extract_strided_slice %549 {offsets = [0, 32], sizes = [2, 16], strides = [1, 1]} : vector<2x64xf32> to vector<2x16xf32>
    %563 = arith.negf %562 : vector<2x16xf32>
    %564 = math.exp %563 : vector<2x16xf32>
    %cst_164 = arith.constant 1.000000e+00 : f32
    %565 = vector.broadcast %cst_164 : f32 to vector<2x16xf32>
    %566 = arith.addf %565, %564 : vector<2x16xf32>
    %567 = arith.divf %565, %566 : vector<2x16xf32>
    %568 = vector.extract_strided_slice %549 {offsets = [0, 48], sizes = [2, 16], strides = [1, 1]} : vector<2x64xf32> to vector<2x16xf32>
    %569 = math.tanh %568 : vector<2x16xf32>
    %570 = arith.mulf %555, %496 : vector<2x16xf32>
    %571 = arith.mulf %561, %569 : vector<2x16xf32>
    %572 = arith.addf %570, %571 : vector<2x16xf32>
    %573 = math.tanh %572 : vector<2x16xf32>
    %574 = arith.mulf %567, %573 : vector<2x16xf32>
    %c7_i32_165 = arith.constant 7 : i32
    %575 = arith.subi %c7_i32_165, %c7_i32_157 : i32
    %576 = arith.index_cast %575 : i32 to index
    %c0_166 = arith.constant 0 : index
    %c0_167 = arith.constant 0 : index
    %577 = vector.load %arg0[%576, %c0_166, %c0_167] : memref<8x2x32xf32, #tpu.memory_space<vmem>>, vector<1x2x32xf32>
    %578 = vector.shape_cast %577 : vector<1x2x32xf32> to vector<2x32xf32>
    %cst_168 = arith.constant dense<0.000000e+00> : vector<2x64xf32>
    %579 = tpu.matmul %532, %3, %cst_168 {dimension_numbers = #tpu.dot_dimension_numbers<[1], [0], [0], [1], [0, 0, 1, 1], [], []>} : vector<2x16xf32>, vector<16x64xf32>, vector<2x64xf32> -> vector<2x64xf32>
    %cst_169 = arith.constant dense<0.000000e+00> : vector<2x64xf32>
    %580 = tpu.matmul %578, %4, %cst_169 {dimension_numbers = #tpu.dot_dimension_numbers<[1], [0], [0], [1], [0, 0, 1, 1], [], []>} : vector<2x32xf32>, vector<32x64xf32>, vector<2x64xf32> -> vector<2x64xf32>
    %581 = arith.addf %579, %580 : vector<2x64xf32>
    %582 = vector.broadcast %5 : vector<1x64xf32> to vector<2x64xf32>
    %583 = arith.addf %581, %582 : vector<2x64xf32>
    %584 = vector.extract_strided_slice %583 {offsets = [0, 0], sizes = [2, 16], strides = [1, 1]} : vector<2x64xf32> to vector<2x16xf32>
    %585 = arith.negf %584 : vector<2x16xf32>
    %586 = math.exp %585 : vector<2x16xf32>
    %cst_170 = arith.constant 1.000000e+00 : f32
    %587 = vector.broadcast %cst_170 : f32 to vector<2x16xf32>
    %588 = arith.addf %587, %586 : vector<2x16xf32>
    %589 = arith.divf %587, %588 : vector<2x16xf32>
    %590 = vector.extract_strided_slice %583 {offsets = [0, 16], sizes = [2, 16], strides = [1, 1]} : vector<2x64xf32> to vector<2x16xf32>
    %591 = arith.negf %590 : vector<2x16xf32>
    %592 = math.exp %591 : vector<2x16xf32>
    %cst_171 = arith.constant 1.000000e+00 : f32
    %593 = vector.broadcast %cst_171 : f32 to vector<2x16xf32>
    %594 = arith.addf %593, %592 : vector<2x16xf32>
    %595 = arith.divf %593, %594 : vector<2x16xf32>
    %596 = vector.extract_strided_slice %583 {offsets = [0, 32], sizes = [2, 16], strides = [1, 1]} : vector<2x64xf32> to vector<2x16xf32>
    %597 = arith.negf %596 : vector<2x16xf32>
    %598 = math.exp %597 : vector<2x16xf32>
    %cst_172 = arith.constant 1.000000e+00 : f32
    %599 = vector.broadcast %cst_172 : f32 to vector<2x16xf32>
    %600 = arith.addf %599, %598 : vector<2x16xf32>
    %601 = arith.divf %599, %600 : vector<2x16xf32>
    %602 = vector.extract_strided_slice %583 {offsets = [0, 48], sizes = [2, 16], strides = [1, 1]} : vector<2x64xf32> to vector<2x16xf32>
    %603 = math.tanh %602 : vector<2x16xf32>
    %604 = arith.mulf %589, %530 : vector<2x16xf32>
    %605 = arith.mulf %595, %603 : vector<2x16xf32>
    %606 = arith.addf %604, %605 : vector<2x16xf32>
    %607 = math.tanh %606 : vector<2x16xf32>
    %608 = arith.mulf %601, %607 : vector<2x16xf32>
    %609 = arith.index_cast %c7_i32_157 : i32 to index
    %c0_173 = arith.constant 0 : index
    %c0_174 = arith.constant 0 : index
    %610 = vector.load %arg16[%609, %c0_173, %c0_174] : memref<8x2x16xf32, #tpu.memory_space<vmem>>, vector<1x2x16xf32>
    %611 = vector.shape_cast %610 : vector<1x2x16xf32> to vector<2x16xf32>
    %612 = vector.shape_cast %574 : vector<2x16xf32> to vector<1x2x16xf32>
    tpu.vector_store %arg16[%609, %c0_173, %c0_174], %612 {strides = array<i32>} : memref<8x2x16xf32, #tpu.memory_space<vmem>>, vector<1x2x16xf32>,
    %c7_i32_175 = arith.constant 7 : i32
    %613 = arith.subi %c7_i32_175, %c7_i32_157 : i32
    %614 = arith.index_cast %613 : i32 to index
    %c0_176 = arith.constant 0 : index
    %c0_177 = arith.constant 0 : index
    %615 = vector.load %arg17[%614, %c0_176, %c0_177] : memref<8x2x16xf32, #tpu.memory_space<vmem>>, vector<1x2x16xf32>
    %616 = vector.shape_cast %615 : vector<1x2x16xf32> to vector<2x16xf32>
    %617 = vector.shape_cast %608 : vector<2x16xf32> to vector<1x2x16xf32>
    tpu.vector_store %arg17[%614, %c0_176, %c0_177], %617 {strides = array<i32>} : memref<8x2x16xf32, #tpu.memory_space<vmem>>, vector<1x2x16xf32>,
    %c8_i32 = arith.constant 8 : i32
    %c0_178 = arith.constant 0 : index
    %c0_179 = arith.constant 0 : index
    %c0_180 = arith.constant 0 : index
    %618 = vector.load %arg16[%c0_178, %c0_179, %c0_180] : memref<8x2x16xf32, #tpu.memory_space<vmem>>, vector<8x2x16xf32>
    %619 = vector.shape_cast %618 : vector<8x2x16xf32> to vector<16x16xf32>
    %c0_181 = arith.constant 0 : index
    %c0_182 = arith.constant 0 : index
    %c0_183 = arith.constant 0 : index
    %620 = vector.load %arg17[%c0_181, %c0_182, %c0_183] : memref<8x2x16xf32, #tpu.memory_space<vmem>>, vector<8x2x16xf32>
    %621 = vector.shape_cast %620 : vector<8x2x16xf32> to vector<16x16xf32>
    %c0_184 = arith.constant 0 : index
    %c0_185 = arith.constant 0 : index
    %622 = vector.load %arg11[%c0_184, %c0_185] : memref<16x32xf32, #tpu.memory_space<vmem>>, vector<16x32xf32>
    %cst_186 = arith.constant dense<0.000000e+00> : vector<16x32xf32>
    %623 = tpu.matmul %619, %622, %cst_186 {dimension_numbers = #tpu.dot_dimension_numbers<[1], [0], [0], [1], [0, 0, 1, 1], [], []>} : vector<16x16xf32>, vector<16x32xf32>, vector<16x32xf32> -> vector<16x32xf32>
    %c0_187 = arith.constant 0 : index
    %c0_188 = arith.constant 0 : index
    %624 = vector.load %arg12[%c0_187, %c0_188] : memref<16x32xf32, #tpu.memory_space<vmem>>, vector<16x32xf32>
    %cst_189 = arith.constant dense<0.000000e+00> : vector<16x32xf32>
    %625 = tpu.matmul %621, %624, %cst_189 {dimension_numbers = #tpu.dot_dimension_numbers<[1], [0], [0], [1], [0, 0, 1, 1], [], []>} : vector<16x16xf32>, vector<16x32xf32>, vector<16x32xf32> -> vector<16x32xf32>
    %626 = arith.addf %623, %625 : vector<16x32xf32>
    %c0_190 = arith.constant 0 : index
    %c0_191 = arith.constant 0 : index
    %627 = vector.load %arg13[%c0_190, %c0_191] : memref<1x32xf32, #tpu.memory_space<vmem>>, vector<1x32xf32>
    %628 = vector.broadcast %627 : vector<1x32xf32> to vector<16x32xf32>
    %629 = arith.addf %626, %628 : vector<16x32xf32>
    %630 = vector.shape_cast %629 : vector<16x32xf32> to vector<8x2x32xf32>
    %c0_192 = arith.constant 0 : index
    %c0_193 = arith.constant 0 : index
    %c0_194 = arith.constant 0 : index
    %631 = vector.load %arg14[%c0_192, %c0_193, %c0_194] : memref<8x2x32xf32, #tpu.memory_space<vmem>>, vector<8x2x32xf32>
    tpu.vector_store %arg14[%c0_192, %c0_193, %c0_194], %630 {strides = array<i32>} : memref<8x2x32xf32, #tpu.memory_space<vmem>>, vector<8x2x32xf32>,
    %c7 = arith.constant 7 : index
    %c0_195 = arith.constant 0 : index
    %c0_196 = arith.constant 0 : index
    %632 = vector.load %arg17[%c7, %c0_195, %c0_196] : memref<8x2x16xf32, #tpu.memory_space<vmem>>, vector<1x2x16xf32>
    %633 = vector.shape_cast %632 : vector<1x2x16xf32> to vector<2x16xf32>
    %634 = tpu.concatenate %574, %633 in 1 : vector<2x16xf32>, vector<2x16xf32> -> vector<2x32xf32>
    %c0_197 = arith.constant 0 : index
    %c0_198 = arith.constant 0 : index
    %635 = vector.load %arg15[%c0_197, %c0_198] : memref<2x32xf32, #tpu.memory_space<vmem>>, vector<2x32xf32>
    tpu.vector_store %arg15[%c0_197, %c0_198], %634 {strides = array<i32>} : memref<2x32xf32, #tpu.memory_space<vmem>>, vector<2x32xf32>,
    return
  }
}

module attributes {stable_mosaic.version = 11 : i64} {
  func.func @_decoder_kernel(%arg0: memref<2x8x32xf32, #tpu.memory_space<vmem>>, %arg1: memref<2x32xf32, #tpu.memory_space<vmem>>, %arg2: memref<8x2x32xf32, #tpu.memory_space<vmem>>, %arg3: memref<1x32xf32, #tpu.memory_space<vmem>>, %arg4: memref<1x1xf32, #tpu.memory_space<vmem>>, %arg5: memref<1x32xf32, #tpu.memory_space<vmem>>, %arg6: memref<32x128xf32, #tpu.memory_space<vmem>>, %arg7: memref<32x128xf32, #tpu.memory_space<vmem>>, %arg8: memref<1x128xf32, #tpu.memory_space<vmem>>, %arg9: memref<32x24xf32, #tpu.memory_space<vmem>>, %arg10: memref<1x24xf32, #tpu.memory_space<vmem>>, %arg11: memref<24x128xf32, #tpu.memory_space<vmem>>, %arg12: memref<1x128xf32, #tpu.memory_space<vmem>>, %arg13: memref<16x128xf32, #tpu.memory_space<vmem>>, %arg14: memref<8x2x8xf32, #tpu.memory_space<vmem>>, %arg15: memref<8x2x32xf32, #tpu.memory_space<vmem>>) attributes {dimension_semantics = [], scalar_prefetch = 0 : i64, scratch_operands = 1 : i64, tpu.core_type = #tpu.core_type<tc>} {
    %c0 = arith.constant 0 : index
    %c0_0 = arith.constant 0 : index
    %c0_1 = arith.constant 0 : index
    %0 = vector.load %arg0[%c0, %c0_0, %c0_1] : memref<2x8x32xf32, #tpu.memory_space<vmem>>, vector<2x8x32xf32>
    %c0_2 = arith.constant 0 : index
    %c0_3 = arith.constant 0 : index
    %1 = vector.load %arg3[%c0_2, %c0_3] : memref<1x32xf32, #tpu.memory_space<vmem>>, vector<1x32xf32>
    %2 = vector.shape_cast %1 : vector<1x32xf32> to vector<1x1x32xf32>
    %3 = vector.broadcast %2 : vector<1x1x32xf32> to vector<2x8x32xf32>
    %4 = arith.mulf %0, %3 : vector<2x8x32xf32>
    %cst = arith.constant dense<0.000000e+00> : vector<2x8xf32>
    %5 = vector.multi_reduction <add>, %4, %cst [2] : vector<2x8x32xf32> to vector<2x8xf32>
    %c0_4 = arith.constant 0 : index
    %c0_5 = arith.constant 0 : index
    %6 = vector.load %arg4[%c0_4, %c0_5] : memref<1x1xf32, #tpu.memory_space<vmem>>, vector<1x1xf32>
    %7 = vector.broadcast %6 : vector<1x1xf32> to vector<2x8xf32>
    %8 = arith.addf %5, %7 : vector<2x8xf32>
    %c0_6 = arith.constant 0 : index
    %c0_7 = arith.constant 0 : index
    %9 = vector.load %arg6[%c0_6, %c0_7] : memref<32x128xf32, #tpu.memory_space<vmem>>, vector<32x128xf32>
    %c0_8 = arith.constant 0 : index
    %c0_9 = arith.constant 0 : index
    %10 = vector.load %arg7[%c0_8, %c0_9] : memref<32x128xf32, #tpu.memory_space<vmem>>, vector<32x128xf32>
    %c0_10 = arith.constant 0 : index
    %c0_11 = arith.constant 0 : index
    %11 = vector.load %arg8[%c0_10, %c0_11] : memref<1x128xf32, #tpu.memory_space<vmem>>, vector<1x128xf32>
    %c0_12 = arith.constant 0 : index
    %c0_13 = arith.constant 0 : index
    %12 = vector.load %arg5[%c0_12, %c0_13] : memref<1x32xf32, #tpu.memory_space<vmem>>, vector<1x32xf32>
    %c0_14 = arith.constant 0 : index
    %c0_15 = arith.constant 0 : index
    %13 = vector.load %arg1[%c0_14, %c0_15] : memref<2x32xf32, #tpu.memory_space<vmem>>, vector<2x32xf32>
    %c0_i32 = arith.constant 0 : i32
    %14 = vector.broadcast %12 : vector<1x32xf32> to vector<2x32xf32>
    %15 = arith.mulf %13, %14 : vector<2x32xf32>
    %cst_16 = arith.constant dense<0.000000e+00> : vector<2xf32>
    %16 = vector.multi_reduction <add>, %15, %cst_16 [1] : vector<2x32xf32> to vector<2xf32>
    %17 = vector.shape_cast %16 : vector<2xf32> to vector<2x1xf32>
    %18 = vector.broadcast %17 : vector<2x1xf32> to vector<2x8xf32>
    %19 = arith.addf %18, %8 : vector<2x8xf32>
    %cst_17 = arith.constant dense<0xFF800000> : vector<2xf32>
    %20 = vector.multi_reduction <maximumf>, %19, %cst_17 [1] : vector<2x8xf32> to vector<2xf32>
    %21 = vector.shape_cast %20 : vector<2xf32> to vector<2x1xf32>
    %22 = vector.broadcast %21 : vector<2x1xf32> to vector<2x8xf32>
    %23 = arith.subf %19, %22 : vector<2x8xf32>
    %24 = math.exp %23 : vector<2x8xf32>
    %cst_18 = arith.constant dense<0.000000e+00> : vector<2xf32>
    %25 = vector.multi_reduction <add>, %24, %cst_18 [1] : vector<2x8xf32> to vector<2xf32>
    %26 = vector.shape_cast %25 : vector<2xf32> to vector<2x1xf32>
    %27 = tpu.reciprocal %26 {approx = true} : vector<2x1xf32> -> vector<2x1xf32>
    %28 = vector.broadcast %27 : vector<2x1xf32> to vector<2x8xf32>
    %29 = arith.mulf %24, %28 : vector<2x8xf32>
    %30 = vector.shape_cast %29 : vector<2x8xf32> to vector<2x8x1xf32>
    %31 = vector.broadcast %30 : vector<2x8x1xf32> to vector<2x8x32xf32>
    %32 = arith.mulf %31, %0 : vector<2x8x32xf32>
    %cst_19 = arith.constant dense<0.000000e+00> : vector<2x32xf32>
    %33 = vector.multi_reduction <add>, %32, %cst_19 [1] : vector<2x8x32xf32> to vector<2x32xf32>
    %34 = arith.index_cast %c0_i32 : i32 to index
    %c0_20 = arith.constant 0 : index
    %c0_21 = arith.constant 0 : index
    %35 = vector.load %arg2[%34, %c0_20, %c0_21] : memref<8x2x32xf32, #tpu.memory_space<vmem>>, vector<1x2x32xf32>
    %36 = vector.shape_cast %35 : vector<1x2x32xf32> to vector<2x32xf32>
    %cst_22 = arith.constant dense<0.000000e+00> : vector<2x128xf32>
    %37 = tpu.matmul %13, %9, %cst_22 {dimension_numbers = #tpu.dot_dimension_numbers<[1], [0], [0], [1], [0, 0, 1, 1], [], []>} : vector<2x32xf32>, vector<32x128xf32>, vector<2x128xf32> -> vector<2x128xf32>
    %cst_23 = arith.constant dense<0.000000e+00> : vector<2x128xf32>
    %38 = tpu.matmul %36, %10, %cst_23 {dimension_numbers = #tpu.dot_dimension_numbers<[1], [0], [0], [1], [0, 0, 1, 1], [], []>} : vector<2x32xf32>, vector<32x128xf32>, vector<2x128xf32> -> vector<2x128xf32>
    %39 = arith.addf %37, %38 : vector<2x128xf32>
    %40 = vector.broadcast %11 : vector<1x128xf32> to vector<2x128xf32>
    %41 = arith.addf %39, %40 : vector<2x128xf32>
    %42 = vector.extract_strided_slice %41 {offsets = [0, 0], sizes = [2, 32], strides = [1, 1]} : vector<2x128xf32> to vector<2x32xf32>
    %43 = arith.negf %42 : vector<2x32xf32>
    %44 = math.exp %43 : vector<2x32xf32>
    %cst_24 = arith.constant 1.000000e+00 : f32
    %45 = vector.broadcast %cst_24 : f32 to vector<2x32xf32>
    %46 = arith.addf %45, %44 : vector<2x32xf32>
    %47 = arith.divf %45, %46 : vector<2x32xf32>
    %48 = vector.extract_strided_slice %41 {offsets = [0, 32], sizes = [2, 32], strides = [1, 1]} : vector<2x128xf32> to vector<2x32xf32>
    %49 = arith.negf %48 : vector<2x32xf32>
    %50 = math.exp %49 : vector<2x32xf32>
    %cst_25 = arith.constant 1.000000e+00 : f32
    %51 = vector.broadcast %cst_25 : f32 to vector<2x32xf32>
    %52 = arith.addf %51, %50 : vector<2x32xf32>
    %53 = arith.divf %51, %52 : vector<2x32xf32>
    %54 = vector.extract_strided_slice %41 {offsets = [0, 64], sizes = [2, 32], strides = [1, 1]} : vector<2x128xf32> to vector<2x32xf32>
    %55 = arith.negf %54 : vector<2x32xf32>
    %56 = math.exp %55 : vector<2x32xf32>
    %cst_26 = arith.constant 1.000000e+00 : f32
    %57 = vector.broadcast %cst_26 : f32 to vector<2x32xf32>
    %58 = arith.addf %57, %56 : vector<2x32xf32>
    %59 = arith.divf %57, %58 : vector<2x32xf32>
    %60 = vector.extract_strided_slice %41 {offsets = [0, 96], sizes = [2, 32], strides = [1, 1]} : vector<2x128xf32> to vector<2x32xf32>
    %61 = math.tanh %60 : vector<2x32xf32>
    %62 = arith.mulf %47, %33 : vector<2x32xf32>
    %63 = arith.mulf %53, %61 : vector<2x32xf32>
    %64 = arith.addf %62, %63 : vector<2x32xf32>
    %65 = math.tanh %64 : vector<2x32xf32>
    %66 = arith.mulf %59, %65 : vector<2x32xf32>
    %67 = arith.index_cast %c0_i32 : i32 to index
    %c0_27 = arith.constant 0 : index
    %c0_28 = arith.constant 0 : index
    %68 = vector.load %arg15[%67, %c0_27, %c0_28] : memref<8x2x32xf32, #tpu.memory_space<vmem>>, vector<1x2x32xf32>
    %69 = vector.shape_cast %68 : vector<1x2x32xf32> to vector<2x32xf32>
    %70 = vector.shape_cast %66 : vector<2x32xf32> to vector<1x2x32xf32>
    tpu.vector_store %arg15[%67, %c0_27, %c0_28], %70 {strides = array<i32>} : memref<8x2x32xf32, #tpu.memory_space<vmem>>, vector<1x2x32xf32>,
    %71 = arith.index_cast %c0_i32 : i32 to index
    %c0_29 = arith.constant 0 : index
    %c0_30 = arith.constant 0 : index
    %72 = vector.load %arg14[%71, %c0_29, %c0_30] : memref<8x2x8xf32, #tpu.memory_space<vmem>>, vector<1x2x8xf32>
    %73 = vector.shape_cast %72 : vector<1x2x8xf32> to vector<2x8xf32>
    %74 = vector.shape_cast %29 : vector<2x8xf32> to vector<1x2x8xf32>
    tpu.vector_store %arg14[%71, %c0_29, %c0_30], %74 {strides = array<i32>} : memref<8x2x8xf32, #tpu.memory_space<vmem>>, vector<1x2x8xf32>,
    %c1_i32 = arith.constant 1 : i32
    %75 = vector.broadcast %12 : vector<1x32xf32> to vector<2x32xf32>
    %76 = arith.mulf %66, %75 : vector<2x32xf32>
    %cst_31 = arith.constant dense<0.000000e+00> : vector<2xf32>
    %77 = vector.multi_reduction <add>, %76, %cst_31 [1] : vector<2x32xf32> to vector<2xf32>
    %78 = vector.shape_cast %77 : vector<2xf32> to vector<2x1xf32>
    %79 = vector.broadcast %78 : vector<2x1xf32> to vector<2x8xf32>
    %80 = arith.addf %79, %8 : vector<2x8xf32>
    %cst_32 = arith.constant dense<0xFF800000> : vector<2xf32>
    %81 = vector.multi_reduction <maximumf>, %80, %cst_32 [1] : vector<2x8xf32> to vector<2xf32>
    %82 = vector.shape_cast %81 : vector<2xf32> to vector<2x1xf32>
    %83 = vector.broadcast %82 : vector<2x1xf32> to vector<2x8xf32>
    %84 = arith.subf %80, %83 : vector<2x8xf32>
    %85 = math.exp %84 : vector<2x8xf32>
    %cst_33 = arith.constant dense<0.000000e+00> : vector<2xf32>
    %86 = vector.multi_reduction <add>, %85, %cst_33 [1] : vector<2x8xf32> to vector<2xf32>
    %87 = vector.shape_cast %86 : vector<2xf32> to vector<2x1xf32>
    %88 = tpu.reciprocal %87 {approx = true} : vector<2x1xf32> -> vector<2x1xf32>
    %89 = vector.broadcast %88 : vector<2x1xf32> to vector<2x8xf32>
    %90 = arith.mulf %85, %89 : vector<2x8xf32>
    %91 = vector.shape_cast %90 : vector<2x8xf32> to vector<2x8x1xf32>
    %92 = vector.broadcast %91 : vector<2x8x1xf32> to vector<2x8x32xf32>
    %93 = arith.mulf %92, %0 : vector<2x8x32xf32>
    %cst_34 = arith.constant dense<0.000000e+00> : vector<2x32xf32>
    %94 = vector.multi_reduction <add>, %93, %cst_34 [1] : vector<2x8x32xf32> to vector<2x32xf32>
    %95 = arith.index_cast %c1_i32 : i32 to index
    %c0_35 = arith.constant 0 : index
    %c0_36 = arith.constant 0 : index
    %96 = vector.load %arg2[%95, %c0_35, %c0_36] : memref<8x2x32xf32, #tpu.memory_space<vmem>>, vector<1x2x32xf32>
    %97 = vector.shape_cast %96 : vector<1x2x32xf32> to vector<2x32xf32>
    %cst_37 = arith.constant dense<0.000000e+00> : vector<2x128xf32>
    %98 = tpu.matmul %66, %9, %cst_37 {dimension_numbers = #tpu.dot_dimension_numbers<[1], [0], [0], [1], [0, 0, 1, 1], [], []>} : vector<2x32xf32>, vector<32x128xf32>, vector<2x128xf32> -> vector<2x128xf32>
    %cst_38 = arith.constant dense<0.000000e+00> : vector<2x128xf32>
    %99 = tpu.matmul %97, %10, %cst_38 {dimension_numbers = #tpu.dot_dimension_numbers<[1], [0], [0], [1], [0, 0, 1, 1], [], []>} : vector<2x32xf32>, vector<32x128xf32>, vector<2x128xf32> -> vector<2x128xf32>
    %100 = arith.addf %98, %99 : vector<2x128xf32>
    %101 = vector.broadcast %11 : vector<1x128xf32> to vector<2x128xf32>
    %102 = arith.addf %100, %101 : vector<2x128xf32>
    %103 = vector.extract_strided_slice %102 {offsets = [0, 0], sizes = [2, 32], strides = [1, 1]} : vector<2x128xf32> to vector<2x32xf32>
    %104 = arith.negf %103 : vector<2x32xf32>
    %105 = math.exp %104 : vector<2x32xf32>
    %cst_39 = arith.constant 1.000000e+00 : f32
    %106 = vector.broadcast %cst_39 : f32 to vector<2x32xf32>
    %107 = arith.addf %106, %105 : vector<2x32xf32>
    %108 = arith.divf %106, %107 : vector<2x32xf32>
    %109 = vector.extract_strided_slice %102 {offsets = [0, 32], sizes = [2, 32], strides = [1, 1]} : vector<2x128xf32> to vector<2x32xf32>
    %110 = arith.negf %109 : vector<2x32xf32>
    %111 = math.exp %110 : vector<2x32xf32>
    %cst_40 = arith.constant 1.000000e+00 : f32
    %112 = vector.broadcast %cst_40 : f32 to vector<2x32xf32>
    %113 = arith.addf %112, %111 : vector<2x32xf32>
    %114 = arith.divf %112, %113 : vector<2x32xf32>
    %115 = vector.extract_strided_slice %102 {offsets = [0, 64], sizes = [2, 32], strides = [1, 1]} : vector<2x128xf32> to vector<2x32xf32>
    %116 = arith.negf %115 : vector<2x32xf32>
    %117 = math.exp %116 : vector<2x32xf32>
    %cst_41 = arith.constant 1.000000e+00 : f32
    %118 = vector.broadcast %cst_41 : f32 to vector<2x32xf32>
    %119 = arith.addf %118, %117 : vector<2x32xf32>
    %120 = arith.divf %118, %119 : vector<2x32xf32>
    %121 = vector.extract_strided_slice %102 {offsets = [0, 96], sizes = [2, 32], strides = [1, 1]} : vector<2x128xf32> to vector<2x32xf32>
    %122 = math.tanh %121 : vector<2x32xf32>
    %123 = arith.mulf %108, %94 : vector<2x32xf32>
    %124 = arith.mulf %114, %122 : vector<2x32xf32>
    %125 = arith.addf %123, %124 : vector<2x32xf32>
    %126 = math.tanh %125 : vector<2x32xf32>
    %127 = arith.mulf %120, %126 : vector<2x32xf32>
    %128 = arith.index_cast %c1_i32 : i32 to index
    %c0_42 = arith.constant 0 : index
    %c0_43 = arith.constant 0 : index
    %129 = vector.load %arg15[%128, %c0_42, %c0_43] : memref<8x2x32xf32, #tpu.memory_space<vmem>>, vector<1x2x32xf32>
    %130 = vector.shape_cast %129 : vector<1x2x32xf32> to vector<2x32xf32>
    %131 = vector.shape_cast %127 : vector<2x32xf32> to vector<1x2x32xf32>
    tpu.vector_store %arg15[%128, %c0_42, %c0_43], %131 {strides = array<i32>} : memref<8x2x32xf32, #tpu.memory_space<vmem>>, vector<1x2x32xf32>,
    %132 = arith.index_cast %c1_i32 : i32 to index
    %c0_44 = arith.constant 0 : index
    %c0_45 = arith.constant 0 : index
    %133 = vector.load %arg14[%132, %c0_44, %c0_45] : memref<8x2x8xf32, #tpu.memory_space<vmem>>, vector<1x2x8xf32>
    %134 = vector.shape_cast %133 : vector<1x2x8xf32> to vector<2x8xf32>
    %135 = vector.shape_cast %90 : vector<2x8xf32> to vector<1x2x8xf32>
    tpu.vector_store %arg14[%132, %c0_44, %c0_45], %135 {strides = array<i32>} : memref<8x2x8xf32, #tpu.memory_space<vmem>>, vector<1x2x8xf32>,
    %c2_i32 = arith.constant 2 : i32
    %136 = vector.broadcast %12 : vector<1x32xf32> to vector<2x32xf32>
    %137 = arith.mulf %127, %136 : vector<2x32xf32>
    %cst_46 = arith.constant dense<0.000000e+00> : vector<2xf32>
    %138 = vector.multi_reduction <add>, %137, %cst_46 [1] : vector<2x32xf32> to vector<2xf32>
    %139 = vector.shape_cast %138 : vector<2xf32> to vector<2x1xf32>
    %140 = vector.broadcast %139 : vector<2x1xf32> to vector<2x8xf32>
    %141 = arith.addf %140, %8 : vector<2x8xf32>
    %cst_47 = arith.constant dense<0xFF800000> : vector<2xf32>
    %142 = vector.multi_reduction <maximumf>, %141, %cst_47 [1] : vector<2x8xf32> to vector<2xf32>
    %143 = vector.shape_cast %142 : vector<2xf32> to vector<2x1xf32>
    %144 = vector.broadcast %143 : vector<2x1xf32> to vector<2x8xf32>
    %145 = arith.subf %141, %144 : vector<2x8xf32>
    %146 = math.exp %145 : vector<2x8xf32>
    %cst_48 = arith.constant dense<0.000000e+00> : vector<2xf32>
    %147 = vector.multi_reduction <add>, %146, %cst_48 [1] : vector<2x8xf32> to vector<2xf32>
    %148 = vector.shape_cast %147 : vector<2xf32> to vector<2x1xf32>
    %149 = tpu.reciprocal %148 {approx = true} : vector<2x1xf32> -> vector<2x1xf32>
    %150 = vector.broadcast %149 : vector<2x1xf32> to vector<2x8xf32>
    %151 = arith.mulf %146, %150 : vector<2x8xf32>
    %152 = vector.shape_cast %151 : vector<2x8xf32> to vector<2x8x1xf32>
    %153 = vector.broadcast %152 : vector<2x8x1xf32> to vector<2x8x32xf32>
    %154 = arith.mulf %153, %0 : vector<2x8x32xf32>
    %cst_49 = arith.constant dense<0.000000e+00> : vector<2x32xf32>
    %155 = vector.multi_reduction <add>, %154, %cst_49 [1] : vector<2x8x32xf32> to vector<2x32xf32>
    %156 = arith.index_cast %c2_i32 : i32 to index
    %c0_50 = arith.constant 0 : index
    %c0_51 = arith.constant 0 : index
    %157 = vector.load %arg2[%156, %c0_50, %c0_51] : memref<8x2x32xf32, #tpu.memory_space<vmem>>, vector<1x2x32xf32>
    %158 = vector.shape_cast %157 : vector<1x2x32xf32> to vector<2x32xf32>
    %cst_52 = arith.constant dense<0.000000e+00> : vector<2x128xf32>
    %159 = tpu.matmul %127, %9, %cst_52 {dimension_numbers = #tpu.dot_dimension_numbers<[1], [0], [0], [1], [0, 0, 1, 1], [], []>} : vector<2x32xf32>, vector<32x128xf32>, vector<2x128xf32> -> vector<2x128xf32>
    %cst_53 = arith.constant dense<0.000000e+00> : vector<2x128xf32>
    %160 = tpu.matmul %158, %10, %cst_53 {dimension_numbers = #tpu.dot_dimension_numbers<[1], [0], [0], [1], [0, 0, 1, 1], [], []>} : vector<2x32xf32>, vector<32x128xf32>, vector<2x128xf32> -> vector<2x128xf32>
    %161 = arith.addf %159, %160 : vector<2x128xf32>
    %162 = vector.broadcast %11 : vector<1x128xf32> to vector<2x128xf32>
    %163 = arith.addf %161, %162 : vector<2x128xf32>
    %164 = vector.extract_strided_slice %163 {offsets = [0, 0], sizes = [2, 32], strides = [1, 1]} : vector<2x128xf32> to vector<2x32xf32>
    %165 = arith.negf %164 : vector<2x32xf32>
    %166 = math.exp %165 : vector<2x32xf32>
    %cst_54 = arith.constant 1.000000e+00 : f32
    %167 = vector.broadcast %cst_54 : f32 to vector<2x32xf32>
    %168 = arith.addf %167, %166 : vector<2x32xf32>
    %169 = arith.divf %167, %168 : vector<2x32xf32>
    %170 = vector.extract_strided_slice %163 {offsets = [0, 32], sizes = [2, 32], strides = [1, 1]} : vector<2x128xf32> to vector<2x32xf32>
    %171 = arith.negf %170 : vector<2x32xf32>
    %172 = math.exp %171 : vector<2x32xf32>
    %cst_55 = arith.constant 1.000000e+00 : f32
    %173 = vector.broadcast %cst_55 : f32 to vector<2x32xf32>
    %174 = arith.addf %173, %172 : vector<2x32xf32>
    %175 = arith.divf %173, %174 : vector<2x32xf32>
    %176 = vector.extract_strided_slice %163 {offsets = [0, 64], sizes = [2, 32], strides = [1, 1]} : vector<2x128xf32> to vector<2x32xf32>
    %177 = arith.negf %176 : vector<2x32xf32>
    %178 = math.exp %177 : vector<2x32xf32>
    %cst_56 = arith.constant 1.000000e+00 : f32
    %179 = vector.broadcast %cst_56 : f32 to vector<2x32xf32>
    %180 = arith.addf %179, %178 : vector<2x32xf32>
    %181 = arith.divf %179, %180 : vector<2x32xf32>
    %182 = vector.extract_strided_slice %163 {offsets = [0, 96], sizes = [2, 32], strides = [1, 1]} : vector<2x128xf32> to vector<2x32xf32>
    %183 = math.tanh %182 : vector<2x32xf32>
    %184 = arith.mulf %169, %155 : vector<2x32xf32>
    %185 = arith.mulf %175, %183 : vector<2x32xf32>
    %186 = arith.addf %184, %185 : vector<2x32xf32>
    %187 = math.tanh %186 : vector<2x32xf32>
    %188 = arith.mulf %181, %187 : vector<2x32xf32>
    %189 = arith.index_cast %c2_i32 : i32 to index
    %c0_57 = arith.constant 0 : index
    %c0_58 = arith.constant 0 : index
    %190 = vector.load %arg15[%189, %c0_57, %c0_58] : memref<8x2x32xf32, #tpu.memory_space<vmem>>, vector<1x2x32xf32>
    %191 = vector.shape_cast %190 : vector<1x2x32xf32> to vector<2x32xf32>
    %192 = vector.shape_cast %188 : vector<2x32xf32> to vector<1x2x32xf32>
    tpu.vector_store %arg15[%189, %c0_57, %c0_58], %192 {strides = array<i32>} : memref<8x2x32xf32, #tpu.memory_space<vmem>>, vector<1x2x32xf32>,
    %193 = arith.index_cast %c2_i32 : i32 to index
    %c0_59 = arith.constant 0 : index
    %c0_60 = arith.constant 0 : index
    %194 = vector.load %arg14[%193, %c0_59, %c0_60] : memref<8x2x8xf32, #tpu.memory_space<vmem>>, vector<1x2x8xf32>
    %195 = vector.shape_cast %194 : vector<1x2x8xf32> to vector<2x8xf32>
    %196 = vector.shape_cast %151 : vector<2x8xf32> to vector<1x2x8xf32>
    tpu.vector_store %arg14[%193, %c0_59, %c0_60], %196 {strides = array<i32>} : memref<8x2x8xf32, #tpu.memory_space<vmem>>, vector<1x2x8xf32>,
    %c3_i32 = arith.constant 3 : i32
    %197 = vector.broadcast %12 : vector<1x32xf32> to vector<2x32xf32>
    %198 = arith.mulf %188, %197 : vector<2x32xf32>
    %cst_61 = arith.constant dense<0.000000e+00> : vector<2xf32>
    %199 = vector.multi_reduction <add>, %198, %cst_61 [1] : vector<2x32xf32> to vector<2xf32>
    %200 = vector.shape_cast %199 : vector<2xf32> to vector<2x1xf32>
    %201 = vector.broadcast %200 : vector<2x1xf32> to vector<2x8xf32>
    %202 = arith.addf %201, %8 : vector<2x8xf32>
    %cst_62 = arith.constant dense<0xFF800000> : vector<2xf32>
    %203 = vector.multi_reduction <maximumf>, %202, %cst_62 [1] : vector<2x8xf32> to vector<2xf32>
    %204 = vector.shape_cast %203 : vector<2xf32> to vector<2x1xf32>
    %205 = vector.broadcast %204 : vector<2x1xf32> to vector<2x8xf32>
    %206 = arith.subf %202, %205 : vector<2x8xf32>
    %207 = math.exp %206 : vector<2x8xf32>
    %cst_63 = arith.constant dense<0.000000e+00> : vector<2xf32>
    %208 = vector.multi_reduction <add>, %207, %cst_63 [1] : vector<2x8xf32> to vector<2xf32>
    %209 = vector.shape_cast %208 : vector<2xf32> to vector<2x1xf32>
    %210 = tpu.reciprocal %209 {approx = true} : vector<2x1xf32> -> vector<2x1xf32>
    %211 = vector.broadcast %210 : vector<2x1xf32> to vector<2x8xf32>
    %212 = arith.mulf %207, %211 : vector<2x8xf32>
    %213 = vector.shape_cast %212 : vector<2x8xf32> to vector<2x8x1xf32>
    %214 = vector.broadcast %213 : vector<2x8x1xf32> to vector<2x8x32xf32>
    %215 = arith.mulf %214, %0 : vector<2x8x32xf32>
    %cst_64 = arith.constant dense<0.000000e+00> : vector<2x32xf32>
    %216 = vector.multi_reduction <add>, %215, %cst_64 [1] : vector<2x8x32xf32> to vector<2x32xf32>
    %217 = arith.index_cast %c3_i32 : i32 to index
    %c0_65 = arith.constant 0 : index
    %c0_66 = arith.constant 0 : index
    %218 = vector.load %arg2[%217, %c0_65, %c0_66] : memref<8x2x32xf32, #tpu.memory_space<vmem>>, vector<1x2x32xf32>
    %219 = vector.shape_cast %218 : vector<1x2x32xf32> to vector<2x32xf32>
    %cst_67 = arith.constant dense<0.000000e+00> : vector<2x128xf32>
    %220 = tpu.matmul %188, %9, %cst_67 {dimension_numbers = #tpu.dot_dimension_numbers<[1], [0], [0], [1], [0, 0, 1, 1], [], []>} : vector<2x32xf32>, vector<32x128xf32>, vector<2x128xf32> -> vector<2x128xf32>
    %cst_68 = arith.constant dense<0.000000e+00> : vector<2x128xf32>
    %221 = tpu.matmul %219, %10, %cst_68 {dimension_numbers = #tpu.dot_dimension_numbers<[1], [0], [0], [1], [0, 0, 1, 1], [], []>} : vector<2x32xf32>, vector<32x128xf32>, vector<2x128xf32> -> vector<2x128xf32>
    %222 = arith.addf %220, %221 : vector<2x128xf32>
    %223 = vector.broadcast %11 : vector<1x128xf32> to vector<2x128xf32>
    %224 = arith.addf %222, %223 : vector<2x128xf32>
    %225 = vector.extract_strided_slice %224 {offsets = [0, 0], sizes = [2, 32], strides = [1, 1]} : vector<2x128xf32> to vector<2x32xf32>
    %226 = arith.negf %225 : vector<2x32xf32>
    %227 = math.exp %226 : vector<2x32xf32>
    %cst_69 = arith.constant 1.000000e+00 : f32
    %228 = vector.broadcast %cst_69 : f32 to vector<2x32xf32>
    %229 = arith.addf %228, %227 : vector<2x32xf32>
    %230 = arith.divf %228, %229 : vector<2x32xf32>
    %231 = vector.extract_strided_slice %224 {offsets = [0, 32], sizes = [2, 32], strides = [1, 1]} : vector<2x128xf32> to vector<2x32xf32>
    %232 = arith.negf %231 : vector<2x32xf32>
    %233 = math.exp %232 : vector<2x32xf32>
    %cst_70 = arith.constant 1.000000e+00 : f32
    %234 = vector.broadcast %cst_70 : f32 to vector<2x32xf32>
    %235 = arith.addf %234, %233 : vector<2x32xf32>
    %236 = arith.divf %234, %235 : vector<2x32xf32>
    %237 = vector.extract_strided_slice %224 {offsets = [0, 64], sizes = [2, 32], strides = [1, 1]} : vector<2x128xf32> to vector<2x32xf32>
    %238 = arith.negf %237 : vector<2x32xf32>
    %239 = math.exp %238 : vector<2x32xf32>
    %cst_71 = arith.constant 1.000000e+00 : f32
    %240 = vector.broadcast %cst_71 : f32 to vector<2x32xf32>
    %241 = arith.addf %240, %239 : vector<2x32xf32>
    %242 = arith.divf %240, %241 : vector<2x32xf32>
    %243 = vector.extract_strided_slice %224 {offsets = [0, 96], sizes = [2, 32], strides = [1, 1]} : vector<2x128xf32> to vector<2x32xf32>
    %244 = math.tanh %243 : vector<2x32xf32>
    %245 = arith.mulf %230, %216 : vector<2x32xf32>
    %246 = arith.mulf %236, %244 : vector<2x32xf32>
    %247 = arith.addf %245, %246 : vector<2x32xf32>
    %248 = math.tanh %247 : vector<2x32xf32>
    %249 = arith.mulf %242, %248 : vector<2x32xf32>
    %250 = arith.index_cast %c3_i32 : i32 to index
    %c0_72 = arith.constant 0 : index
    %c0_73 = arith.constant 0 : index
    %251 = vector.load %arg15[%250, %c0_72, %c0_73] : memref<8x2x32xf32, #tpu.memory_space<vmem>>, vector<1x2x32xf32>
    %252 = vector.shape_cast %251 : vector<1x2x32xf32> to vector<2x32xf32>
    %253 = vector.shape_cast %249 : vector<2x32xf32> to vector<1x2x32xf32>
    tpu.vector_store %arg15[%250, %c0_72, %c0_73], %253 {strides = array<i32>} : memref<8x2x32xf32, #tpu.memory_space<vmem>>, vector<1x2x32xf32>,
    %254 = arith.index_cast %c3_i32 : i32 to index
    %c0_74 = arith.constant 0 : index
    %c0_75 = arith.constant 0 : index
    %255 = vector.load %arg14[%254, %c0_74, %c0_75] : memref<8x2x8xf32, #tpu.memory_space<vmem>>, vector<1x2x8xf32>
    %256 = vector.shape_cast %255 : vector<1x2x8xf32> to vector<2x8xf32>
    %257 = vector.shape_cast %212 : vector<2x8xf32> to vector<1x2x8xf32>
    tpu.vector_store %arg14[%254, %c0_74, %c0_75], %257 {strides = array<i32>} : memref<8x2x8xf32, #tpu.memory_space<vmem>>, vector<1x2x8xf32>,
    %c4_i32 = arith.constant 4 : i32
    %258 = vector.broadcast %12 : vector<1x32xf32> to vector<2x32xf32>
    %259 = arith.mulf %249, %258 : vector<2x32xf32>
    %cst_76 = arith.constant dense<0.000000e+00> : vector<2xf32>
    %260 = vector.multi_reduction <add>, %259, %cst_76 [1] : vector<2x32xf32> to vector<2xf32>
    %261 = vector.shape_cast %260 : vector<2xf32> to vector<2x1xf32>
    %262 = vector.broadcast %261 : vector<2x1xf32> to vector<2x8xf32>
    %263 = arith.addf %262, %8 : vector<2x8xf32>
    %cst_77 = arith.constant dense<0xFF800000> : vector<2xf32>
    %264 = vector.multi_reduction <maximumf>, %263, %cst_77 [1] : vector<2x8xf32> to vector<2xf32>
    %265 = vector.shape_cast %264 : vector<2xf32> to vector<2x1xf32>
    %266 = vector.broadcast %265 : vector<2x1xf32> to vector<2x8xf32>
    %267 = arith.subf %263, %266 : vector<2x8xf32>
    %268 = math.exp %267 : vector<2x8xf32>
    %cst_78 = arith.constant dense<0.000000e+00> : vector<2xf32>
    %269 = vector.multi_reduction <add>, %268, %cst_78 [1] : vector<2x8xf32> to vector<2xf32>
    %270 = vector.shape_cast %269 : vector<2xf32> to vector<2x1xf32>
    %271 = tpu.reciprocal %270 {approx = true} : vector<2x1xf32> -> vector<2x1xf32>
    %272 = vector.broadcast %271 : vector<2x1xf32> to vector<2x8xf32>
    %273 = arith.mulf %268, %272 : vector<2x8xf32>
    %274 = vector.shape_cast %273 : vector<2x8xf32> to vector<2x8x1xf32>
    %275 = vector.broadcast %274 : vector<2x8x1xf32> to vector<2x8x32xf32>
    %276 = arith.mulf %275, %0 : vector<2x8x32xf32>
    %cst_79 = arith.constant dense<0.000000e+00> : vector<2x32xf32>
    %277 = vector.multi_reduction <add>, %276, %cst_79 [1] : vector<2x8x32xf32> to vector<2x32xf32>
    %278 = arith.index_cast %c4_i32 : i32 to index
    %c0_80 = arith.constant 0 : index
    %c0_81 = arith.constant 0 : index
    %279 = vector.load %arg2[%278, %c0_80, %c0_81] : memref<8x2x32xf32, #tpu.memory_space<vmem>>, vector<1x2x32xf32>
    %280 = vector.shape_cast %279 : vector<1x2x32xf32> to vector<2x32xf32>
    %cst_82 = arith.constant dense<0.000000e+00> : vector<2x128xf32>
    %281 = tpu.matmul %249, %9, %cst_82 {dimension_numbers = #tpu.dot_dimension_numbers<[1], [0], [0], [1], [0, 0, 1, 1], [], []>} : vector<2x32xf32>, vector<32x128xf32>, vector<2x128xf32> -> vector<2x128xf32>
    %cst_83 = arith.constant dense<0.000000e+00> : vector<2x128xf32>
    %282 = tpu.matmul %280, %10, %cst_83 {dimension_numbers = #tpu.dot_dimension_numbers<[1], [0], [0], [1], [0, 0, 1, 1], [], []>} : vector<2x32xf32>, vector<32x128xf32>, vector<2x128xf32> -> vector<2x128xf32>
    %283 = arith.addf %281, %282 : vector<2x128xf32>
    %284 = vector.broadcast %11 : vector<1x128xf32> to vector<2x128xf32>
    %285 = arith.addf %283, %284 : vector<2x128xf32>
    %286 = vector.extract_strided_slice %285 {offsets = [0, 0], sizes = [2, 32], strides = [1, 1]} : vector<2x128xf32> to vector<2x32xf32>
    %287 = arith.negf %286 : vector<2x32xf32>
    %288 = math.exp %287 : vector<2x32xf32>
    %cst_84 = arith.constant 1.000000e+00 : f32
    %289 = vector.broadcast %cst_84 : f32 to vector<2x32xf32>
    %290 = arith.addf %289, %288 : vector<2x32xf32>
    %291 = arith.divf %289, %290 : vector<2x32xf32>
    %292 = vector.extract_strided_slice %285 {offsets = [0, 32], sizes = [2, 32], strides = [1, 1]} : vector<2x128xf32> to vector<2x32xf32>
    %293 = arith.negf %292 : vector<2x32xf32>
    %294 = math.exp %293 : vector<2x32xf32>
    %cst_85 = arith.constant 1.000000e+00 : f32
    %295 = vector.broadcast %cst_85 : f32 to vector<2x32xf32>
    %296 = arith.addf %295, %294 : vector<2x32xf32>
    %297 = arith.divf %295, %296 : vector<2x32xf32>
    %298 = vector.extract_strided_slice %285 {offsets = [0, 64], sizes = [2, 32], strides = [1, 1]} : vector<2x128xf32> to vector<2x32xf32>
    %299 = arith.negf %298 : vector<2x32xf32>
    %300 = math.exp %299 : vector<2x32xf32>
    %cst_86 = arith.constant 1.000000e+00 : f32
    %301 = vector.broadcast %cst_86 : f32 to vector<2x32xf32>
    %302 = arith.addf %301, %300 : vector<2x32xf32>
    %303 = arith.divf %301, %302 : vector<2x32xf32>
    %304 = vector.extract_strided_slice %285 {offsets = [0, 96], sizes = [2, 32], strides = [1, 1]} : vector<2x128xf32> to vector<2x32xf32>
    %305 = math.tanh %304 : vector<2x32xf32>
    %306 = arith.mulf %291, %277 : vector<2x32xf32>
    %307 = arith.mulf %297, %305 : vector<2x32xf32>
    %308 = arith.addf %306, %307 : vector<2x32xf32>
    %309 = math.tanh %308 : vector<2x32xf32>
    %310 = arith.mulf %303, %309 : vector<2x32xf32>
    %311 = arith.index_cast %c4_i32 : i32 to index
    %c0_87 = arith.constant 0 : index
    %c0_88 = arith.constant 0 : index
    %312 = vector.load %arg15[%311, %c0_87, %c0_88] : memref<8x2x32xf32, #tpu.memory_space<vmem>>, vector<1x2x32xf32>
    %313 = vector.shape_cast %312 : vector<1x2x32xf32> to vector<2x32xf32>
    %314 = vector.shape_cast %310 : vector<2x32xf32> to vector<1x2x32xf32>
    tpu.vector_store %arg15[%311, %c0_87, %c0_88], %314 {strides = array<i32>} : memref<8x2x32xf32, #tpu.memory_space<vmem>>, vector<1x2x32xf32>,
    %315 = arith.index_cast %c4_i32 : i32 to index
    %c0_89 = arith.constant 0 : index
    %c0_90 = arith.constant 0 : index
    %316 = vector.load %arg14[%315, %c0_89, %c0_90] : memref<8x2x8xf32, #tpu.memory_space<vmem>>, vector<1x2x8xf32>
    %317 = vector.shape_cast %316 : vector<1x2x8xf32> to vector<2x8xf32>
    %318 = vector.shape_cast %273 : vector<2x8xf32> to vector<1x2x8xf32>
    tpu.vector_store %arg14[%315, %c0_89, %c0_90], %318 {strides = array<i32>} : memref<8x2x8xf32, #tpu.memory_space<vmem>>, vector<1x2x8xf32>,
    %c5_i32 = arith.constant 5 : i32
    %319 = vector.broadcast %12 : vector<1x32xf32> to vector<2x32xf32>
    %320 = arith.mulf %310, %319 : vector<2x32xf32>
    %cst_91 = arith.constant dense<0.000000e+00> : vector<2xf32>
    %321 = vector.multi_reduction <add>, %320, %cst_91 [1] : vector<2x32xf32> to vector<2xf32>
    %322 = vector.shape_cast %321 : vector<2xf32> to vector<2x1xf32>
    %323 = vector.broadcast %322 : vector<2x1xf32> to vector<2x8xf32>
    %324 = arith.addf %323, %8 : vector<2x8xf32>
    %cst_92 = arith.constant dense<0xFF800000> : vector<2xf32>
    %325 = vector.multi_reduction <maximumf>, %324, %cst_92 [1] : vector<2x8xf32> to vector<2xf32>
    %326 = vector.shape_cast %325 : vector<2xf32> to vector<2x1xf32>
    %327 = vector.broadcast %326 : vector<2x1xf32> to vector<2x8xf32>
    %328 = arith.subf %324, %327 : vector<2x8xf32>
    %329 = math.exp %328 : vector<2x8xf32>
    %cst_93 = arith.constant dense<0.000000e+00> : vector<2xf32>
    %330 = vector.multi_reduction <add>, %329, %cst_93 [1] : vector<2x8xf32> to vector<2xf32>
    %331 = vector.shape_cast %330 : vector<2xf32> to vector<2x1xf32>
    %332 = tpu.reciprocal %331 {approx = true} : vector<2x1xf32> -> vector<2x1xf32>
    %333 = vector.broadcast %332 : vector<2x1xf32> to vector<2x8xf32>
    %334 = arith.mulf %329, %333 : vector<2x8xf32>
    %335 = vector.shape_cast %334 : vector<2x8xf32> to vector<2x8x1xf32>
    %336 = vector.broadcast %335 : vector<2x8x1xf32> to vector<2x8x32xf32>
    %337 = arith.mulf %336, %0 : vector<2x8x32xf32>
    %cst_94 = arith.constant dense<0.000000e+00> : vector<2x32xf32>
    %338 = vector.multi_reduction <add>, %337, %cst_94 [1] : vector<2x8x32xf32> to vector<2x32xf32>
    %339 = arith.index_cast %c5_i32 : i32 to index
    %c0_95 = arith.constant 0 : index
    %c0_96 = arith.constant 0 : index
    %340 = vector.load %arg2[%339, %c0_95, %c0_96] : memref<8x2x32xf32, #tpu.memory_space<vmem>>, vector<1x2x32xf32>
    %341 = vector.shape_cast %340 : vector<1x2x32xf32> to vector<2x32xf32>
    %cst_97 = arith.constant dense<0.000000e+00> : vector<2x128xf32>
    %342 = tpu.matmul %310, %9, %cst_97 {dimension_numbers = #tpu.dot_dimension_numbers<[1], [0], [0], [1], [0, 0, 1, 1], [], []>} : vector<2x32xf32>, vector<32x128xf32>, vector<2x128xf32> -> vector<2x128xf32>
    %cst_98 = arith.constant dense<0.000000e+00> : vector<2x128xf32>
    %343 = tpu.matmul %341, %10, %cst_98 {dimension_numbers = #tpu.dot_dimension_numbers<[1], [0], [0], [1], [0, 0, 1, 1], [], []>} : vector<2x32xf32>, vector<32x128xf32>, vector<2x128xf32> -> vector<2x128xf32>
    %344 = arith.addf %342, %343 : vector<2x128xf32>
    %345 = vector.broadcast %11 : vector<1x128xf32> to vector<2x128xf32>
    %346 = arith.addf %344, %345 : vector<2x128xf32>
    %347 = vector.extract_strided_slice %346 {offsets = [0, 0], sizes = [2, 32], strides = [1, 1]} : vector<2x128xf32> to vector<2x32xf32>
    %348 = arith.negf %347 : vector<2x32xf32>
    %349 = math.exp %348 : vector<2x32xf32>
    %cst_99 = arith.constant 1.000000e+00 : f32
    %350 = vector.broadcast %cst_99 : f32 to vector<2x32xf32>
    %351 = arith.addf %350, %349 : vector<2x32xf32>
    %352 = arith.divf %350, %351 : vector<2x32xf32>
    %353 = vector.extract_strided_slice %346 {offsets = [0, 32], sizes = [2, 32], strides = [1, 1]} : vector<2x128xf32> to vector<2x32xf32>
    %354 = arith.negf %353 : vector<2x32xf32>
    %355 = math.exp %354 : vector<2x32xf32>
    %cst_100 = arith.constant 1.000000e+00 : f32
    %356 = vector.broadcast %cst_100 : f32 to vector<2x32xf32>
    %357 = arith.addf %356, %355 : vector<2x32xf32>
    %358 = arith.divf %356, %357 : vector<2x32xf32>
    %359 = vector.extract_strided_slice %346 {offsets = [0, 64], sizes = [2, 32], strides = [1, 1]} : vector<2x128xf32> to vector<2x32xf32>
    %360 = arith.negf %359 : vector<2x32xf32>
    %361 = math.exp %360 : vector<2x32xf32>
    %cst_101 = arith.constant 1.000000e+00 : f32
    %362 = vector.broadcast %cst_101 : f32 to vector<2x32xf32>
    %363 = arith.addf %362, %361 : vector<2x32xf32>
    %364 = arith.divf %362, %363 : vector<2x32xf32>
    %365 = vector.extract_strided_slice %346 {offsets = [0, 96], sizes = [2, 32], strides = [1, 1]} : vector<2x128xf32> to vector<2x32xf32>
    %366 = math.tanh %365 : vector<2x32xf32>
    %367 = arith.mulf %352, %338 : vector<2x32xf32>
    %368 = arith.mulf %358, %366 : vector<2x32xf32>
    %369 = arith.addf %367, %368 : vector<2x32xf32>
    %370 = math.tanh %369 : vector<2x32xf32>
    %371 = arith.mulf %364, %370 : vector<2x32xf32>
    %372 = arith.index_cast %c5_i32 : i32 to index
    %c0_102 = arith.constant 0 : index
    %c0_103 = arith.constant 0 : index
    %373 = vector.load %arg15[%372, %c0_102, %c0_103] : memref<8x2x32xf32, #tpu.memory_space<vmem>>, vector<1x2x32xf32>
    %374 = vector.shape_cast %373 : vector<1x2x32xf32> to vector<2x32xf32>
    %375 = vector.shape_cast %371 : vector<2x32xf32> to vector<1x2x32xf32>
    tpu.vector_store %arg15[%372, %c0_102, %c0_103], %375 {strides = array<i32>} : memref<8x2x32xf32, #tpu.memory_space<vmem>>, vector<1x2x32xf32>,
    %376 = arith.index_cast %c5_i32 : i32 to index
    %c0_104 = arith.constant 0 : index
    %c0_105 = arith.constant 0 : index
    %377 = vector.load %arg14[%376, %c0_104, %c0_105] : memref<8x2x8xf32, #tpu.memory_space<vmem>>, vector<1x2x8xf32>
    %378 = vector.shape_cast %377 : vector<1x2x8xf32> to vector<2x8xf32>
    %379 = vector.shape_cast %334 : vector<2x8xf32> to vector<1x2x8xf32>
    tpu.vector_store %arg14[%376, %c0_104, %c0_105], %379 {strides = array<i32>} : memref<8x2x8xf32, #tpu.memory_space<vmem>>, vector<1x2x8xf32>,
    %c6_i32 = arith.constant 6 : i32
    %380 = vector.broadcast %12 : vector<1x32xf32> to vector<2x32xf32>
    %381 = arith.mulf %371, %380 : vector<2x32xf32>
    %cst_106 = arith.constant dense<0.000000e+00> : vector<2xf32>
    %382 = vector.multi_reduction <add>, %381, %cst_106 [1] : vector<2x32xf32> to vector<2xf32>
    %383 = vector.shape_cast %382 : vector<2xf32> to vector<2x1xf32>
    %384 = vector.broadcast %383 : vector<2x1xf32> to vector<2x8xf32>
    %385 = arith.addf %384, %8 : vector<2x8xf32>
    %cst_107 = arith.constant dense<0xFF800000> : vector<2xf32>
    %386 = vector.multi_reduction <maximumf>, %385, %cst_107 [1] : vector<2x8xf32> to vector<2xf32>
    %387 = vector.shape_cast %386 : vector<2xf32> to vector<2x1xf32>
    %388 = vector.broadcast %387 : vector<2x1xf32> to vector<2x8xf32>
    %389 = arith.subf %385, %388 : vector<2x8xf32>
    %390 = math.exp %389 : vector<2x8xf32>
    %cst_108 = arith.constant dense<0.000000e+00> : vector<2xf32>
    %391 = vector.multi_reduction <add>, %390, %cst_108 [1] : vector<2x8xf32> to vector<2xf32>
    %392 = vector.shape_cast %391 : vector<2xf32> to vector<2x1xf32>
    %393 = tpu.reciprocal %392 {approx = true} : vector<2x1xf32> -> vector<2x1xf32>
    %394 = vector.broadcast %393 : vector<2x1xf32> to vector<2x8xf32>
    %395 = arith.mulf %390, %394 : vector<2x8xf32>
    %396 = vector.shape_cast %395 : vector<2x8xf32> to vector<2x8x1xf32>
    %397 = vector.broadcast %396 : vector<2x8x1xf32> to vector<2x8x32xf32>
    %398 = arith.mulf %397, %0 : vector<2x8x32xf32>
    %cst_109 = arith.constant dense<0.000000e+00> : vector<2x32xf32>
    %399 = vector.multi_reduction <add>, %398, %cst_109 [1] : vector<2x8x32xf32> to vector<2x32xf32>
    %400 = arith.index_cast %c6_i32 : i32 to index
    %c0_110 = arith.constant 0 : index
    %c0_111 = arith.constant 0 : index
    %401 = vector.load %arg2[%400, %c0_110, %c0_111] : memref<8x2x32xf32, #tpu.memory_space<vmem>>, vector<1x2x32xf32>
    %402 = vector.shape_cast %401 : vector<1x2x32xf32> to vector<2x32xf32>
    %cst_112 = arith.constant dense<0.000000e+00> : vector<2x128xf32>
    %403 = tpu.matmul %371, %9, %cst_112 {dimension_numbers = #tpu.dot_dimension_numbers<[1], [0], [0], [1], [0, 0, 1, 1], [], []>} : vector<2x32xf32>, vector<32x128xf32>, vector<2x128xf32> -> vector<2x128xf32>
    %cst_113 = arith.constant dense<0.000000e+00> : vector<2x128xf32>
    %404 = tpu.matmul %402, %10, %cst_113 {dimension_numbers = #tpu.dot_dimension_numbers<[1], [0], [0], [1], [0, 0, 1, 1], [], []>} : vector<2x32xf32>, vector<32x128xf32>, vector<2x128xf32> -> vector<2x128xf32>
    %405 = arith.addf %403, %404 : vector<2x128xf32>
    %406 = vector.broadcast %11 : vector<1x128xf32> to vector<2x128xf32>
    %407 = arith.addf %405, %406 : vector<2x128xf32>
    %408 = vector.extract_strided_slice %407 {offsets = [0, 0], sizes = [2, 32], strides = [1, 1]} : vector<2x128xf32> to vector<2x32xf32>
    %409 = arith.negf %408 : vector<2x32xf32>
    %410 = math.exp %409 : vector<2x32xf32>
    %cst_114 = arith.constant 1.000000e+00 : f32
    %411 = vector.broadcast %cst_114 : f32 to vector<2x32xf32>
    %412 = arith.addf %411, %410 : vector<2x32xf32>
    %413 = arith.divf %411, %412 : vector<2x32xf32>
    %414 = vector.extract_strided_slice %407 {offsets = [0, 32], sizes = [2, 32], strides = [1, 1]} : vector<2x128xf32> to vector<2x32xf32>
    %415 = arith.negf %414 : vector<2x32xf32>
    %416 = math.exp %415 : vector<2x32xf32>
    %cst_115 = arith.constant 1.000000e+00 : f32
    %417 = vector.broadcast %cst_115 : f32 to vector<2x32xf32>
    %418 = arith.addf %417, %416 : vector<2x32xf32>
    %419 = arith.divf %417, %418 : vector<2x32xf32>
    %420 = vector.extract_strided_slice %407 {offsets = [0, 64], sizes = [2, 32], strides = [1, 1]} : vector<2x128xf32> to vector<2x32xf32>
    %421 = arith.negf %420 : vector<2x32xf32>
    %422 = math.exp %421 : vector<2x32xf32>
    %cst_116 = arith.constant 1.000000e+00 : f32
    %423 = vector.broadcast %cst_116 : f32 to vector<2x32xf32>
    %424 = arith.addf %423, %422 : vector<2x32xf32>
    %425 = arith.divf %423, %424 : vector<2x32xf32>
    %426 = vector.extract_strided_slice %407 {offsets = [0, 96], sizes = [2, 32], strides = [1, 1]} : vector<2x128xf32> to vector<2x32xf32>
    %427 = math.tanh %426 : vector<2x32xf32>
    %428 = arith.mulf %413, %399 : vector<2x32xf32>
    %429 = arith.mulf %419, %427 : vector<2x32xf32>
    %430 = arith.addf %428, %429 : vector<2x32xf32>
    %431 = math.tanh %430 : vector<2x32xf32>
    %432 = arith.mulf %425, %431 : vector<2x32xf32>
    %433 = arith.index_cast %c6_i32 : i32 to index
    %c0_117 = arith.constant 0 : index
    %c0_118 = arith.constant 0 : index
    %434 = vector.load %arg15[%433, %c0_117, %c0_118] : memref<8x2x32xf32, #tpu.memory_space<vmem>>, vector<1x2x32xf32>
    %435 = vector.shape_cast %434 : vector<1x2x32xf32> to vector<2x32xf32>
    %436 = vector.shape_cast %432 : vector<2x32xf32> to vector<1x2x32xf32>
    tpu.vector_store %arg15[%433, %c0_117, %c0_118], %436 {strides = array<i32>} : memref<8x2x32xf32, #tpu.memory_space<vmem>>, vector<1x2x32xf32>,
    %437 = arith.index_cast %c6_i32 : i32 to index
    %c0_119 = arith.constant 0 : index
    %c0_120 = arith.constant 0 : index
    %438 = vector.load %arg14[%437, %c0_119, %c0_120] : memref<8x2x8xf32, #tpu.memory_space<vmem>>, vector<1x2x8xf32>
    %439 = vector.shape_cast %438 : vector<1x2x8xf32> to vector<2x8xf32>
    %440 = vector.shape_cast %395 : vector<2x8xf32> to vector<1x2x8xf32>
    tpu.vector_store %arg14[%437, %c0_119, %c0_120], %440 {strides = array<i32>} : memref<8x2x8xf32, #tpu.memory_space<vmem>>, vector<1x2x8xf32>,
    %c7_i32 = arith.constant 7 : i32
    %441 = vector.broadcast %12 : vector<1x32xf32> to vector<2x32xf32>
    %442 = arith.mulf %432, %441 : vector<2x32xf32>
    %cst_121 = arith.constant dense<0.000000e+00> : vector<2xf32>
    %443 = vector.multi_reduction <add>, %442, %cst_121 [1] : vector<2x32xf32> to vector<2xf32>
    %444 = vector.shape_cast %443 : vector<2xf32> to vector<2x1xf32>
    %445 = vector.broadcast %444 : vector<2x1xf32> to vector<2x8xf32>
    %446 = arith.addf %445, %8 : vector<2x8xf32>
    %cst_122 = arith.constant dense<0xFF800000> : vector<2xf32>
    %447 = vector.multi_reduction <maximumf>, %446, %cst_122 [1] : vector<2x8xf32> to vector<2xf32>
    %448 = vector.shape_cast %447 : vector<2xf32> to vector<2x1xf32>
    %449 = vector.broadcast %448 : vector<2x1xf32> to vector<2x8xf32>
    %450 = arith.subf %446, %449 : vector<2x8xf32>
    %451 = math.exp %450 : vector<2x8xf32>
    %cst_123 = arith.constant dense<0.000000e+00> : vector<2xf32>
    %452 = vector.multi_reduction <add>, %451, %cst_123 [1] : vector<2x8xf32> to vector<2xf32>
    %453 = vector.shape_cast %452 : vector<2xf32> to vector<2x1xf32>
    %454 = tpu.reciprocal %453 {approx = true} : vector<2x1xf32> -> vector<2x1xf32>
    %455 = vector.broadcast %454 : vector<2x1xf32> to vector<2x8xf32>
    %456 = arith.mulf %451, %455 : vector<2x8xf32>
    %457 = vector.shape_cast %456 : vector<2x8xf32> to vector<2x8x1xf32>
    %458 = vector.broadcast %457 : vector<2x8x1xf32> to vector<2x8x32xf32>
    %459 = arith.mulf %458, %0 : vector<2x8x32xf32>
    %cst_124 = arith.constant dense<0.000000e+00> : vector<2x32xf32>
    %460 = vector.multi_reduction <add>, %459, %cst_124 [1] : vector<2x8x32xf32> to vector<2x32xf32>
    %461 = arith.index_cast %c7_i32 : i32 to index
    %c0_125 = arith.constant 0 : index
    %c0_126 = arith.constant 0 : index
    %462 = vector.load %arg2[%461, %c0_125, %c0_126] : memref<8x2x32xf32, #tpu.memory_space<vmem>>, vector<1x2x32xf32>
    %463 = vector.shape_cast %462 : vector<1x2x32xf32> to vector<2x32xf32>
    %cst_127 = arith.constant dense<0.000000e+00> : vector<2x128xf32>
    %464 = tpu.matmul %432, %9, %cst_127 {dimension_numbers = #tpu.dot_dimension_numbers<[1], [0], [0], [1], [0, 0, 1, 1], [], []>} : vector<2x32xf32>, vector<32x128xf32>, vector<2x128xf32> -> vector<2x128xf32>
    %cst_128 = arith.constant dense<0.000000e+00> : vector<2x128xf32>
    %465 = tpu.matmul %463, %10, %cst_128 {dimension_numbers = #tpu.dot_dimension_numbers<[1], [0], [0], [1], [0, 0, 1, 1], [], []>} : vector<2x32xf32>, vector<32x128xf32>, vector<2x128xf32> -> vector<2x128xf32>
    %466 = arith.addf %464, %465 : vector<2x128xf32>
    %467 = vector.broadcast %11 : vector<1x128xf32> to vector<2x128xf32>
    %468 = arith.addf %466, %467 : vector<2x128xf32>
    %469 = vector.extract_strided_slice %468 {offsets = [0, 0], sizes = [2, 32], strides = [1, 1]} : vector<2x128xf32> to vector<2x32xf32>
    %470 = arith.negf %469 : vector<2x32xf32>
    %471 = math.exp %470 : vector<2x32xf32>
    %cst_129 = arith.constant 1.000000e+00 : f32
    %472 = vector.broadcast %cst_129 : f32 to vector<2x32xf32>
    %473 = arith.addf %472, %471 : vector<2x32xf32>
    %474 = arith.divf %472, %473 : vector<2x32xf32>
    %475 = vector.extract_strided_slice %468 {offsets = [0, 32], sizes = [2, 32], strides = [1, 1]} : vector<2x128xf32> to vector<2x32xf32>
    %476 = arith.negf %475 : vector<2x32xf32>
    %477 = math.exp %476 : vector<2x32xf32>
    %cst_130 = arith.constant 1.000000e+00 : f32
    %478 = vector.broadcast %cst_130 : f32 to vector<2x32xf32>
    %479 = arith.addf %478, %477 : vector<2x32xf32>
    %480 = arith.divf %478, %479 : vector<2x32xf32>
    %481 = vector.extract_strided_slice %468 {offsets = [0, 64], sizes = [2, 32], strides = [1, 1]} : vector<2x128xf32> to vector<2x32xf32>
    %482 = arith.negf %481 : vector<2x32xf32>
    %483 = math.exp %482 : vector<2x32xf32>
    %cst_131 = arith.constant 1.000000e+00 : f32
    %484 = vector.broadcast %cst_131 : f32 to vector<2x32xf32>
    %485 = arith.addf %484, %483 : vector<2x32xf32>
    %486 = arith.divf %484, %485 : vector<2x32xf32>
    %487 = vector.extract_strided_slice %468 {offsets = [0, 96], sizes = [2, 32], strides = [1, 1]} : vector<2x128xf32> to vector<2x32xf32>
    %488 = math.tanh %487 : vector<2x32xf32>
    %489 = arith.mulf %474, %460 : vector<2x32xf32>
    %490 = arith.mulf %480, %488 : vector<2x32xf32>
    %491 = arith.addf %489, %490 : vector<2x32xf32>
    %492 = math.tanh %491 : vector<2x32xf32>
    %493 = arith.mulf %486, %492 : vector<2x32xf32>
    %494 = arith.index_cast %c7_i32 : i32 to index
    %c0_132 = arith.constant 0 : index
    %c0_133 = arith.constant 0 : index
    %495 = vector.load %arg15[%494, %c0_132, %c0_133] : memref<8x2x32xf32, #tpu.memory_space<vmem>>, vector<1x2x32xf32>
    %496 = vector.shape_cast %495 : vector<1x2x32xf32> to vector<2x32xf32>
    %497 = vector.shape_cast %493 : vector<2x32xf32> to vector<1x2x32xf32>
    tpu.vector_store %arg15[%494, %c0_132, %c0_133], %497 {strides = array<i32>} : memref<8x2x32xf32, #tpu.memory_space<vmem>>, vector<1x2x32xf32>,
    %498 = arith.index_cast %c7_i32 : i32 to index
    %c0_134 = arith.constant 0 : index
    %c0_135 = arith.constant 0 : index
    %499 = vector.load %arg14[%498, %c0_134, %c0_135] : memref<8x2x8xf32, #tpu.memory_space<vmem>>, vector<1x2x8xf32>
    %500 = vector.shape_cast %499 : vector<1x2x8xf32> to vector<2x8xf32>
    %501 = vector.shape_cast %456 : vector<2x8xf32> to vector<1x2x8xf32>
    tpu.vector_store %arg14[%498, %c0_134, %c0_135], %501 {strides = array<i32>} : memref<8x2x8xf32, #tpu.memory_space<vmem>>, vector<1x2x8xf32>,
    %c8_i32 = arith.constant 8 : i32
    %c0_136 = arith.constant 0 : index
    %c0_137 = arith.constant 0 : index
    %c0_138 = arith.constant 0 : index
    %502 = vector.load %arg15[%c0_136, %c0_137, %c0_138] : memref<8x2x32xf32, #tpu.memory_space<vmem>>, vector<8x2x32xf32>
    %503 = vector.shape_cast %502 : vector<8x2x32xf32> to vector<16x32xf32>
    %c0_139 = arith.constant 0 : index
    %c0_140 = arith.constant 0 : index
    %504 = vector.load %arg9[%c0_139, %c0_140] : memref<32x24xf32, #tpu.memory_space<vmem>>, vector<32x24xf32>
    %cst_141 = arith.constant dense<0.000000e+00> : vector<16x24xf32>
    %505 = tpu.matmul %503, %504, %cst_141 {dimension_numbers = #tpu.dot_dimension_numbers<[1], [0], [0], [1], [0, 0, 1, 1], [], []>} : vector<16x32xf32>, vector<32x24xf32>, vector<16x24xf32> -> vector<16x24xf32>
    %c0_142 = arith.constant 0 : index
    %c0_143 = arith.constant 0 : index
    %506 = vector.load %arg10[%c0_142, %c0_143] : memref<1x24xf32, #tpu.memory_space<vmem>>, vector<1x24xf32>
    %507 = vector.broadcast %506 : vector<1x24xf32> to vector<16x24xf32>
    %508 = arith.addf %505, %507 : vector<16x24xf32>
    %c0_144 = arith.constant 0 : index
    %c0_145 = arith.constant 0 : index
    %509 = vector.load %arg11[%c0_144, %c0_145] : memref<24x128xf32, #tpu.memory_space<vmem>>, vector<24x128xf32>
    %cst_146 = arith.constant dense<0.000000e+00> : vector<16x128xf32>
    %510 = tpu.matmul %508, %509, %cst_146 {dimension_numbers = #tpu.dot_dimension_numbers<[1], [0], [0], [1], [0, 0, 1, 1], [], []>} : vector<16x24xf32>, vector<24x128xf32>, vector<16x128xf32> -> vector<16x128xf32>
    %c0_147 = arith.constant 0 : index
    %c0_148 = arith.constant 0 : index
    %511 = vector.load %arg12[%c0_147, %c0_148] : memref<1x128xf32, #tpu.memory_space<vmem>>, vector<1x128xf32>
    %512 = vector.broadcast %511 : vector<1x128xf32> to vector<16x128xf32>
    %513 = arith.addf %510, %512 : vector<16x128xf32>
    %c0_149 = arith.constant 0 : index
    %c0_150 = arith.constant 0 : index
    %514 = vector.load %arg13[%c0_149, %c0_150] : memref<16x128xf32, #tpu.memory_space<vmem>>, vector<16x128xf32>
    tpu.vector_store %arg13[%c0_149, %c0_150], %513 {strides = array<i32>} : memref<16x128xf32, #tpu.memory_space<vmem>>, vector<16x128xf32>,
    return
  }
}

</mosaic_0001>

<bundles_post_ra>
// kernel: _lambda_.3
= control target key start
LH: loop header
LB: loop body
LE: loop exit
PB: predicated region body
PF: predicated region fallthrough
CT: control target
= control target key end

     0   :  { %vm96_vm0 = vcmask 254976   ;;  %v2675_v3 = vmov 0   ;;  %v2676_v5 = vmov 0.0   ;;  %vm59_vm1 = vcmask 261120   ;;  %s2678_s22 = smov 64   ;;  %s3312_s1 = inlined_call_operand.vmem [shape: f32[2,32], index: 1, kind: input, shape index: {}]   ;;  %s3313_s5 = inlined_call_operand.vmem [shape: f32[1,32], index: 5, kind: input, shape index: {}]   ;;  %s3314_s0 = inlined_call_operand.vmem [shape: f32[2,8,32], index: 0, kind: input, shape index: {}]   ;;  %s3315_s3 = inlined_call_operand.vmem [shape: f32[1,32], index: 3, kind: input, shape index: {}]   ;;  %s3316_s4 = inlined_call_operand.<no memory space> [shape: f32[1,1], index: 4, kind: input, shape index: {}]   ;;  %s3317_s7 = inlined_call_operand.vmem [shape: f32[32,128], index: 7, kind: input, shape index: {}]   ;;  %s3318_s6 = inlined_call_operand.vmem [shape: f32[32,128], index: 6, kind: input, shape index: {}]   ;;  %s3319_s2 = inlined_call_operand.vmem [shape: f32[8,2,32], index: 2, kind: input, shape index: {}]   ;;  %s3320_s8 = inlined_call_operand.vmem [shape: f32[1,128], index: 8, kind: input, shape index: {}]   ;;  %s3321_s14 = inlined_call_operand.vmem [shape: f32[8,2,8], index: 14, kind: output, shape index: {1}]   ;;  %s3322_s9 = inlined_call_operand.vmem [shape: f32[32,24], index: 9, kind: input, shape index: {}]   ;;  %s3323_s11 = inlined_call_operand.vmem [shape: f32[24,128], index: 11, kind: input, shape index: {}]   ;;  %s3324_s10 = inlined_call_operand.vmem [shape: f32[1,24], index: 10, kind: input, shape index: {}]   ;;  %s3325_s12 = inlined_call_operand.vmem [shape: f32[1,128], index: 12, kind: input, shape index: {}]   ;;  %s3326_s13 = inlined_call_operand.vmem [shape: f32[16,128], index: 13, kind: output, shape index: {0}]  }
   0x1   :  { %v2759_v0 = vld [vmem:[%s3313_s5] ss:$0 sm:$0xff]  ;;  %2570 = vset.pattern.permute.xlu1 %v2675_v3  ;;  %v20_v4 = vstv %s3316_s4  ;;  %2368 = vmatprep.subr.mxu0 %v2676_v5  ;;  %v2781_v8 = vld [vmem:[%s3314_s0 + $0x8] sm:$0xff]  ;;  %v2787_v9 = vld [vmem:[%s3317_s7 + $0x18] sm:$0xff]  ;;  %vm2677_vm2 = vmmov 0   ;;  %v102_v24 = vlaneseq  ;;  %vm112_vm3 = vcmask 1041409  }
   0x2   :  { %v88_v1 = vld [vmem:[%s3312_s1] sm:$0x3]  ;;  %21 = vst [vmem:[#allocation3] sm:$0x1] %v20_v4  ;;  %2379 = vmatprep.subr.mxu1 %v2676_v5  ;;  %2376 = vmatprep.mubr.msk.f32.mxu0 %vm2677_vm2, %v2676_v5  ;;  %v2797_v12 = vld [vmem:[%s3318_s6 + $0x18] sm:$0xff]  ;;  %v2802_v13 = vld [vmem:[%s3317_s7 + $0x10] sm:$0xff] }
   0x3   :  { %v2767_v2 = vld [vmem:[%s3314_s0] sm:$0xff]  ;;  %v95_v6 = vmul.f32 %v2759_v0, %v88_v1  ;;  %2369 = vmatpush3.msra.mxu0 %v2787_v9  ;;  %2387 = vmatprep.mubr.msk.f32.mxu1 %vm2677_vm2, %v2676_v5  ;;  %v2812_v15 = vld [vmem:[%s3318_s6 + $0x10] sm:$0xff]  ;;  %v2819_v17 = vld [vmem:[%s3317_s7 + $0x8] sm:$0xff]  ;;  %v103_v25 = vand.u32 127, %v102_v24  ;;  %v2875_v26 = vshrl.u32 %v102_v24, 7  ;;  %vm116_vm4 = vcmask 58368  }
   0x4   :  { %v2229_v7 = vld [vmem:[%s3315_s3] ss:$0 sm:$0xff]  ;;  %2380 = vmatpush3.msra.mxu1 %v2797_v12  ;;  %2370 = vmatprep.subr.mxu0 %v2676_v5  ;;  %v2825_v18 = vld [vmem:[%s3318_s6 + $0x8] sm:$0xff]  ;;  %s2679_s3 = smov 96   ;;  %vm2137_vm5 = vcmask 195584  }
   0x5   :  { %v57_v10 = vmul.f32 %v2229_v7, %v2767_v2  ;;  %v58_v11 = vmul.f32 %v2229_v7, %v2781_v8  ;;  %v97_v14 = vsel %vm96_vm0, %v95_v6, 0.0  ;;  %2381 = vmatprep.subr.mxu1 %v2676_v5  ;;  %2371 = vmatpush3.msra.mxu0 %v2802_v13  ;;  %v2835_v20 = vld [vmem:[%s3317_s7] sm:$0xff]  ;;  %v106_v29 = vsub.s32 %v103_v25, %v2875_v26 }
   0x6   :  { %98 = vadd.xlane.f32.xlu1 %v97_v14  ;;  %2382 = vmatpush3.msra.mxu1 %v2812_v15  ;;  %v2840_v21 = vld [vmem:[%s3318_s6] sm:$0xff]  ;;  %v2892_v56 = vsub.s32 0, %v2875_v26  ;;  %v2895_v59 = vsub.s32 1, %v2875_v26 }
   0x7   :  { %v60_v16 = vsel %vm59_vm1, %v57_v10, 0.0  ;;  %v63_v19 = vsel %vm59_vm1, %v58_v11, 0.0  ;;  %2372 = vmatprep.subr.mxu0 %v2676_v5  ;;  %2383 = vmatprep.subr.mxu1 %v2676_v5  ;;  %v158_v22 = vld [vmem:[%s3319_s2] sm:$0x3] }
   0x8   :  { %61 = vadd.xlane.f32.xlu0 %v60_v16  ;;  %2373 = vmatpush3.msra.mxu0 %v2819_v17  ;;  %v2887_v49 = vld [vmem:[%s3320_s8] ss:$0 sm:$0xff] }
   0x9   :  { %2384 = vmatpush3.msra.mxu1 %v2825_v18  ;;  %2374 = vmatprep.subr.mxu0 %v2676_v5  ;;  %v2230_v23 = vld [vmem:[#allocation3] ss:$0 sm:$0xff] }
   0xa   :  { %2385 = vmatprep.subr.mxu1 %v2676_v5  ;;  %2375 = vmatpush3.msra.mxu0 %v2835_v20 }
   0xb   :  { %2386 = vmatpush3.msra.mxu1 %v2840_v21  ;;  %2377 = vmatmul.mubr.msk.f32.vlgmr.msra.gmra.mxu0 %vm59_vm1, %v158_v22 }
   0xc   :  { %64 = vadd.xlane.f32.xlu0 %v63_v19  ;;  %2388 = vmatmul.mubr.msk.f32.vlgmr.msra.gmra.mxu1 %vm59_vm1, %v88_v1 }
   0xd   :  { %2390 = vmatprep.subr.mxu0 %v2676_v5  ;;  %2401 = vmatprep.subr.mxu1 %v2676_v5 }
   0xe   :  { %2391 = vmatpush3.msra.mxu0 %v2787_v9  ;;  %2402 = vmatpush3.msra.mxu1 %v2797_v12 }
   0xf   :  { %2392 = vmatprep.subr.mxu0 %v2676_v5  ;;  %2403 = vmatprep.subr.mxu1 %v2676_v5 }
  0x10   :  { %2393 = vmatpush3.msra.mxu0 %v2802_v13  ;;  %2404 = vmatpush3.msra.mxu1 %v2812_v15 }
  0x11   :  { %2394 = vmatprep.subr.mxu0 %v2676_v5  ;;  %2405 = vmatprep.subr.mxu1 %v2676_v5 }
  0x12   :  { %2395 = vmatpush3.msra.mxu0 %v2819_v17  ;;  %2406 = vmatpush3.msra.mxu1 %v2825_v18 }
  0x13   :  { %2396 = vmatprep.subr.mxu0 %v2676_v5  ;;  %2407 = vmatprep.subr.mxu1 %v2676_v5 }
  0x14   :  { %2397 = vmatpush3.msra.mxu0 %v2835_v20  ;;  %2398 = vmatprep.mubr.msk.f32.mxu0 %vm2677_vm2, %v2676_v5 }
  0x15   :  { %2408 = vmatpush3.msra.mxu1 %v2840_v21  ;;  %2409 = vmatprep.mubr.msk.f32.mxu1 %vm2677_vm2, %v2676_v5 }
  0x16   :  { %2412 = vmatprep.subr.mxu0 %v2676_v5  ;;  %2423 = vmatprep.subr.mxu1 %v2676_v5 }
  0x17   :  { %73 = vperm.xlu1 %2570, %v2230_v23   ;;  %2571 = vset.pattern.permute.xlu0 %v2675_v3 }
  0x8f   :  { %v99_v27 = vpop.xlane.xlu1 %98 }
  0x91   :  { %v62_v28 = vpop.xlane.xlu0 %61 }
  0x93   :  { %v74_v30 = vpop.permute.xlu1 %73 }
  0x94   :  { %v76_v31 = vadd.f32 %v74_v30, %v62_v28 }
  0x95   :  { %v65_v32 = vpop.xlane.xlu0 %64 }
  0x96   :  { %v77_v33 = vadd.f32 %v74_v30, %v65_v32  ;;  %v107_v34 = vrot.slane %v76_v31, %v106_v29 }
  0x98   :  { %v111_v35 = vrot.slane %v77_v33, %v106_v29 }
  0x9a   :  { %v2879_v36 = vsel %vm112_vm3, %v111_v35, %v107_v34 }
  0x9b   :  { %v115_v37 = vadd.f32 %v2879_v36, %v99_v27 }
  0x9d   :  { %v117_v38 = vsel %vm116_vm4, %v115_v37, -inf }
  0x9e   :  { %118 = vmax.xlane.f32.xlu0 %v117_v38  ;;  %v2236_v38 = vld [vmem:[%s3319_s2 + $0x2] sm:$0x3] }
  0x9f   :  { %2399 = vmatmul.mubr.msk.f32.vlgmr.msra.gmra.mxu0 %vm59_vm1, %v2236_v38 }
  0xa0   :  { %2413 = vmatpush3.msra.mxu0 %v2787_v9  ;;  %2420 = vmatprep.mubr.msk.f32.mxu0 %vm2677_vm2, %v2676_v5 }
  0xa1   :  { %2414 = vmatprep.subr.mxu0 %v2676_v5 }
  0xa2   :  { %2415 = vmatpush3.msra.mxu0 %v2802_v13 }
  0xa3   :  { %2416 = vmatprep.subr.mxu0 %v2676_v5 }
  0xa4   :  { %2417 = vmatpush3.msra.mxu0 %v2819_v17 }
  0xa5   :  { %2418 = vmatprep.subr.mxu0 %v2676_v5 }
  0xa6   :  { %2419 = vmatpush3.msra.mxu0 %v2835_v20 }
  0xa7   :  { %2434 = vmatprep.subr.mxu0 %v2676_v5 }
  0xcb   :  { %v228_v39 = vpop.f32.mrf.mxu0 }
  0xcc   :  { %v301_v40 = vpop.f32.mrf.mxu1 }
  0xcd   :  { %v302_v41 = vadd.f32 %v301_v40, %v228_v39  ;;  %v2378_v42 = vpop.f32.mrf.mxu0 }
  0xce   :  { %v2389_v43 = vpop.f32.mrf.mxu1 }
  0xcf   :  { %v311_v50 = vadd.f32 %v2887_v49, %v302_v41 }
  0xd1   :  { %v2235_v52 = vmul.f32 -1.442695, %v311_v50 }
 0x127   :  { %v119_v44 = vpop.xlane.xlu0 %118 }
 0x128   :  { %v120_v45 = vsub.f32 %v115_v37, %v119_v44 }
 0x12a   :  { %v121_v46 = vmul.f32 1.442695, %v120_v45 }
 0x12c   :  { %2572 = vpow2.f32 %v121_v46 }
 0x12d   :  { %2574 = vtanh.f32 %v311_v50 }
 0x12e   :  { %2576 = vpow2.f32 %v2235_v52 }
 0x139   :  { %v2573_v47 = vpop.eup %2572 }
 0x13a   :  { %v123_v48 = vsel %vm116_vm4, %v2573_v47, 0.0  ;;  %v2575_v51 = vpop.eup %2574 }
 0x13b   :  { %124 = vadd.xlane.f32.xlu0 %v123_v48  ;;  %v2577_v54 = vpop.eup %2576 }
 0x13c   :  { %v315_v55 = vadd.f32 1.0, %v2577_v54 }
 0x151   :  { %325 = vrot.lane.b32.xlu0 %v2575_v51, %s2678_s22 }
 0x15f   :  { %v470_v45 = vpop.f32.mrf.mxu0 }
 0x161   :  { %v2400_v46 = vpop.f32.mrf.mxu0 }
 0x1c4   :  { %v125_v53 = vpop.xlane.xlu0 %124 }
 0x1c5   :  { %2578 = vrcp.f32 %v125_v53 }
 0x1c6   :  { %2580 = vrcp.f32 %v315_v55 }
 0x1c8   :  { %v326_v62 = vpop.permute.xlu0 %325 }
 0x1d2   :  { %v2579_v57 = vpop.eup %2578 }
 0x1d3   :  { %v127_v58 = vmul.f32 %v2579_v57, %v2573_v47  ;;  %v2581_v63 = vpop.eup %2580 }
 0x1d4   :  { %v328_v1 = vmul.f32 %v2581_v63, %v326_v62 }
 0x1d5   :  { %v131_v60 = vrot.slane %v127_v58, %v2892_v56  ;;  %345 = vst.msk [vmem:[%s3321_s14] sm:$0x3] %vm116_vm4, %v127_v58  ;;  %v138_v61 = vrot.slane %v127_v58, %v2895_v59 }
 0x1d7   :  { %133 = vbcast.lane.b32.xlu1 %v131_v60, 256 }
 0x1db   :  { %140 = vbcast.lane.b32.xlu1 %v138_v61, 256 }
 0x1df   :  { %330 = vrot.lane.b32.xlu1 %v328_v1, %s2679_s3 }
 0x249   :  { %v134_v3 = vpop.permute.xlu1 %133 }
 0x24a   :  { %v142_v4 = vmul.f32 %v134_v3, %v2767_v2 }
 0x24c   :  { %v144_v6 = vsel %vm59_vm1, %v142_v4, 0.0 }
 0x24d   :  { %v145_v7 = vrot.slane %v144_v6, 4  ;;  %v141_v10 = vpop.permute.xlu1 %140 }
 0x24e   :  { %v143_v11 = vmul.f32 %v141_v10, %v2781_v8 }
 0x24f   :  { %v146_v14 = vadd.f32 %v145_v7, %v144_v6 }
 0x250   :  { %v151_v16 = vsel %vm59_vm1, %v143_v11, 0.0 }
 0x251   :  { %v147_v19 = vrot.slane %v146_v14, 2  ;;  %v152_v22 = vrot.slane %v151_v16, 4  ;;  %v331_v34 = vpop.permute.xlu1 %330 }
 0x253   :  { %v148_v23 = vadd.f32 %v147_v19, %v146_v14  ;;  %v153_v24 = vadd.f32 %v152_v22, %v151_v16 }
 0x255   :  { %v154_v25 = vrot.slane %v153_v24, 2  ;;  %v149_v27 = vrot.slane %v148_v23, 1 }
 0x257   :  { %v155_v28 = vadd.f32 %v154_v25, %v153_v24  ;;  %v150_v30 = vadd.f32 %v149_v27, %v148_v23 }
 0x259   :  { %v156_v29 = vrot.slane %v155_v28, 1 }
 0x25b   :  { %v157_v31 = vadd.f32 %v156_v29, %v155_v28 }
 0x25d   :  { %v321_v32 = vsel %vm112_vm3, %v157_v31, %v150_v30 }
 0x25e   :  { %v323_v33 = vmul.f32 %v2581_v63, %v321_v32 }
 0x260   :  { %v333_v35 = vadd.f32 %v331_v34, %v323_v33 }
 0x262   :  { %2582 = vtanh.f32 %v333_v35 }
 0x26f   :  { %v2583_v37 = vpop.eup %2582 }
 0x270   :  { %336 = vrot.lane.b32.xlu1 %v2583_v37, %s2678_s22 }
 0x274   :  { %346 = vrot.lane.b32.xlu1 %v2759_v0, %s2678_s22 }
 0x2e2   :  { %v337_v0 = vpop.permute.xlu1 %336 }
 0x2e3   :  { %v339_v39 = vmul.f32 %v2581_v63, %v337_v0 }
 0x2e5   :  { %341 = vrot.lane.b32.xlu0 %v339_v39, %s2678_s22 }
 0x2e6   :  { %v2927_v40 = vpop.permute.xlu1 %346 }
 0x2e7   :  { %v349_v41 = vmul.f32 %v2927_v40, %v339_v39 }
 0x2e9   :  { %351 = vrot.lane.b32.xlu1 %v349_v41, %s2678_s22 }
 0x357   :  { %v342_v42 = vpop.permute.xlu0 %341 }
 0x358   :  { %344 = vst.msk [vmem:[#allocation2] sm:$0x3] %vm96_vm0, %v342_v42  ;;  %2410 = vmatmul.mubr.msk.f32.vlgmr.msra.gmra.mxu1 %vm59_vm1, %v342_v42 }
 0x359   :  { %2424 = vmatpush3.msra.mxu1 %v2797_v12  ;;  %2431 = vmatprep.mubr.msk.f32.mxu1 %vm2677_vm2, %v2676_v5 }
 0x35a   :  { %2425 = vmatprep.subr.mxu1 %v2676_v5 }
 0x35b   :  { %v352_v43 = vpop.permute.xlu1 %351  ;;  %2426 = vmatpush3.msra.mxu1 %v2812_v15 }
 0x35c   :  { %v354_v44 = vsel %vm96_vm0, %v352_v43, 0.0  ;;  %2427 = vmatprep.subr.mxu1 %v2676_v5 }
 0x35d   :  { %355 = vadd.xlane.f32.xlu0 %v354_v44  ;;  %2428 = vmatpush3.msra.mxu1 %v2825_v18 }
 0x35e   :  { %2429 = vmatprep.subr.mxu1 %v2676_v5 }
 0x35f   :  { %2430 = vmatpush3.msra.mxu1 %v2840_v21 }
 0x360   :  { %2445 = vmatprep.subr.mxu1 %v2676_v5 }
 0x3e6   :  { %v356_v47 = vpop.xlane.xlu0 %355 }
 0x3e7   :  { %v357_v48 = vadd.f32 %v356_v47, %v2879_v36  ;;  %v2241_v47 = vld [vmem:[%s3319_s2 + $0x4] sm:$0x3] }
 0x3e8   :  { %2421 = vmatmul.mubr.msk.f32.vlgmr.msra.gmra.mxu0 %vm59_vm1, %v2241_v47 }
 0x3e9   :  { %v358_v50 = vsel %vm116_vm4, %v357_v48, -inf  ;;  %2435 = vmatpush3.msra.mxu0 %v2787_v9  ;;  %2442 = vmatprep.mubr.msk.f32.mxu0 %vm2677_vm2, %v2676_v5 }
 0x3ea   :  { %359 = vmax.xlane.f32.xlu1 %v358_v50  ;;  %2436 = vmatprep.subr.mxu0 %v2676_v5 }
 0x3eb   :  { %2437 = vmatpush3.msra.mxu0 %v2802_v13 }
 0x3ec   :  { %2438 = vmatprep.subr.mxu0 %v2676_v5 }
 0x3ed   :  { %2439 = vmatpush3.msra.mxu0 %v2819_v17 }
 0x3ee   :  { %2440 = vmatprep.subr.mxu0 %v2676_v5 }
 0x3ef   :  { %2441 = vmatpush3.msra.mxu0 %v2835_v20 }
 0x3f0   :  { %2456 = vmatprep.subr.mxu0 %v2676_v5 }
 0x418   :  { %v542_v51 = vpop.f32.mrf.mxu1 }
 0x419   :  { %v543_v60 = vadd.f32 %v542_v51, %v470_v45 }
 0x41a   :  { %v2411_v52 = vpop.f32.mrf.mxu1 }
 0x41b   :  { %v546_v61 = vadd.f32 %v2887_v49, %v543_v60 }
 0x41d   :  { %v2239_v63 = vmul.f32 -1.442695, %v546_v61 }
 0x473   :  { %v360_v53 = vpop.xlane.xlu1 %359 }
 0x474   :  { %v361_v54 = vsub.f32 %v357_v48, %v360_v53 }
 0x476   :  { %v362_v55 = vmul.f32 1.442695, %v361_v54 }
 0x478   :  { %2584 = vpow2.f32 %v362_v55 }
 0x479   :  { %2586 = vtanh.f32 %v546_v61 }
 0x47a   :  { %2588 = vpow2.f32 %v2239_v63 }
 0x485   :  { %v2585_v57 = vpop.eup %2584 }
 0x486   :  { %v364_v58 = vsel %vm116_vm4, %v2585_v57, 0.0  ;;  %v2587_v62 = vpop.eup %2586 }
 0x487   :  { %365 = vadd.xlane.f32.xlu0 %v364_v58  ;;  %v2589_v1 = vpop.eup %2588 }
 0x488   :  { %v550_v3 = vadd.f32 1.0, %v2589_v1 }
 0x48a   :  { %2590 = vrcp.f32 %v550_v3 }
 0x497   :  { %v2591_v6 = vpop.eup %2590 }
 0x49d   :  { %560 = vrot.lane.b32.xlu0 %v2587_v62, %s2678_s22 }
 0x4a8   :  { %v704_v55 = vpop.f32.mrf.mxu0 }
 0x510   :  { %v366_v4 = vpop.xlane.xlu0 %365 }
 0x511   :  { %2592 = vrcp.f32 %v366_v4 }
 0x514   :  { %v561_v7 = vpop.permute.xlu0 %560 }
 0x515   :  { %v563_v10 = vmul.f32 %v2591_v6, %v561_v7 }
 0x517   :  { %565 = vrot.lane.b32.xlu0 %v563_v10, %s2679_s3 }
 0x51e   :  { %v2593_v11 = vpop.eup %2592 }
 0x51f   :  { %v368_v14 = vmul.f32 %v2593_v11, %v2585_v57  ;;  %v2422_v57 = vpop.f32.mrf.mxu0 }
 0x521   :  { %v372_v16 = vrot.slane %v368_v14, %v2892_v56  ;;  %2240 = vst.msk [vmem:[%s3321_s14 + $0x2] sm:$0x3] %vm116_vm4, %v368_v14  ;;  %v379_v19 = vrot.slane %v368_v14, %v2895_v59 }
 0x523   :  { %374 = vbcast.lane.b32.xlu1 %v372_v16, 256 }
 0x527   :  { %381 = vbcast.lane.b32.xlu1 %v379_v19, 256 }
 0x589   :  { %v566_v44 = vpop.permute.xlu0 %565 }
 0x595   :  { %v375_v22 = vpop.permute.xlu1 %374 }
 0x596   :  { %v383_v23 = vmul.f32 %v375_v22, %v2767_v2 }
 0x598   :  { %v385_v24 = vsel %vm59_vm1, %v383_v23, 0.0 }
 0x599   :  { %v386_v25 = vrot.slane %v385_v24, 4  ;;  %v382_v27 = vpop.permute.xlu1 %381 }
 0x59a   :  { %v384_v28 = vmul.f32 %v382_v27, %v2781_v8 }
 0x59b   :  { %v387_v29 = vadd.f32 %v386_v25, %v385_v24 }
 0x59c   :  { %v392_v30 = vsel %vm59_vm1, %v384_v28, 0.0 }
 0x59d   :  { %v388_v31 = vrot.slane %v387_v29, 2  ;;  %v393_v32 = vrot.slane %v392_v30, 4 }
 0x59f   :  { %v389_v33 = vadd.f32 %v388_v31, %v387_v29  ;;  %v394_v34 = vadd.f32 %v393_v32, %v392_v30 }
 0x5a1   :  { %v395_v35 = vrot.slane %v394_v34, 2  ;;  %v390_v37 = vrot.slane %v389_v33, 1 }
 0x5a3   :  { %v396_v38 = vadd.f32 %v395_v35, %v394_v34  ;;  %v391_v39 = vadd.f32 %v390_v37, %v389_v33 }
 0x5a5   :  { %v397_v0 = vrot.slane %v396_v38, 1 }
 0x5a7   :  { %v398_v41 = vadd.f32 %v397_v0, %v396_v38 }
 0x5a9   :  { %v556_v42 = vsel %vm112_vm3, %v398_v41, %v391_v39 }
 0x5aa   :  { %v558_v43 = vmul.f32 %v2591_v6, %v556_v42 }
 0x5ac   :  { %v568_v45 = vadd.f32 %v566_v44, %v558_v43 }
 0x5ae   :  { %2594 = vtanh.f32 %v568_v45 }
 0x5bb   :  { %v2595_v46 = vpop.eup %2594 }
 0x5bc   :  { %571 = vrot.lane.b32.xlu1 %v2595_v46, %s2678_s22 }
 0x62e   :  { %v572_v48 = vpop.permute.xlu1 %571 }
 0x62f   :  { %v574_v50 = vmul.f32 %v2591_v6, %v572_v48 }
 0x631   :  { %v583_v51 = vmul.f32 %v574_v50, %v2927_v40  ;;  %576 = vrot.lane.b32.xlu0 %v574_v50, %s2678_s22 }
 0x633   :  { %585 = vrot.lane.b32.xlu1 %v583_v51, %s2678_s22 }
 0x6a3   :  { %v577_v52 = vpop.permute.xlu0 %576 }
 0x6a4   :  { %580 = vst.msk [vmem:[#allocation2 + $0x2] sm:$0x3] %vm96_vm0, %v577_v52  ;;  %2432 = vmatmul.mubr.msk.f32.vlgmr.msra.gmra.mxu1 %vm59_vm1, %v577_v52 }
 0x6a5   :  { %v586_v53 = vpop.permute.xlu1 %585  ;;  %2446 = vmatpush3.msra.mxu1 %v2797_v12  ;;  %2453 = vmatprep.mubr.msk.f32.mxu1 %vm2677_vm2, %v2676_v5 }
 0x6a6   :  { %v588_v54 = vsel %vm96_vm0, %v586_v53, 0.0  ;;  %2447 = vmatprep.subr.mxu1 %v2676_v5 }
 0x6a7   :  { %589 = vadd.xlane.f32.xlu0 %v588_v54  ;;  %2448 = vmatpush3.msra.mxu1 %v2812_v15 }
 0x6a8   :  { %2449 = vmatprep.subr.mxu1 %v2676_v5 }
 0x6a9   :  { %2450 = vmatpush3.msra.mxu1 %v2825_v18 }
 0x6aa   :  { %2451 = vmatprep.subr.mxu1 %v2676_v5 }
 0x6ab   :  { %2452 = vmatpush3.msra.mxu1 %v2840_v21 }
 0x6ac   :  { %2467 = vmatprep.subr.mxu1 %v2676_v5 }
 0x730   :  { %v590_v58 = vpop.xlane.xlu0 %589 }
 0x731   :  { %v591_v60 = vadd.f32 %v590_v58, %v2879_v36  ;;  %v2246_v58 = vld [vmem:[%s3319_s2 + $0x6] sm:$0x3] }
 0x732   :  { %2443 = vmatmul.mubr.msk.f32.vlgmr.msra.gmra.mxu0 %vm59_vm1, %v2246_v58 }
 0x733   :  { %v592_v61 = vsel %vm116_vm4, %v591_v60, -inf  ;;  %2457 = vmatpush3.msra.mxu0 %v2787_v9  ;;  %2464 = vmatprep.mubr.msk.f32.mxu0 %vm2677_vm2, %v2676_v5 }
 0x734   :  { %593 = vmax.xlane.f32.xlu1 %v592_v61  ;;  %2458 = vmatprep.subr.mxu0 %v2676_v5 }
 0x735   :  { %2459 = vmatpush3.msra.mxu0 %v2802_v13 }
 0x736   :  { %2460 = vmatprep.subr.mxu0 %v2676_v5 }
 0x737   :  { %2461 = vmatpush3.msra.mxu0 %v2819_v17 }
 0x738   :  { %2462 = vmatprep.subr.mxu0 %v2676_v5 }
 0x739   :  { %2463 = vmatpush3.msra.mxu0 %v2835_v20 }
 0x73a   :  { %2478 = vmatprep.subr.mxu0 %v2676_v5 }
 0x764   :  { %v776_v62 = vpop.f32.mrf.mxu1 }
 0x765   :  { %v777_v10 = vadd.f32 %v776_v62, %v704_v55 }
 0x766   :  { %v2433_v63 = vpop.f32.mrf.mxu1 }
 0x767   :  { %v780_v11 = vadd.f32 %v2887_v49, %v777_v10 }
 0x769   :  { %v2244_v16 = vmul.f32 -1.442695, %v780_v11 }
 0x7bd   :  { %v594_v1 = vpop.xlane.xlu1 %593 }
 0x7be   :  { %v595_v3 = vsub.f32 %v591_v60, %v594_v1 }
 0x7c0   :  { %v596_v4 = vmul.f32 1.442695, %v595_v3 }
 0x7c2   :  { %2596 = vpow2.f32 %v596_v4 }
 0x7c3   :  { %2598 = vtanh.f32 %v780_v11 }
 0x7c4   :  { %2600 = vpow2.f32 %v2244_v16 }
 0x7cf   :  { %v2597_v6 = vpop.eup %2596 }
 0x7d0   :  { %v598_v7 = vsel %vm116_vm4, %v2597_v6, 0.0  ;;  %v2599_v14 = vpop.eup %2598 }
 0x7d1   :  { %599 = vadd.xlane.f32.xlu0 %v598_v7  ;;  %v2601_v19 = vpop.eup %2600 }
 0x7d2   :  { %v784_v22 = vadd.f32 1.0, %v2601_v19 }
 0x7d4   :  { %2602 = vrcp.f32 %v784_v22 }
 0x7e1   :  { %v2603_v24 = vpop.eup %2602 }
 0x7e7   :  { %794 = vrot.lane.b32.xlu0 %v2599_v14, %s2678_s22 }
 0x7f2   :  { %v938_v4 = vpop.f32.mrf.mxu0 }
 0x85a   :  { %v600_v23 = vpop.xlane.xlu0 %599 }
 0x85b   :  { %2604 = vrcp.f32 %v600_v23 }
 0x85e   :  { %v795_v25 = vpop.permute.xlu0 %794 }
 0x85f   :  { %v797_v27 = vmul.f32 %v2603_v24, %v795_v25 }
 0x861   :  { %799 = vrot.lane.b32.xlu0 %v797_v27, %s2679_s3 }
 0x868   :  { %v2605_v28 = vpop.eup %2604 }
 0x869   :  { %v602_v29 = vmul.f32 %v2605_v28, %v2597_v6  ;;  %v2444_v6 = vpop.f32.mrf.mxu0 }
 0x86b   :  { %v606_v30 = vrot.slane %v602_v29, %v2892_v56  ;;  %2245 = vst.msk [vmem:[%s3321_s14 + $0x4] sm:$0x3] %vm116_vm4, %v602_v29  ;;  %v613_v31 = vrot.slane %v602_v29, %v2895_v59 }
 0x86d   :  { %608 = vbcast.lane.b32.xlu1 %v606_v30, 256 }
 0x871   :  { %615 = vbcast.lane.b32.xlu1 %v613_v31, 256 }
 0x8d3   :  { %v800_v54 = vpop.permute.xlu0 %799 }
 0x8df   :  { %v609_v32 = vpop.permute.xlu1 %608 }
 0x8e0   :  { %v617_v33 = vmul.f32 %v609_v32, %v2767_v2 }
 0x8e2   :  { %v619_v34 = vsel %vm59_vm1, %v617_v33, 0.0 }
 0x8e3   :  { %v620_v35 = vrot.slane %v619_v34, 4  ;;  %v616_v37 = vpop.permute.xlu1 %615 }
 0x8e4   :  { %v618_v38 = vmul.f32 %v616_v37, %v2781_v8 }
 0x8e5   :  { %v621_v0 = vadd.f32 %v620_v35, %v619_v34 }
 0x8e6   :  { %v626_v39 = vsel %vm59_vm1, %v618_v38, 0.0 }
 0x8e7   :  { %v622_v41 = vrot.slane %v621_v0, 2  ;;  %v627_v42 = vrot.slane %v626_v39, 4 }
 0x8e9   :  { %v623_v43 = vadd.f32 %v622_v41, %v621_v0  ;;  %v628_v44 = vadd.f32 %v627_v42, %v626_v39 }
 0x8eb   :  { %v629_v45 = vrot.slane %v628_v44, 2  ;;  %v624_v46 = vrot.slane %v623_v43, 1 }
 0x8ed   :  { %v630_v47 = vadd.f32 %v629_v45, %v628_v44  ;;  %v625_v50 = vadd.f32 %v624_v46, %v623_v43 }
 0x8ef   :  { %v631_v48 = vrot.slane %v630_v47, 1 }
 0x8f1   :  { %v632_v51 = vadd.f32 %v631_v48, %v630_v47 }
 0x8f3   :  { %v790_v52 = vsel %vm112_vm3, %v632_v51, %v625_v50 }
 0x8f4   :  { %v792_v53 = vmul.f32 %v2603_v24, %v790_v52 }
 0x8f6   :  { %v802_v55 = vadd.f32 %v800_v54, %v792_v53 }
 0x8f8   :  { %2606 = vtanh.f32 %v802_v55 }
 0x905   :  { %v2607_v57 = vpop.eup %2606 }
 0x906   :  { %805 = vrot.lane.b32.xlu1 %v2607_v57, %s2678_s22 }
 0x978   :  { %v806_v60 = vpop.permute.xlu1 %805 }
 0x979   :  { %v808_v61 = vmul.f32 %v2603_v24, %v806_v60 }
 0x97b   :  { %v817_v62 = vmul.f32 %v808_v61, %v2927_v40  ;;  %810 = vrot.lane.b32.xlu0 %v808_v61, %s2678_s22 }
 0x97d   :  { %819 = vrot.lane.b32.xlu1 %v817_v62, %s2678_s22 }
 0x9ed   :  { %v811_v63 = vpop.permute.xlu0 %810 }
 0x9ee   :  { %814 = vst.msk [vmem:[#allocation2 + $0x4] sm:$0x3] %vm96_vm0, %v811_v63  ;;  %2454 = vmatmul.mubr.msk.f32.vlgmr.msra.gmra.mxu1 %vm59_vm1, %v811_v63 }
 0x9ef   :  { %v820_v1 = vpop.permute.xlu1 %819  ;;  %2468 = vmatpush3.msra.mxu1 %v2797_v12  ;;  %2475 = vmatprep.mubr.msk.f32.mxu1 %vm2677_vm2, %v2676_v5 }
 0x9f0   :  { %v822_v3 = vsel %vm96_vm0, %v820_v1, 0.0  ;;  %2469 = vmatprep.subr.mxu1 %v2676_v5 }
 0x9f1   :  { %823 = vadd.xlane.f32.xlu0 %v822_v3  ;;  %2470 = vmatpush3.msra.mxu1 %v2812_v15 }
 0x9f2   :  { %2471 = vmatprep.subr.mxu1 %v2676_v5 }
 0x9f3   :  { %2472 = vmatpush3.msra.mxu1 %v2825_v18 }
 0x9f4   :  { %2473 = vmatprep.subr.mxu1 %v2676_v5 }
 0x9f5   :  { %2474 = vmatpush3.msra.mxu1 %v2840_v21 }
 0x9f6   :  { %2489 = vmatprep.subr.mxu1 %v2676_v5 }
 0xa7a   :  { %v824_v7 = vpop.xlane.xlu0 %823 }
 0xa7b   :  { %v825_v10 = vadd.f32 %v824_v7, %v2879_v36  ;;  %v2261_v7 = vld [vmem:[%s3319_s2 + $0xc] sm:$0x3] }
 0xa7d   :  { %v826_v11 = vsel %vm116_vm4, %v825_v10, -inf }
 0xa7e   :  { %827 = vmax.xlane.f32.xlu1 %v826_v11 }
 0xaae   :  { %v1010_v14 = vpop.f32.mrf.mxu1 }
 0xaaf   :  { %v1011_v27 = vadd.f32 %v1010_v14, %v938_v4  ;;  %v2256_v4 = vld [vmem:[%s3319_s2 + $0xa] sm:$0x3] }
 0xab0   :  { %v2455_v16 = vpop.f32.mrf.mxu1 }
 0xab1   :  { %v1014_v28 = vadd.f32 %v2887_v49, %v1011_v27  ;;  %v1989_v27 = vld [vmem:[#allocation2 + $0x4] sm:$0x3] }
 0xab3   :  { %v2249_v30 = vmul.f32 -1.442695, %v1014_v28 }
 0xb07   :  { %v828_v19 = vpop.xlane.xlu1 %827 }
 0xb08   :  { %v829_v22 = vsub.f32 %v825_v10, %v828_v19  ;;  %v2266_v10 = vld [vmem:[%s3319_s2 + $0xe] sm:$0x3] }
 0xb0a   :  { %v830_v23 = vmul.f32 1.442695, %v829_v22 }
 0xb0c   :  { %2608 = vpow2.f32 %v830_v23  ;;  %v1988_v23 = vld [vmem:[#allocation2 + $0x2] sm:$0x3] }
 0xb0d   :  { %2610 = vtanh.f32 %v1014_v28 }
 0xb0e   :  { %2612 = vpow2.f32 %v2249_v30 }
 0xb19   :  { %v2609_v24 = vpop.eup %2608 }
 0xb1a   :  { %v832_v25 = vsel %vm116_vm4, %v2609_v24, 0.0  ;;  %v2611_v29 = vpop.eup %2610 }
 0xb1b   :  { %833 = vadd.xlane.f32.xlu0 %v832_v25  ;;  %v2613_v31 = vpop.eup %2612 }
 0xb1c   :  { %v1018_v32 = vadd.f32 1.0, %v2613_v31 }
 0xb1e   :  { %2614 = vrcp.f32 %v1018_v32 }
 0xb2b   :  { %v3045_v34 = vpop.eup %2614 }
 0xb31   :  { %1028 = vrot.lane.b32.xlu0 %v2611_v29, %s2678_s22 }
 0xba4   :  { %v834_v33 = vpop.xlane.xlu0 %833 }
 0xba5   :  { %2616 = vrcp.f32 %v834_v33 }
 0xba8   :  { %v1029_v35 = vpop.permute.xlu0 %1028 }
 0xba9   :  { %v1031_v37 = vmul.f32 %v3045_v34, %v1029_v35 }
 0xbab   :  { %1033 = vrot.lane.b32.xlu0 %v1031_v37, %s2679_s3 }
 0xbb2   :  { %v2617_v38 = vpop.eup %2616 }
 0xbb3   :  { %v836_v0 = vmul.f32 %v2617_v38, %v2609_v24  ;;  %v1987_v24 = vld [vmem:[#allocation2] sm:$0x3] }
 0xbb4   :  { %v2014_v25 = vcombine.low %v1987_v24, %v1988_v23 }
 0xbb5   :  { %v840_v39 = vrot.slane %v836_v0, %v2892_v56  ;;  %2250 = vst.msk [vmem:[%s3321_s14 + $0x6] sm:$0x3] %vm116_vm4, %v836_v0  ;;  %v847_v41 = vrot.slane %v836_v0, %v2895_v59 }
 0xbb7   :  { %842 = vbcast.lane.b32.xlu1 %v840_v39, 256 }
 0xbbb   :  { %849 = vbcast.lane.b32.xlu1 %v847_v41, 256 }
 0xc1d   :  { %v1034_v1 = vpop.permute.xlu0 %1033 }
 0xc29   :  { %v843_v42 = vpop.permute.xlu1 %842 }
 0xc2a   :  { %v851_v43 = vmul.f32 %v843_v42, %v2767_v2 }
 0xc2c   :  { %v853_v44 = vsel %vm59_vm1, %v851_v43, 0.0 }
 0xc2d   :  { %v854_v45 = vrot.slane %v853_v44, 4  ;;  %v850_v46 = vpop.permute.xlu1 %849 }
 0xc2e   :  { %v852_v47 = vmul.f32 %v850_v46, %v2781_v8  ;;  %v2251_v8 = vld [vmem:[%s3319_s2 + $0x8] sm:$0x3] }
 0xc2f   :  { %v855_v48 = vadd.f32 %v854_v45, %v853_v44  ;;  %2465 = vmatmul.mubr.msk.f32.vlgmr.msra.gmra.mxu0 %vm59_vm1, %v2251_v8 }
 0xc30   :  { %v860_v50 = vsel %vm59_vm1, %v852_v47, 0.0  ;;  %2479 = vmatpush3.msra.mxu0 %v2787_v9  ;;  %2486 = vmatprep.mubr.msk.f32.mxu0 %vm2677_vm2, %v2676_v5 }
 0xc31   :  { %v856_v51 = vrot.slane %v855_v48, 2  ;;  %v861_v52 = vrot.slane %v860_v50, 4  ;;  %2480 = vmatprep.subr.mxu0 %v2676_v5 }
 0xc32   :  { %2481 = vmatpush3.msra.mxu0 %v2802_v13 }
 0xc33   :  { %v857_v53 = vadd.f32 %v856_v51, %v855_v48  ;;  %v862_v54 = vadd.f32 %v861_v52, %v860_v50  ;;  %2482 = vmatprep.subr.mxu0 %v2676_v5 }
 0xc34   :  { %2483 = vmatpush3.msra.mxu0 %v2819_v17 }
 0xc35   :  { %v863_v55 = vrot.slane %v862_v54, 2  ;;  %v858_v57 = vrot.slane %v857_v53, 1  ;;  %2484 = vmatprep.subr.mxu0 %v2676_v5 }
 0xc36   :  { %2485 = vmatpush3.msra.mxu0 %v2835_v20 }
 0xc37   :  { %v864_v58 = vadd.f32 %v863_v55, %v862_v54  ;;  %v859_v61 = vadd.f32 %v858_v57, %v857_v53  ;;  %2500 = vmatprep.subr.mxu0 %v2676_v5  ;;  %2487 = vmatmul.mubr.msk.f32.vlgmr.msra.gmra.mxu0 %vm59_vm1, %v2256_v4 }
 0xc38   :  { %2501 = vmatpush3.msra.mxu0 %v2787_v9  ;;  %2508 = vmatprep.mubr.msk.f32.mxu0 %vm2677_vm2, %v2676_v5 }
 0xc39   :  { %v865_v60 = vrot.slane %v864_v58, 1  ;;  %2502 = vmatprep.subr.mxu0 %v2676_v5 }
 0xc3a   :  { %2503 = vmatpush3.msra.mxu0 %v2802_v13 }
 0xc3b   :  { %v866_v62 = vadd.f32 %v865_v60, %v864_v58  ;;  %2504 = vmatprep.subr.mxu0 %v2676_v5  ;;  %v3145_v60 = vld [vmem:[%s3314_s0] sm:$0xff] }
 0xc3c   :  { %2505 = vmatpush3.msra.mxu0 %v2819_v17 }
 0xc3d   :  { %v1024_v2 = vsel %vm112_vm3, %v866_v62, %v859_v61  ;;  %2506 = vmatprep.subr.mxu0 %v2676_v5 }
 0xc3e   :  { %v1026_v63 = vmul.f32 %v3045_v34, %v1024_v2  ;;  %2507 = vmatpush3.msra.mxu0 %v2835_v20 }
 0xc3f   :  { %2522 = vmatprep.subr.mxu0 %v2676_v5  ;;  %2509 = vmatmul.mubr.msk.f32.vlgmr.msra.gmra.mxu0 %vm59_vm1, %v2261_v7 }
 0xc40   :  { %v1036_v3 = vadd.f32 %v1034_v1, %v1026_v63  ;;  %2523 = vmatpush3.msra.mxu0 %v2787_v9  ;;  %2530 = vmatprep.mubr.msk.f32.mxu0 %vm2677_vm2, %v2676_v5  ;;  %v3152_v1 = vld [vmem:[%s3314_s0 + $0x8] sm:$0xff] }
 0xc41   :  { %2524 = vmatprep.subr.mxu0 %v2676_v5 }
 0xc42   :  { %2618 = vtanh.f32 %v1036_v3  ;;  %2525 = vmatpush3.msra.mxu0 %v2802_v13  ;;  %v2680_v13 = vmov 1983009808  }
 0xc43   :  { %2526 = vmatprep.subr.mxu0 %v2676_v5 }
 0xc44   :  { %2527 = vmatpush3.msra.mxu0 %v2819_v17  ;;  %v2017_v17 = vunpack.c.l.s4 %v2680_v13 }
 0xc45   :  { %2528 = vmatprep.subr.mxu0 %v2676_v5 }
 0xc46   :  { %2529 = vmatpush3.msra.mxu0 %v2835_v20  ;;  %v2018_v22 = vunpack.c.0.s8 %v2017_v17 }
 0xc47   :  { %2531 = vmatmul.mubr.msk.f32.vlgmr.msra.gmra.mxu0 %vm59_vm1, %v2266_v10 }
 0xc4f   :  { %v2619_v6 = vpop.eup %2618 }
 0xc50   :  { %1039 = vrot.lane.b32.xlu1 %v2619_v6, %s2678_s22 }
 0xcc2   :  { %v1040_v11 = vpop.permute.xlu1 %1039 }
 0xcc3   :  { %v1042_v9 = vmul.f32 %v3045_v34, %v1040_v11 }
 0xcc5   :  { %v1051_v14 = vmul.f32 %v1042_v9, %v2927_v40  ;;  %1044 = vrot.lane.b32.xlu0 %v1042_v9, %s2678_s22 }
 0xcc7   :  { %1053 = vrot.lane.b32.xlu1 %v1051_v14, %s2678_s22 }
 0xd37   :  { %v1045_v16 = vpop.permute.xlu0 %1044 }
 0xd38   :  { %1048 = vst.msk [vmem:[#allocation2 + $0x6] sm:$0x3] %vm96_vm0, %v1045_v16  ;;  %2476 = vmatmul.mubr.msk.f32.vlgmr.msra.gmra.mxu1 %vm59_vm1, %v1045_v16 }
 0xd39   :  { %v1054_v19 = vpop.permute.xlu1 %1053  ;;  %2490 = vmatpush3.msra.mxu1 %v2797_v12  ;;  %2497 = vmatprep.mubr.msk.f32.mxu1 %vm2677_vm2, %v2676_v5  ;;  %v3122_v12 = vsub.s32 %v2018_v22, %v2875_v26 }
 0xd3a   :  { %v1056_v20 = vsel %vm96_vm0, %v1054_v19, 0.0  ;;  %2491 = vmatprep.subr.mxu1 %v2676_v5 }
 0xd3b   :  { %1057 = vadd.xlane.f32.xlu0 %v1056_v20  ;;  %2492 = vmatpush3.msra.mxu1 %v2812_v15  ;;  %v2022_v15 = vrot.slane %v2014_v25, %v3122_v12 }
 0xd3c   :  { %2493 = vmatprep.subr.mxu1 %v2676_v5 }
 0xd3d   :  { %2494 = vmatpush3.msra.mxu1 %v2825_v18  ;;  %v1172_v18 = vpop.f32.mrf.mxu0 }
 0xd3e   :  { %2495 = vmatprep.subr.mxu1 %v2676_v5 }
 0xd3f   :  { %v1990_v28 = vld [vmem:[#allocation2 + $0x6] sm:$0x3]  ;;  %2496 = vmatpush3.msra.mxu1 %v2840_v21  ;;  %v2466_v32 = vpop.f32.mrf.mxu0 }
 0xd40   :  { %v2015_v29 = vcombine.low %v1989_v27, %v1990_v28  ;;  %2511 = vmatprep.subr.mxu1 %v2676_v5  ;;  %v3176_v32 = vld [vmem:[%s3318_s6 + $0x10] sm:$0xff] }
 0xd42   :  { %v2029_v30 = vrot.slane %v2015_v29, %v3122_v12 }
 0xd44   :  { %v2030_v31 = vcombine.low %v2022_v15, %v2029_v30 }
 0xd46   :  { %2552 = vmatprep.mubr.msk.f32.mxu0 %vm59_vm1, %v2030_v31  ;;  %v3166_v31 = vld [vmem:[%s3318_s6 + $0x18] sm:$0xff] }
 0xdc4   :  { %v1058_v26 = vpop.xlane.xlu0 %1057 }
 0xdc5   :  { %v1059_v33 = vadd.f32 %v1058_v26, %v2879_v36  ;;  %v3183_v26 = vld [vmem:[%s3318_s6 + $0x8] sm:$0xff] }
 0xdc7   :  { %v1060_v34 = vsel %vm116_vm4, %v1059_v33, -inf }
 0xdc8   :  { %1061 = vmax.xlane.f32.xlu1 %v1060_v34  ;;  %v1406_v34 = vpop.f32.mrf.mxu0 }
 0xdf8   :  { %v1244_v35 = vpop.f32.mrf.mxu1 }
 0xdf9   :  { %v1245_v42 = vadd.f32 %v1244_v35, %v1172_v18  ;;  %v2488_v35 = vpop.f32.mrf.mxu0 }
 0xdfa   :  { %v2477_v21 = vpop.f32.mrf.mxu1 }
 0xdfb   :  { %v1248_v43 = vadd.f32 %v2887_v49, %v1245_v42 }
 0xdfd   :  { %v2254_v45 = vmul.f32 -1.442695, %v1248_v43 }
 0xe51   :  { %v1062_v37 = vpop.xlane.xlu1 %1061 }
 0xe52   :  { %v1063_v38 = vsub.f32 %v1059_v33, %v1062_v37  ;;  %v3190_v33 = vld [vmem:[%s3318_s6] sm:$0xff] }
 0xe54   :  { %v1064_v0 = vmul.f32 1.442695, %v1063_v38 }
 0xe56   :  { %2620 = vpow2.f32 %v1064_v0 }
 0xe57   :  { %2622 = vtanh.f32 %v1248_v43 }
 0xe58   :  { %2624 = vpow2.f32 %v2254_v45 }
 0xe63   :  { %v2621_v39 = vpop.eup %2620 }
 0xe64   :  { %v1066_v41 = vsel %vm116_vm4, %v2621_v39, 0.0  ;;  %v2623_v44 = vpop.eup %2622 }
 0xe65   :  { %1067 = vadd.xlane.f32.xlu0 %v1066_v41  ;;  %v2625_v46 = vpop.eup %2624 }
 0xe66   :  { %v1252_v47 = vadd.f32 1.0, %v2625_v46 }
 0xe68   :  { %2626 = vrcp.f32 %v1252_v47 }
 0xe75   :  { %v2627_v50 = vpop.eup %2626 }
 0xe7b   :  { %1262 = vrot.lane.b32.xlu0 %v2623_v44, %s2678_s22 }
 0xeee   :  { %v1068_v48 = vpop.xlane.xlu0 %1067 }
 0xeef   :  { %2628 = vrcp.f32 %v1068_v48 }
 0xef2   :  { %v1263_v51 = vpop.permute.xlu0 %1262 }
 0xef3   :  { %v1265_v52 = vmul.f32 %v2627_v50, %v1263_v51 }
 0xef5   :  { %1267 = vrot.lane.b32.xlu0 %v1265_v52, %s2679_s3 }
 0xefc   :  { %v2629_v53 = vpop.eup %2628 }
 0xefd   :  { %v1070_v54 = vmul.f32 %v2629_v53, %v2621_v39 }
 0xeff   :  { %v1074_v55 = vrot.slane %v1070_v54, %v2892_v56  ;;  %2255 = vst.msk [vmem:[%s3321_s14 + $0x8] sm:$0x3] %vm116_vm4, %v1070_v54  ;;  %v1081_v57 = vrot.slane %v1070_v54, %v2895_v59 }
 0xf01   :  { %1076 = vbcast.lane.b32.xlu1 %v1074_v55, 256 }
 0xf05   :  { %1083 = vbcast.lane.b32.xlu1 %v1081_v57, 256 }
 0xf67   :  { %v1268_v23 = vpop.permute.xlu0 %1267 }
 0xf73   :  { %v1077_v58 = vpop.permute.xlu1 %1076 }
 0xf74   :  { %v1085_v61 = vmul.f32 %v3145_v60, %v1077_v58 }
 0xf76   :  { %v1087_v62 = vsel %vm59_vm1, %v1085_v61, 0.0 }
 0xf77   :  { %v1088_v2 = vrot.slane %v1087_v62, 4  ;;  %v1084_v63 = vpop.permute.xlu1 %1083 }
 0xf78   :  { %v1086_v3 = vmul.f32 %v3152_v1, %v1084_v63 }
 0xf79   :  { %v1089_v8 = vadd.f32 %v1088_v2, %v1087_v62 }
 0xf7a   :  { %v1094_v4 = vsel %vm59_vm1, %v1086_v3, 0.0 }
 0xf7b   :  { %v1090_v6 = vrot.slane %v1089_v8, 2  ;;  %v1095_v7 = vrot.slane %v1094_v4, 4 }
 0xf7d   :  { %v1091_v10 = vadd.f32 %v1090_v6, %v1089_v8  ;;  %v1096_v11 = vadd.f32 %v1095_v7, %v1094_v4 }
 0xf7f   :  { %v1097_v9 = vrot.slane %v1096_v11, 2  ;;  %v1092_v14 = vrot.slane %v1091_v10, 1 }
 0xf81   :  { %v1098_v13 = vadd.f32 %v1097_v9, %v1096_v11  ;;  %v1093_v16 = vadd.f32 %v1092_v14, %v1091_v10 }
 0xf83   :  { %v1099_v17 = vrot.slane %v1098_v13, 1 }
 0xf85   :  { %v1100_v19 = vadd.f32 %v1099_v17, %v1098_v13 }
 0xf87   :  { %v1258_v20 = vsel %vm112_vm3, %v1100_v19, %v1093_v16 }
 0xf88   :  { %v1260_v22 = vmul.f32 %v2627_v50, %v1258_v20 }
 0xf8a   :  { %v1270_v24 = vadd.f32 %v1268_v23, %v1260_v22 }
 0xf8c   :  { %2630 = vtanh.f32 %v1270_v24 }
 0xf99   :  { %v2631_v25 = vpop.eup %2630 }
 0xf9a   :  { %1273 = vrot.lane.b32.xlu1 %v2631_v25, %s2678_s22 }
0x100c   :  { %v1274_v27 = vpop.permute.xlu1 %1273 }
0x100d   :  { %v1276_v28 = vmul.f32 %v2627_v50, %v1274_v27 }
0x100f   :  { %v1285_v29 = vmul.f32 %v1276_v28, %v2927_v40  ;;  %1278 = vrot.lane.b32.xlu0 %v1276_v28, %s2678_s22 }
0x1011   :  { %1287 = vrot.lane.b32.xlu1 %v1285_v29, %s2678_s22 }
0x1081   :  { %v1279_v15 = vpop.permute.xlu0 %1278 }
0x1082   :  { %1282 = vst.msk [vmem:[#allocation2 + $0x8] sm:$0x3] %vm96_vm0, %v1279_v15  ;;  %2498 = vmatmul.mubr.msk.f32.vlgmr.msra.gmra.mxu1 %vm59_vm1, %v1279_v15 }
0x1083   :  { %v1288_v30 = vpop.permute.xlu1 %1287  ;;  %2512 = vmatpush3.msra.mxu1 %v3166_v31  ;;  %2519 = vmatprep.mubr.msk.f32.mxu1 %vm2677_vm2, %v2676_v5 }
0x1084   :  { %v1290_v18 = vsel %vm96_vm0, %v1288_v30, 0.0  ;;  %2513 = vmatprep.subr.mxu1 %v2676_v5 }
0x1085   :  { %1291 = vadd.xlane.f32.xlu0 %v1290_v18  ;;  %2514 = vmatpush3.msra.mxu1 %v3176_v32 }
0x1086   :  { %2515 = vmatprep.subr.mxu1 %v2676_v5 }
0x1087   :  { %2516 = vmatpush3.msra.mxu1 %v3183_v26 }
0x1088   :  { %2517 = vmatprep.subr.mxu1 %v2676_v5 }
0x1089   :  { %2518 = vmatpush3.msra.mxu1 %v3190_v33 }
0x108a   :  { %2533 = vmatprep.subr.mxu1 %v2676_v5 }
0x110e   :  { %v1292_v21 = vpop.xlane.xlu0 %1291 }
0x110f   :  { %v1293_v37 = vadd.f32 %v1292_v21, %v2879_v36 }
0x1111   :  { %v1294_v38 = vsel %vm116_vm4, %v1293_v37, -inf }
0x1112   :  { %1295 = vmax.xlane.f32.xlu1 %v1294_v38 }
0x1142   :  { %v1478_v0 = vpop.f32.mrf.mxu1 }
0x1143   :  { %v1479_v46 = vadd.f32 %v1478_v0, %v1406_v34 }
0x1144   :  { %v2499_v39 = vpop.f32.mrf.mxu1 }
0x1145   :  { %v1482_v47 = vadd.f32 %v2887_v49, %v1479_v46 }
0x1147   :  { %v2259_v50 = vmul.f32 -1.442695, %v1482_v47 }
0x119b   :  { %v1296_v41 = vpop.xlane.xlu1 %1295 }
0x119c   :  { %v1297_v42 = vsub.f32 %v1293_v37, %v1296_v41  ;;  %v1640_v37 = vpop.f32.mrf.mxu0 }
0x119e   :  { %v1298_v43 = vmul.f32 1.442695, %v1297_v42 }
0x11a0   :  { %2632 = vpow2.f32 %v1298_v43 }
0x11a1   :  { %2634 = vtanh.f32 %v1482_v47 }
0x11a2   :  { %2636 = vpow2.f32 %v2259_v50 }
0x11ad   :  { %v2633_v44 = vpop.eup %2632 }
0x11ae   :  { %v1300_v45 = vsel %vm116_vm4, %v2633_v44, 0.0  ;;  %v2635_v48 = vpop.eup %2634 }
0x11af   :  { %1301 = vadd.xlane.f32.xlu0 %v1300_v45  ;;  %v2637_v51 = vpop.eup %2636 }
0x11b0   :  { %v1486_v52 = vadd.f32 1.0, %v2637_v51 }
0x11b2   :  { %2638 = vrcp.f32 %v1486_v52 }
0x11bf   :  { %v2639_v54 = vpop.eup %2638 }
0x11c5   :  { %1496 = vrot.lane.b32.xlu0 %v2635_v48, %s2678_s22 }
0x1238   :  { %v1302_v53 = vpop.xlane.xlu0 %1301 }
0x1239   :  { %2640 = vrcp.f32 %v1302_v53 }
0x123c   :  { %v1497_v55 = vpop.permute.xlu0 %1496 }
0x123d   :  { %v1499_v57 = vmul.f32 %v2639_v54, %v1497_v55 }
0x123f   :  { %1501 = vrot.lane.b32.xlu0 %v1499_v57, %s2679_s3 }
0x1246   :  { %v2641_v58 = vpop.eup %2640 }
0x1247   :  { %v1304_v61 = vmul.f32 %v2641_v58, %v2633_v44 }
0x1249   :  { %v1308_v49 = vrot.slane %v1304_v61, %v2892_v56  ;;  %2260 = vst.msk [vmem:[%s3321_s14 + $0xa] sm:$0x3] %vm116_vm4, %v1304_v61  ;;  %v1315_v62 = vrot.slane %v1304_v61, %v2895_v59 }
0x124b   :  { %1310 = vbcast.lane.b32.xlu1 %v1308_v49, 256 }
0x124f   :  { %1317 = vbcast.lane.b32.xlu1 %v1315_v62, 256 }
0x12b1   :  { %v1502_v27 = vpop.permute.xlu0 %1501 }
0x12bd   :  { %v1311_v2 = vpop.permute.xlu1 %1310 }
0x12be   :  { %v1319_v63 = vmul.f32 %v3145_v60, %v1311_v2 }
0x12c0   :  { %v1321_v3 = vsel %vm59_vm1, %v1319_v63, 0.0 }
0x12c1   :  { %v1322_v8 = vrot.slane %v1321_v3, 4  ;;  %v1318_v4 = vpop.permute.xlu1 %1317 }
0x12c2   :  { %v1320_v6 = vmul.f32 %v3152_v1, %v1318_v4 }
0x12c3   :  { %v1323_v7 = vadd.f32 %v1322_v8, %v1321_v3 }
0x12c4   :  { %v1328_v10 = vsel %vm59_vm1, %v1320_v6, 0.0 }
0x12c5   :  { %v1324_v11 = vrot.slane %v1323_v7, 2  ;;  %v1329_v9 = vrot.slane %v1328_v10, 4 }
0x12c7   :  { %v1325_v14 = vadd.f32 %v1324_v11, %v1323_v7  ;;  %v1330_v13 = vadd.f32 %v1329_v9, %v1328_v10 }
0x12c9   :  { %v1331_v17 = vrot.slane %v1330_v13, 2  ;;  %v1326_v16 = vrot.slane %v1325_v14, 1 }
0x12cb   :  { %v1332_v19 = vadd.f32 %v1331_v17, %v1330_v13  ;;  %v1327_v22 = vadd.f32 %v1326_v16, %v1325_v14 }
0x12cd   :  { %v1333_v20 = vrot.slane %v1332_v19, 1 }
0x12cf   :  { %v1334_v23 = vadd.f32 %v1333_v20, %v1332_v19 }
0x12d1   :  { %v1492_v24 = vsel %vm112_vm3, %v1334_v23, %v1327_v22 }
0x12d2   :  { %v1494_v25 = vmul.f32 %v2639_v54, %v1492_v24 }
0x12d4   :  { %v1504_v28 = vadd.f32 %v1502_v27, %v1494_v25 }
0x12d6   :  { %2642 = vtanh.f32 %v1504_v28 }
0x12e3   :  { %v2643_v29 = vpop.eup %2642 }
0x12e4   :  { %1507 = vrot.lane.b32.xlu1 %v2643_v29, %s2678_s22 }
0x1356   :  { %v1508_v15 = vpop.permute.xlu1 %1507 }
0x1357   :  { %v1510_v30 = vmul.f32 %v2639_v54, %v1508_v15 }
0x1359   :  { %v1519_v18 = vmul.f32 %v1510_v30, %v2927_v40  ;;  %1512 = vrot.lane.b32.xlu0 %v1510_v30, %s2678_s22 }
0x135b   :  { %1521 = vrot.lane.b32.xlu1 %v1519_v18, %s2678_s22 }
0x13cb   :  { %v1513_v34 = vpop.permute.xlu0 %1512 }
0x13cc   :  { %1516 = vst.msk [vmem:[#allocation2 + $0xa] sm:$0x3] %vm96_vm0, %v1513_v34  ;;  %2520 = vmatmul.mubr.msk.f32.vlgmr.msra.gmra.mxu1 %vm59_vm1, %v1513_v34 }
0x13cd   :  { %v1522_v35 = vpop.permute.xlu1 %1521  ;;  %2534 = vmatpush3.msra.mxu1 %v3166_v31  ;;  %2541 = vmatprep.mubr.msk.f32.mxu1 %vm2677_vm2, %v2676_v5  ;;  %v2510_v31 = vpop.f32.mrf.mxu0 }
0x13ce   :  { %v1524_v21 = vsel %vm96_vm0, %v1522_v35, 0.0  ;;  %2535 = vmatprep.subr.mxu1 %v2676_v5 }
0x13cf   :  { %1525 = vadd.xlane.f32.xlu0 %v1524_v21  ;;  %2536 = vmatpush3.msra.mxu1 %v3176_v32  ;;  %v1874_v21 = vpop.f32.mrf.mxu0 }
0x13d0   :  { %2537 = vmatprep.subr.mxu1 %v2676_v5 }
0x13d1   :  { %2538 = vmatpush3.msra.mxu1 %v3183_v26 }
0x13d2   :  { %2539 = vmatprep.subr.mxu1 %v2676_v5 }
0x13d3   :  { %2540 = vmatpush3.msra.mxu1 %v3190_v33  ;;  %v3233_v33 = vld [vmem:[%s3320_s8] ss:$0 sm:$0xff] }
0x1458   :  { %v1526_v38 = vpop.xlane.xlu0 %1525 }
0x1459   :  { %v1527_v0 = vadd.f32 %v1526_v38, %v2879_v36 }
0x145b   :  { %v1528_v39 = vsel %vm116_vm4, %v1527_v0, -inf }
0x145c   :  { %1529 = vmax.xlane.f32.xlu1 %v1528_v39 }
0x148c   :  { %v1712_v41 = vpop.f32.mrf.mxu1 }
0x148d   :  { %v1713_v5 = vadd.f32 %v1712_v41, %v1640_v37  ;;  %v2532_v37 = vpop.f32.mrf.mxu0 }
0x148e   :  { %v2521_v42 = vpop.f32.mrf.mxu1 }
0x148f   :  { %v1716_v46 = vadd.f32 %v3233_v33, %v1713_v5 }
0x1491   :  { %v2264_v48 = vmul.f32 -1.442695, %v1716_v46 }
0x14e5   :  { %v1530_v43 = vpop.xlane.xlu1 %1529 }
0x14e6   :  { %v1531_v32 = vsub.f32 %v1527_v0, %v1530_v43 }
0x14e8   :  { %v1532_v44 = vmul.f32 1.442695, %v1531_v32 }
0x14ea   :  { %2644 = vpow2.f32 %v1532_v44 }
0x14eb   :  { %2646 = vtanh.f32 %v1716_v46 }
0x14ec   :  { %2648 = vpow2.f32 %v2264_v48 }
0x14f7   :  { %v2645_v45 = vpop.eup %2644 }
0x14f8   :  { %v1534_v26 = vsel %vm116_vm4, %v2645_v45, 0.0  ;;  %v2647_v47 = vpop.eup %2646 }
0x14f9   :  { %1535 = vadd.xlane.f32.xlu0 %v1534_v26  ;;  %v2649_v50 = vpop.eup %2648 }
0x14fa   :  { %v1720_v51 = vadd.f32 1.0, %v2649_v50 }
0x14fc   :  { %2650 = vrcp.f32 %v1720_v51 }
0x1509   :  { %v2651_v53 = vpop.eup %2650 }
0x150f   :  { %1730 = vrot.lane.b32.xlu0 %v2647_v47, %s2678_s22 }
0x1582   :  { %v1536_v52 = vpop.xlane.xlu0 %1535 }
0x1583   :  { %2652 = vrcp.f32 %v1536_v52 }
0x1586   :  { %v1731_v54 = vpop.permute.xlu0 %1730 }
0x1587   :  { %v1733_v55 = vmul.f32 %v2651_v53, %v1731_v54 }
0x1589   :  { %1735 = vrot.lane.b32.xlu0 %v1733_v55, %s2679_s3 }
0x1590   :  { %v2653_v57 = vpop.eup %2652 }
0x1591   :  { %v1538_v58 = vmul.f32 %v2653_v57, %v2645_v45 }
0x1593   :  { %v1542_v61 = vrot.slane %v1538_v58, %v2892_v56  ;;  %2265 = vst.msk [vmem:[%s3321_s14 + $0xc] sm:$0x3] %vm116_vm4, %v1538_v58  ;;  %v1549_v49 = vrot.slane %v1538_v58, %v2895_v59 }
0x1595   :  { %1544 = vbcast.lane.b32.xlu1 %v1542_v61, 256 }
0x1599   :  { %1551 = vbcast.lane.b32.xlu1 %v1549_v49, 256 }
0x15fb   :  { %v1736_v25 = vpop.permute.xlu0 %1735 }
0x1607   :  { %v1545_v62 = vpop.permute.xlu1 %1544 }
0x1608   :  { %v1553_v2 = vmul.f32 %v3145_v60, %v1545_v62 }
0x160a   :  { %v1555_v63 = vsel %vm59_vm1, %v1553_v2, 0.0 }
0x160b   :  { %v1556_v3 = vrot.slane %v1555_v63, 4  ;;  %v1552_v8 = vpop.permute.xlu1 %1551 }
0x160c   :  { %v1554_v4 = vmul.f32 %v3152_v1, %v1552_v8 }
0x160d   :  { %v1557_v6 = vadd.f32 %v1556_v3, %v1555_v63 }
0x160e   :  { %v1562_v7 = vsel %vm59_vm1, %v1554_v4, 0.0 }
0x160f   :  { %v1558_v10 = vrot.slane %v1557_v6, 2  ;;  %v1563_v11 = vrot.slane %v1562_v7, 4 }
0x1611   :  { %v1559_v9 = vadd.f32 %v1558_v10, %v1557_v6  ;;  %v1564_v14 = vadd.f32 %v1563_v11, %v1562_v7 }
0x1613   :  { %v1565_v13 = vrot.slane %v1564_v14, 2  ;;  %v1560_v17 = vrot.slane %v1559_v9, 1 }
0x1615   :  { %v1566_v16 = vadd.f32 %v1565_v13, %v1564_v14  ;;  %v1561_v20 = vadd.f32 %v1560_v17, %v1559_v9 }
0x1617   :  { %v1567_v19 = vrot.slane %v1566_v16, 1 }
0x1619   :  { %v1568_v22 = vadd.f32 %v1567_v19, %v1566_v16  ;;  %v1998_v19 = vld [vmem:[%s3322_s9 + $0x18] sm:$0xff] }
0x161a   :  { %2544 = vmatprep.subr.mxu0 %v1998_v19 }
0x161b   :  { %v1726_v23 = vsel %vm112_vm3, %v1568_v22, %v1561_v20  ;;  %v1997_v20 = vld [vmem:[%s3322_s9 + $0x10] sm:$0xff]  ;;  %2545 = vmatpush3.msra.mxu0 %v1998_v19  ;;  %v1996_v22 = vld [vmem:[%s3322_s9 + $0x8] sm:$0xff] }
0x161c   :  { %v1728_v24 = vmul.f32 %v2651_v53, %v1726_v23  ;;  %2546 = vmatprep.subr.mxu0 %v1997_v20  ;;  %v1995_v23 = vld [vmem:[%s3322_s9] sm:$0xff] }
0x161d   :  { %2547 = vmatpush3.msra.mxu0 %v1997_v20 }
0x161e   :  { %v1738_v27 = vadd.f32 %v1736_v25, %v1728_v24  ;;  %2548 = vmatprep.subr.mxu0 %v1996_v22 }
0x161f   :  { %2549 = vmatpush3.msra.mxu0 %v1996_v22 }
0x1620   :  { %2654 = vtanh.f32 %v1738_v27  ;;  %2550 = vmatprep.subr.mxu0 %v1995_v23 }
0x1621   :  { %2551 = vmatpush3.msra.mxu0 %v1995_v23 }
0x162d   :  { %v2655_v28 = vpop.eup %2654 }
0x162e   :  { %1741 = vrot.lane.b32.xlu1 %v2655_v28, %s2678_s22  ;;  %v1992_v28 = vld [vmem:[#allocation2 + $0xa] sm:$0x3] }
0x16a0   :  { %v1742_v29 = vpop.permute.xlu1 %1741 }
0x16a1   :  { %v1744_v15 = vmul.f32 %v2651_v53, %v1742_v29  ;;  %v1991_v29 = vld [vmem:[#allocation2 + $0x8] sm:$0x3] }
0x16a3   :  { %v1753_v30 = vmul.f32 %v1744_v15, %v2927_v40  ;;  %1746 = vrot.lane.b32.xlu0 %v1744_v15, %s2678_s22  ;;  %v2031_v15 = vcombine.low %v1991_v29, %v1992_v28 }
0x16a5   :  { %1755 = vrot.lane.b32.xlu1 %v1753_v30, %s2678_s22 }
0x1715   :  { %v1747_v18 = vpop.permute.xlu0 %1746 }
0x1716   :  { %1750 = vst.msk [vmem:[#allocation2 + $0xc] sm:$0x3] %vm96_vm0, %v1747_v18  ;;  %2542 = vmatmul.mubr.msk.f32.vlgmr.msra.gmra.mxu1 %vm59_vm1, %v1747_v18 }
0x1717   :  { %v1756_v34 = vpop.permute.xlu1 %1755 }
0x1718   :  { %v1758_v35 = vsel %vm96_vm0, %v1756_v34, 0.0 }
0x1719   :  { %1759 = vadd.xlane.f32.xlu0 %v1758_v35  ;;  %v2039_v35 = vrot.slane %v2031_v15, %v3122_v12 }
0x171d   :  { %v1993_v30 = vld [vmem:[#allocation2 + $0xc] sm:$0x3] }
0x17a2   :  { %v1760_v31 = vpop.xlane.xlu0 %1759 }
0x17a3   :  { %v1761_v38 = vadd.f32 %v1760_v31, %v2879_v36  ;;  %v2129_v31 = vld [vmem:[%s3323_s11 + $0x10] sm:$0xff] }
0x17a4   :  { %2555 = vmatprep.subr.mxu1 %v2129_v31 }
0x17a5   :  { %v1762_v40 = vsel %vm116_vm4, %v1761_v38, -inf  ;;  %2556 = vmatpush3.msra.mxu1 %v2129_v31 }
0x17a6   :  { %1763 = vmax.xlane.f32.xlu1 %v1762_v40  ;;  %v2127_v40 = vld [vmem:[%s3323_s11] sm:$0xff] }
0x17d6   :  { %v1946_v0 = vpop.f32.mrf.mxu1 }
0x17d7   :  { %v1947_v45 = vadd.f32 %v1946_v0, %v1874_v21  ;;  %v2271_v0 = vld [vmem:[%s3324_s10] ss:$0 sm:$0xff] }
0x17d8   :  { %v2543_v39 = vpop.f32.mrf.mxu1 }
0x17d9   :  { %v1950_v26 = vadd.f32 %v3233_v33, %v1947_v45 }
0x17db   :  { %v2269_v36 = vmul.f32 -1.442695, %v1950_v26 }
0x182f   :  { %v1764_v41 = vpop.xlane.xlu1 %1763 }
0x1830   :  { %v1765_v42 = vsub.f32 %v1761_v38, %v1764_v41  ;;  %v2128_v38 = vld [vmem:[%s3323_s11 + $0x8] sm:$0xff] }
0x1831   :  { %2557 = vmatprep.subr.mxu1 %v2128_v38 }
0x1832   :  { %v1766_v43 = vmul.f32 1.442695, %v1765_v42  ;;  %2558 = vmatpush3.msra.mxu1 %v2128_v38 }
0x1833   :  { %2559 = vmatprep.subr.mxu1 %v2127_v40 }
0x1834   :  { %2656 = vpow2.f32 %v1766_v43  ;;  %2560 = vmatpush3.msra.mxu1 %v2127_v40  ;;  %v2274_v43 = vld [vmem:[%s3325_s12] ss:$0 sm:$0xff] }
0x1835   :  { %2658 = vtanh.f32 %v1950_v26 }
0x1836   :  { %2660 = vpow2.f32 %v2269_v36 }
0x1841   :  { %v2657_v32 = vpop.eup %2656 }
0x1842   :  { %v1768_v44 = vsel %vm116_vm4, %v2657_v32, 0.0  ;;  %v2659_v5 = vpop.eup %2658 }
0x1843   :  { %1769 = vadd.xlane.f32.xlu0 %v1768_v44  ;;  %v2661_v46 = vpop.eup %2660 }
0x1844   :  { %v1954_v47 = vadd.f32 1.0, %v2661_v46 }
0x1846   :  { %2662 = vrcp.f32 %v1954_v47 }
0x1853   :  { %v2663_v50 = vpop.eup %2662 }
0x1859   :  { %1964 = vrot.lane.b32.xlu0 %v2659_v5, %s2678_s22 }
0x18cc   :  { %v1770_v48 = vpop.xlane.xlu0 %1769 }
0x18cd   :  { %2664 = vrcp.f32 %v1770_v48 }
0x18d0   :  { %v1965_v51 = vpop.permute.xlu0 %1964 }
0x18d1   :  { %v1967_v52 = vmul.f32 %v2663_v50, %v1965_v51 }
0x18d3   :  { %1969 = vrot.lane.b32.xlu0 %v1967_v52, %s2679_s3 }
0x18da   :  { %v2665_v53 = vpop.eup %2664 }
0x18db   :  { %v1772_v54 = vmul.f32 %v2665_v53, %v2657_v32 }
0x18dd   :  { %v1776_v33 = vrot.slane %v1772_v54, %v2892_v56  ;;  %2270 = vst.msk [vmem:[%s3321_s14 + $0xe] sm:$0x3] %vm116_vm4, %v1772_v54  ;;  %v1783_v55 = vrot.slane %v1772_v54, %v2895_v59 }
0x18df   :  { %1778 = vbcast.lane.b32.xlu1 %v1776_v33, 256 }
0x18e3   :  { %1785 = vbcast.lane.b32.xlu1 %v1783_v55, 256 }
0x1945   :  { %v1970_v17 = vpop.permute.xlu0 %1969 }
0x1951   :  { %v1779_v57 = vpop.permute.xlu1 %1778 }
0x1952   :  { %v1787_v58 = vmul.f32 %v3145_v60, %v1779_v57 }
0x1954   :  { %v1789_v61 = vsel %vm59_vm1, %v1787_v58, 0.0 }
0x1955   :  { %v1790_v49 = vrot.slane %v1789_v61, 4  ;;  %v1786_v62 = vpop.permute.xlu1 %1785 }
0x1956   :  { %v1788_v2 = vmul.f32 %v3152_v1, %v1786_v62 }
0x1957   :  { %v1791_v63 = vadd.f32 %v1790_v49, %v1789_v61 }
0x1958   :  { %v1796_v56 = vsel %vm59_vm1, %v1788_v2, 0.0 }
0x1959   :  { %v1792_v3 = vrot.slane %v1791_v63, 2  ;;  %v1797_v8 = vrot.slane %v1796_v56, 4 }
0x195b   :  { %v1793_v4 = vadd.f32 %v1792_v3, %v1791_v63  ;;  %v1798_v6 = vadd.f32 %v1797_v8, %v1796_v56 }
0x195d   :  { %v1799_v7 = vrot.slane %v1798_v6, 2  ;;  %v1794_v10 = vrot.slane %v1793_v4, 1 }
0x195f   :  { %v1800_v59 = vadd.f32 %v1799_v7, %v1798_v6  ;;  %v1795_v9 = vadd.f32 %v1794_v10, %v1793_v4 }
0x1961   :  { %v1801_v11 = vrot.slane %v1800_v59, 1 }
0x1963   :  { %v1802_v14 = vadd.f32 %v1801_v11, %v1800_v59 }
0x1965   :  { %v1960_v60 = vsel %vm112_vm3, %v1802_v14, %v1795_v9 }
0x1966   :  { %v1962_v13 = vmul.f32 %v2663_v50, %v1960_v60 }
0x1968   :  { %v1972_v16 = vadd.f32 %v1970_v17, %v1962_v13 }
0x196a   :  { %2666 = vtanh.f32 %v1972_v16 }
0x1977   :  { %v2667_v1 = vpop.eup %2666 }
0x1978   :  { %1975 = vrot.lane.b32.xlu1 %v2667_v1, %s2678_s22 }
0x19ea   :  { %v1976_v24 = vpop.permute.xlu1 %1975 }
0x19eb   :  { %v1978_v25 = vmul.f32 %v2663_v50, %v1976_v24 }
0x19ed   :  { %1980 = vrot.lane.b32.xlu0 %v1978_v25, %s2678_s22 }
0x1a5f   :  { %v1981_v27 = vpop.permute.xlu0 %1980 }
0x1a60   :  { %1984 = vst.msk [vmem:[#allocation2 + $0xe] sm:$0x3] %vm96_vm0, %v1981_v27 }
0x1a67   :  { %v1994_v18 = vld [vmem:[#allocation2 + $0xe] sm:$0x3] }
0x1a68   :  { %v2032_v34 = vcombine.low %v1993_v30, %v1994_v18 }
0x1a6a   :  { %v2046_v21 = vrot.slane %v2032_v34, %v3122_v12 }
0x1a6c   :  { %v2047_v37 = vcombine.low %v2039_v35, %v2046_v21 }
0x1a6e   :  { %2553 = vmatmul.mubr.msk.f32.vlgmr.msra.gmra.mxu0 %vm59_vm1, %v2047_v37 }
0x1b2e   :  { %v2554_v12 = vpop.f32.mrf.mxu0 }
0x1b2f   :  { %v2124_v42 = vadd.f32 %v2554_v12, %v2271_v0 }
0x1b30   :  { %v2118_v39 = vpop.f32.mrf.mxu0 }
0x1b31   :  { %v2119_v41 = vadd.f32 %v2271_v0, %v2118_v39 }
0x1b33   :  { %2561 = vmatprep.mubr.msk.f32.mxu1 %vm2137_vm5, %v2119_v41 }
0x1b34   :  { %2562 = vmatmul.mubr.msk.f32.vlgmr.msra.gmra.mxu1 %vm2137_vm5, %v2124_v42 }
0x1bf4   :  { %v2563_v32 = vpop.f32.mrf.mxu1 }
0x1bf5   :  { %v2216_v44 = vadd.f32 %v2563_v32, %v2274_v43 }
0x1bf6   :  { %v2210_v45 = vpop.f32.mrf.mxu1 }
0x1bf7   :  { %2220 = vst [vmem:[%s3326_s13 + $0x8] sm:$0xff] %v2216_v44  ;;  %v2211_v26 = vadd.f32 %v2274_v43, %v2210_v45 }
0x1bf9   :  { %2219 = vst [vmem:[%s3326_s13] sm:$0xff] %v2211_v26 }

// kernel: _lambda_.2
= control target key start
LH: loop header
LB: loop body
LE: loop exit
PB: predicated region body
PF: predicated region fallthrough
CT: control target
= control target key end

     0   :  { %v3916_v0 = vmov 0.0   ;;  %vm142_vm0 = vcmask 130048   ;;  %vm3917_vm1 = vmmov 0   ;;  %vm68_vm2 = vcmask 261120   ;;  %s3918_s21 = smov 96   ;;  %s3919_s22 = smov 112   ;;  %s4713_s6 = inlined_call_operand.vmem [shape: f32[32,64], index: 6, kind: input, shape index: {}]   ;;  %s4714_s5 = inlined_call_operand.vmem [shape: f32[16,64], index: 5, kind: input, shape index: {}]   ;;  %s4715_s1 = inlined_call_operand.vmem [shape: f32[2,16], index: 1, kind: input, shape index: {}]   ;;  %s4716_s9 = inlined_call_operand.vmem [shape: f32[32,64], index: 9, kind: input, shape index: {}]   ;;  %s4717_s0 = inlined_call_operand.vmem [shape: f32[8,2,32], index: 0, kind: input, shape index: {}]   ;;  %s4718_s8 = inlined_call_operand.vmem [shape: f32[16,64], index: 8, kind: input, shape index: {}]   ;;  %s4719_s3 = inlined_call_operand.vmem [shape: f32[2,16], index: 3, kind: input, shape index: {}]   ;;  %s4720_s7 = inlined_call_operand.vmem [shape: f32[1,64], index: 7, kind: input, shape index: {}]   ;;  %s4721_s10 = inlined_call_operand.vmem [shape: f32[1,64], index: 10, kind: input, shape index: {}]   ;;  %s4722_s2 = inlined_call_operand.vmem [shape: f32[2,16], index: 2, kind: input, shape index: {}]   ;;  %s4723_s4 = inlined_call_operand.vmem [shape: f32[2,16], index: 4, kind: input, shape index: {}]   ;;  %s4724_s11 = inlined_call_operand.vmem [shape: f32[16,32], index: 11, kind: input, shape index: {}]   ;;  %s4725_s12 = inlined_call_operand.vmem [shape: f32[16,32], index: 12, kind: input, shape index: {}]   ;;  %s4726_s15 = inlined_call_operand.vmem [shape: f32[2,32], index: 15, kind: output, shape index: {1}]   ;;  %s4727_s13 = inlined_call_operand.vmem [shape: f32[1,32], index: 13, kind: input, shape index: {}]   ;;  %s4728_s14 = inlined_call_operand.vmem [shape: f32[8,2,32], index: 14, kind: output, shape index: {0}]  }
   0x1   :  { %3465 = vmatprep.subr.mxu0 %v3916_v0  ;;  %3476 = vmatprep.subr.mxu1 %v3916_v0  ;;  %v4008_v1 = vld [vmem:[%s4713_s6 + $0x18] sm:$0xff]  ;;  %v4013_v2 = vld [vmem:[%s4714_s5 + $0x8] sm:$0xff]  ;;  %v4018_v3 = vld [vmem:[%s4713_s6 + $0x10] sm:$0xff]  ;;  %vm430_vm3 = vcmask 123904   ;;  %vm3236_vm4 = vcmask 254976  }
   0x2   :  { %3466 = vmatpush3.msra.mxu0 %v4008_v1  ;;  %3477 = vmatpush3.msra.mxu1 %v4013_v2  ;;  %v4025_v4 = vld [vmem:[%s4714_s5] sm:$0xff]  ;;  %v4032_v5 = vld [vmem:[%s4713_s6 + $0x8] sm:$0xff]  ;;  %v4045_v7 = vld [vmem:[%s4716_s9 + $0x18] sm:$0xff] }
   0x3   :  { %3467 = vmatprep.subr.mxu0 %v3916_v0  ;;  %3478 = vmatprep.subr.mxu1 %v3916_v0  ;;  %v63_v6 = vld [vmem:[%s4715_s1] sm:$0x3]  ;;  %v4059_v9 = vld [vmem:[%s4716_s9 + $0x10] sm:$0xff]  ;;  %v4072_v11 = vld [vmem:[%s4716_s9 + $0x8] sm:$0xff] }
   0x4   :  { %3468 = vmatpush3.msra.mxu0 %v4018_v3  ;;  %3479 = vmatpush3.msra.mxu1 %v4025_v4  ;;  %v4050_v8 = vld [vmem:[%s4713_s6] sm:$0xff]  ;;  %v4077_v12 = vld [vmem:[%s4718_s8 + $0x8] sm:$0xff] }
   0x5   :  { %3469 = vmatprep.subr.mxu0 %v3916_v0  ;;  %3480 = vmatprep.mubr.msk.f32.mxu1 %vm3917_vm1, %v3916_v0  ;;  %v67_v10 = vld [vmem:[%s4717_s0] sm:$0x3]  ;;  %v3264_v15 = vld [vmem:[%s4717_s0 + $0xe] sm:$0x3]  ;;  %v3269_v53 = vld [vmem:[%s4717_s0 + $0x2] sm:$0x3] }
   0x6   :  { %3483 = vmatprep.subr.mxu1 %v3916_v0  ;;  %3470 = vmatpush3.msra.mxu0 %v4032_v5  ;;  %v4086_v13 = vld [vmem:[%s4716_s9] sm:$0xff] }
   0x7   :  { %3481 = vmatmul.mubr.msk.f32.vlgmr.msra.gmra.mxu1 %vm142_vm0, %v63_v6  ;;  %3471 = vmatprep.subr.mxu0 %v3916_v0  ;;  %v4093_v14 = vld [vmem:[%s4718_s8] sm:$0xff]  ;;  %v3273_v6 = vld [vmem:[%s4717_s0 + $0xc] sm:$0x3] }
   0x8   :  { %3484 = vmatpush3.msra.mxu1 %v4045_v7  ;;  %3472 = vmatpush3.msra.mxu0 %v4050_v8  ;;  %v65_v16 = vld [vmem:[%s4719_s3] sm:$0x3] }
   0x9   :  { %3485 = vmatprep.subr.mxu1 %v3916_v0  ;;  %3473 = vmatprep.mubr.msk.f32.mxu0 %vm3917_vm1, %v3916_v0  ;;  %v4132_v19 = vld [vmem:[%s4720_s7] ss:$0 sm:$0xff] }
   0xa   :  { %3486 = vmatpush3.msra.mxu1 %v4059_v9  ;;  %3474 = vmatmul.mubr.msk.f32.vlgmr.msra.gmra.mxu0 %vm68_vm2, %v67_v10  ;;  %v4138_v25 = vld [vmem:[%s4721_s10] ss:$0 sm:$0xff] }
   0xb   :  { %3487 = vmatprep.subr.mxu1 %v3916_v0  ;;  %3494 = vmatprep.subr.mxu0 %v3916_v0  ;;  %v64_v45 = vld [vmem:[%s4722_s2] sm:$0x3]  ;;  %s3920_s2 = smov 32  }
   0xc   :  { %3488 = vmatpush3.msra.mxu1 %v4072_v11  ;;  %3495 = vmatpush3.msra.mxu0 %v4077_v12  ;;  %v66_v49 = vld [vmem:[%s4723_s4] sm:$0x3] }
   0xd   :  { %3489 = vmatprep.subr.mxu1 %v3916_v0  ;;  %3496 = vmatprep.subr.mxu0 %v3916_v0 }
   0xe   :  { %3490 = vmatpush3.msra.mxu1 %v4086_v13  ;;  %3491 = vmatprep.mubr.msk.f32.mxu1 %vm3917_vm1, %v3916_v0 }
   0xf   :  { %3497 = vmatpush3.msra.mxu0 %v4093_v14  ;;  %3498 = vmatprep.mubr.msk.f32.mxu0 %vm3917_vm1, %v3916_v0 }
  0x10   :  { %3492 = vmatmul.mubr.msk.f32.vlgmr.msra.gmra.mxu1 %vm68_vm2, %v3264_v15  ;;  %3499 = vmatmul.mubr.msk.f32.vlgmr.msra.gmra.mxu0 %vm142_vm0, %v65_v16 }
  0x11   :  { %3501 = vmatprep.subr.mxu0 %v3916_v0  ;;  %3512 = vmatprep.subr.mxu1 %v3916_v0 }
  0x12   :  { %3502 = vmatpush3.msra.mxu0 %v4008_v1  ;;  %3513 = vmatpush3.msra.mxu1 %v4013_v2 }
  0x13   :  { %3503 = vmatprep.subr.mxu0 %v3916_v0  ;;  %3509 = vmatprep.mubr.msk.f32.mxu0 %vm3917_vm1, %v3916_v0 }
  0x14   :  { %3504 = vmatpush3.msra.mxu0 %v4018_v3  ;;  %3514 = vmatprep.subr.mxu1 %v3916_v0 }
  0x15   :  { %3505 = vmatprep.subr.mxu0 %v3916_v0  ;;  %3515 = vmatpush3.msra.mxu1 %v4025_v4 }
  0x16   :  { %3506 = vmatpush3.msra.mxu0 %v4032_v5  ;;  %3516 = vmatprep.mubr.msk.f32.mxu1 %vm3917_vm1, %v3916_v0 }
  0x17   :  { %3507 = vmatprep.subr.mxu0 %v3916_v0  ;;  %3519 = vmatprep.subr.mxu1 %v3916_v0 }
  0x18   :  { %3508 = vmatpush3.msra.mxu0 %v4050_v8 }
  0x19   :  { %3530 = vmatprep.subr.mxu0 %v3916_v0  ;;  %3510 = vmatmul.mubr.msk.f32.vlgmr.msra.gmra.mxu0 %vm68_vm2, %v3269_v53 }
  0x1a   :  { %3531 = vmatpush3.msra.mxu0 %v4077_v12  ;;  %3534 = vmatprep.mubr.msk.f32.mxu0 %vm3917_vm1, %v3916_v0 }
  0x1b   :  { %3532 = vmatprep.subr.mxu0 %v3916_v0 }
  0x1c   :  { %3533 = vmatpush3.msra.mxu0 %v4093_v14 }
  0x1d   :  { %3537 = vmatprep.subr.mxu0 %v3916_v0 }
  0xc7   :  { %v212_v17 = vpop.f32.mrf.mxu1 }
  0xc9   :  { %v3482_v18 = vpop.f32.mrf.mxu1 }
  0xca   :  { %v138_v20 = vpop.f32.mrf.mxu0 }
  0xcb   :  { %v213_v21 = vadd.f32 %v212_v17, %v138_v20 }
  0xcc   :  { %v3475_v22 = vpop.f32.mrf.mxu0 }
  0xcd   :  { %v222_v23 = vadd.f32 %v4132_v19, %v213_v21 }
  0xcf   :  { %3774 = vtanh.f32 %v222_v23  ;;  %v3263_v33 = vmul.f32 -1.442695, %v222_v23 }
  0xd0   :  { %v318_v24 = vpop.f32.mrf.mxu1  ;;  %v391_v26 = vpop.f32.mrf.mxu0 }
  0xd1   :  { %v392_v27 = vadd.f32 %v391_v26, %v318_v24 }
  0xd2   :  { %v3493_v28 = vpop.f32.mrf.mxu1  ;;  %v3500_v29 = vpop.f32.mrf.mxu0 }
  0xd3   :  { %v401_v30 = vadd.f32 %v4138_v25, %v392_v27 }
  0xd5   :  { %3776 = vtanh.f32 %v401_v30  ;;  %v3268_v34 = vmul.f32 -1.442695, %v401_v30 }
  0xd6   :  { %3778 = vpow2.f32 %v3263_v33 }
  0xd7   :  { %3780 = vpow2.f32 %v3268_v34 }
  0xd9   :  { %v509_v60 = vpop.f32.mrf.mxu0 }
  0xdb   :  { %v3511_v61 = vpop.f32.mrf.mxu0 }
  0xdc   :  { %v3775_v31 = vpop.eup %3774 }
  0xdd   :  { %232 = vrot.lane.b32.xlu0 %v3775_v31, %s3918_s21 }
  0xe2   :  { %v3777_v32 = vpop.eup %3776 }
  0xe3   :  { %411 = vrot.lane.b32.xlu0 %v3777_v32, %s3918_s21  ;;  %v3779_v35 = vpop.eup %3778 }
  0xe4   :  { %v226_v36 = vadd.f32 1.0, %v3779_v35  ;;  %v3781_v37 = vpop.eup %3780 }
  0xe5   :  { %v405_v38 = vadd.f32 1.0, %v3781_v37 }
  0xe6   :  { %3782 = vrcp.f32 %v226_v36 }
  0xe7   :  { %3784 = vrcp.f32 %v405_v38 }
  0xf3   :  { %v3783_v39 = vpop.eup %3782 }
  0xf4   :  { %v3785_v42 = vpop.eup %3784  ;;  %v230_v46 = vmul.f32 %v3783_v39, %v64_v45 }
  0xf5   :  { %v409_v50 = vmul.f32 %v3785_v42, %v66_v49 }
 0x14f   :  { %v233_v40 = vpop.permute.xlu0 %232 }
 0x150   :  { %v235_v41 = vmul.f32 %v3783_v39, %v233_v40 }
 0x152   :  { %237 = vrot.lane.b32.xlu1 %v235_v41, %s3919_s22 }
 0x155   :  { %v412_v43 = vpop.permute.xlu0 %411 }
 0x156   :  { %v414_v44 = vmul.f32 %v3785_v42, %v412_v43 }
 0x158   :  { %416 = vrot.lane.b32.xlu1 %v414_v44, %s3919_s22 }
 0x1c4   :  { %v238_v47 = vpop.permute.xlu1 %237 }
 0x1c5   :  { %v4148_v48 = vadd.f32 %v238_v47, %v230_v46  ;;  %v3277_v46 = vld [vmem:[%s4717_s0 + $0x4] sm:$0x3] }
 0x1c7   :  { %3786 = vtanh.f32 %v4148_v48 }
 0x1ca   :  { %v417_v51 = vpop.permute.xlu1 %416 }
 0x1cb   :  { %v4154_v52 = vadd.f32 %v417_v51, %v409_v50 }
 0x1cd   :  { %3788 = vtanh.f32 %v4154_v52 }
 0x1d4   :  { %v3787_v54 = vpop.eup %3786 }
 0x1d5   :  { %243 = vrot.lane.b32.xlu0 %v3787_v54, %s3920_s2 }
 0x1da   :  { %v3789_v55 = vpop.eup %3788 }
 0x1db   :  { %422 = vrot.lane.b32.xlu1 %v3789_v55, %s3920_s2 }
 0x247   :  { %v244_v56 = vpop.permute.xlu0 %243 }
 0x248   :  { %v246_v57 = vmul.f32 %v3783_v39, %v244_v56  ;;  %v3281_v56 = vld [vmem:[%s4717_s0 + $0xa] sm:$0x3] }
 0x24a   :  { %427 = vrot.lane.b32.xlu0 %v246_v57, %s3918_s21 }
 0x24d   :  { %v423_v58 = vpop.permute.xlu1 %422 }
 0x24e   :  { %v425_v59 = vmul.f32 %v3785_v42, %v423_v58 }
 0x250   :  { %433 = vrot.lane.b32.xlu1 %v425_v59, %s3918_s21 }
 0x2bc   :  { %v428_v62 = vpop.permute.xlu0 %427 }
 0x2bd   :  { %431 = vst.msk [vmem:[#allocation2] sm:$0x3] %vm430_vm3, %v428_v62  ;;  %3517 = vmatmul.mubr.msk.f32.vlgmr.msra.gmra.mxu1 %vm142_vm0, %v428_v62 }
 0x2be   :  { %3520 = vmatpush3.msra.mxu1 %v4045_v7  ;;  %3527 = vmatprep.mubr.msk.f32.mxu1 %vm3917_vm1, %v3916_v0 }
 0x2bf   :  { %3521 = vmatprep.subr.mxu1 %v3916_v0 }
 0x2c0   :  { %3522 = vmatpush3.msra.mxu1 %v4059_v9 }
 0x2c1   :  { %3523 = vmatprep.subr.mxu1 %v3916_v0 }
 0x2c2   :  { %v434_v63 = vpop.permute.xlu1 %433  ;;  %3524 = vmatpush3.msra.mxu1 %v4072_v11 }
 0x2c3   :  { %437 = vst.msk [vmem:[#allocation3 + $0xe] sm:$0x3] %vm430_vm3, %v434_v63  ;;  %3535 = vmatmul.mubr.msk.f32.vlgmr.msra.gmra.mxu0 %vm142_vm0, %v434_v63  ;;  %3525 = vmatprep.subr.mxu1 %v3916_v0 }
 0x2c4   :  { %3526 = vmatpush3.msra.mxu1 %v4086_v13  ;;  %3538 = vmatpush3.msra.mxu0 %v4008_v1 }
 0x2c5   :  { %3528 = vmatmul.mubr.msk.f32.vlgmr.msra.gmra.mxu1 %vm68_vm2, %v3273_v6  ;;  %3539 = vmatprep.subr.mxu0 %v3916_v0 }
 0x2c6   :  { %3540 = vmatpush3.msra.mxu0 %v4018_v3  ;;  %3548 = vmatprep.subr.mxu1 %v3916_v0 }
 0x2c7   :  { %3541 = vmatprep.subr.mxu0 %v3916_v0  ;;  %3549 = vmatpush3.msra.mxu1 %v4013_v2 }
 0x2c8   :  { %3542 = vmatpush3.msra.mxu0 %v4032_v5  ;;  %3545 = vmatprep.mubr.msk.f32.mxu0 %vm3917_vm1, %v3916_v0 }
 0x2c9   :  { %3543 = vmatprep.subr.mxu0 %v3916_v0  ;;  %3550 = vmatprep.subr.mxu1 %v3916_v0 }
 0x2ca   :  { %3544 = vmatpush3.msra.mxu0 %v4050_v8  ;;  %3551 = vmatpush3.msra.mxu1 %v4025_v4 }
 0x2cb   :  { %3552 = vmatprep.mubr.msk.f32.mxu1 %vm3917_vm1, %v3916_v0  ;;  %3555 = vmatprep.subr.mxu1 %v3916_v0 }
 0x2cc   :  { %3566 = vmatprep.subr.mxu0 %v3916_v0  ;;  %3546 = vmatmul.mubr.msk.f32.vlgmr.msra.gmra.mxu0 %vm68_vm2, %v3277_v46 }
 0x2cd   :  { %3567 = vmatpush3.msra.mxu0 %v4077_v12  ;;  %3570 = vmatprep.mubr.msk.f32.mxu0 %vm3917_vm1, %v3916_v0 }
 0x2ce   :  { %3568 = vmatprep.subr.mxu0 %v3916_v0 }
 0x2cf   :  { %3569 = vmatpush3.msra.mxu0 %v4093_v14 }
 0x2d0   :  { %3573 = vmatprep.subr.mxu0 %v3916_v0 }
 0x37d   :  { %v581_v10 = vpop.f32.mrf.mxu1 }
 0x37e   :  { %v582_v15 = vadd.f32 %v581_v10, %v509_v60 }
 0x37f   :  { %v3518_v16 = vpop.f32.mrf.mxu1 }
 0x380   :  { %v585_v17 = vadd.f32 %v4132_v19, %v582_v15 }
 0x382   :  { %3790 = vtanh.f32 %v585_v17  ;;  %v3272_v28 = vmul.f32 -1.442695, %v585_v17 }
 0x383   :  { %v753_v18 = vpop.f32.mrf.mxu0 }
 0x385   :  { %v3536_v20 = vpop.f32.mrf.mxu0  ;;  %v681_v21 = vpop.f32.mrf.mxu1 }
 0x386   :  { %v754_v22 = vadd.f32 %v753_v18, %v681_v21 }
 0x387   :  { %v3529_v23 = vpop.f32.mrf.mxu1 }
 0x388   :  { %v757_v24 = vadd.f32 %v4138_v25, %v754_v22 }
 0x38a   :  { %3792 = vtanh.f32 %v757_v24  ;;  %v3276_v29 = vmul.f32 -1.442695, %v757_v24 }
 0x38b   :  { %3794 = vpow2.f32 %v3272_v28 }
 0x38c   :  { %3796 = vpow2.f32 %v3276_v29  ;;  %v865_v53 = vpop.f32.mrf.mxu0 }
 0x38e   :  { %v3547_v54 = vpop.f32.mrf.mxu0 }
 0x38f   :  { %v3791_v26 = vpop.eup %3790 }
 0x390   :  { %595 = vrot.lane.b32.xlu0 %v3791_v26, %s3918_s21 }
 0x397   :  { %v3793_v27 = vpop.eup %3792 }
 0x398   :  { %767 = vrot.lane.b32.xlu1 %v3793_v27, %s3918_s21  ;;  %v3795_v30 = vpop.eup %3794 }
 0x399   :  { %v589_v31 = vadd.f32 1.0, %v3795_v30  ;;  %v3797_v32 = vpop.eup %3796 }
 0x39a   :  { %v761_v33 = vadd.f32 1.0, %v3797_v32 }
 0x39b   :  { %3798 = vrcp.f32 %v589_v31 }
 0x39c   :  { %3800 = vrcp.f32 %v761_v33 }
 0x3a8   :  { %v3799_v34 = vpop.eup %3798 }
 0x3a9   :  { %v3801_v37 = vpop.eup %3800  ;;  %v593_v40 = vmul.f32 %v3799_v34, %v4148_v48 }
 0x3aa   :  { %v765_v43 = vmul.f32 %v3801_v37, %v4154_v52 }
 0x402   :  { %v596_v35 = vpop.permute.xlu0 %595 }
 0x403   :  { %v598_v36 = vmul.f32 %v3799_v34, %v596_v35 }
 0x405   :  { %600 = vrot.lane.b32.xlu0 %v598_v36, %s3919_s22 }
 0x40a   :  { %v768_v38 = vpop.permute.xlu1 %767 }
 0x40b   :  { %v770_v39 = vmul.f32 %v3801_v37, %v768_v38 }
 0x40d   :  { %772 = vrot.lane.b32.xlu1 %v770_v39, %s3919_s22  ;;  %v3285_v39 = vld [vmem:[%s4717_s0 + $0x6] sm:$0x3] }
 0x477   :  { %v601_v41 = vpop.permute.xlu0 %600 }
 0x478   :  { %v4212_v42 = vadd.f32 %v601_v41, %v593_v40 }
 0x47a   :  { %3802 = vtanh.f32 %v4212_v42 }
 0x47f   :  { %v773_v44 = vpop.permute.xlu1 %772 }
 0x480   :  { %v4216_v45 = vadd.f32 %v773_v44, %v765_v43 }
 0x482   :  { %3804 = vtanh.f32 %v4216_v45 }
 0x487   :  { %v3803_v47 = vpop.eup %3802 }
 0x488   :  { %606 = vrot.lane.b32.xlu0 %v3803_v47, %s3920_s2 }
 0x48f   :  { %v3805_v48 = vpop.eup %3804 }
 0x490   :  { %778 = vrot.lane.b32.xlu1 %v3805_v48, %s3920_s2 }
 0x4fa   :  { %v607_v49 = vpop.permute.xlu0 %606 }
 0x4fb   :  { %v609_v50 = vmul.f32 %v3799_v34, %v607_v49  ;;  %v3289_v49 = vld [vmem:[%s4717_s0 + $0x8] sm:$0x3] }
 0x4fd   :  { %783 = vrot.lane.b32.xlu0 %v609_v50, %s3918_s21 }
 0x502   :  { %v779_v51 = vpop.permute.xlu1 %778 }
 0x503   :  { %v781_v52 = vmul.f32 %v3801_v37, %v779_v51 }
 0x505   :  { %789 = vrot.lane.b32.xlu1 %v781_v52, %s3918_s21 }
 0x56f   :  { %v784_v55 = vpop.permute.xlu0 %783 }
 0x570   :  { %787 = vst.msk [vmem:[#allocation2 + $0x2] sm:$0x3] %vm430_vm3, %v784_v55  ;;  %3553 = vmatmul.mubr.msk.f32.vlgmr.msra.gmra.mxu1 %vm142_vm0, %v784_v55 }
 0x571   :  { %3556 = vmatpush3.msra.mxu1 %v4045_v7  ;;  %3563 = vmatprep.mubr.msk.f32.mxu1 %vm3917_vm1, %v3916_v0 }
 0x572   :  { %3557 = vmatprep.subr.mxu1 %v3916_v0 }
 0x573   :  { %3558 = vmatpush3.msra.mxu1 %v4059_v9 }
 0x574   :  { %3559 = vmatprep.subr.mxu1 %v3916_v0 }
 0x575   :  { %3560 = vmatpush3.msra.mxu1 %v4072_v11 }
 0x576   :  { %3561 = vmatprep.subr.mxu1 %v3916_v0 }
 0x577   :  { %3562 = vmatpush3.msra.mxu1 %v4086_v13  ;;  %v790_v57 = vpop.permute.xlu1 %789 }
 0x578   :  { %793 = vst.msk [vmem:[#allocation3 + $0xc] sm:$0x3] %vm430_vm3, %v790_v57  ;;  %3564 = vmatmul.mubr.msk.f32.vlgmr.msra.gmra.mxu1 %vm68_vm2, %v3281_v56  ;;  %3571 = vmatmul.mubr.msk.f32.vlgmr.msra.gmra.mxu0 %vm142_vm0, %v790_v57 }
 0x579   :  { %3574 = vmatpush3.msra.mxu0 %v4008_v1  ;;  %3584 = vmatprep.subr.mxu1 %v3916_v0 }
 0x57a   :  { %3575 = vmatprep.subr.mxu0 %v3916_v0  ;;  %3585 = vmatpush3.msra.mxu1 %v4013_v2 }
 0x57b   :  { %3576 = vmatpush3.msra.mxu0 %v4018_v3  ;;  %3581 = vmatprep.mubr.msk.f32.mxu0 %vm3917_vm1, %v3916_v0 }
 0x57c   :  { %3577 = vmatprep.subr.mxu0 %v3916_v0  ;;  %3586 = vmatprep.subr.mxu1 %v3916_v0 }
 0x57d   :  { %3578 = vmatpush3.msra.mxu0 %v4032_v5  ;;  %3587 = vmatpush3.msra.mxu1 %v4025_v4 }
 0x57e   :  { %3579 = vmatprep.subr.mxu0 %v3916_v0  ;;  %3588 = vmatprep.mubr.msk.f32.mxu1 %vm3917_vm1, %v3916_v0 }
 0x57f   :  { %3580 = vmatpush3.msra.mxu0 %v4050_v8  ;;  %3591 = vmatprep.subr.mxu1 %v3916_v0 }
 0x580   :  { %3602 = vmatprep.subr.mxu0 %v3916_v0  ;;  %3582 = vmatmul.mubr.msk.f32.vlgmr.msra.gmra.mxu0 %vm68_vm2, %v3285_v39 }
 0x581   :  { %3603 = vmatpush3.msra.mxu0 %v4077_v12  ;;  %3606 = vmatprep.mubr.msk.f32.mxu0 %vm3917_vm1, %v3916_v0 }
 0x582   :  { %3604 = vmatprep.subr.mxu0 %v3916_v0 }
 0x583   :  { %3605 = vmatpush3.msra.mxu0 %v4093_v14 }
 0x584   :  { %3609 = vmatprep.subr.mxu0 %v3916_v0 }
 0x630   :  { %v937_v58 = vpop.f32.mrf.mxu1 }
 0x631   :  { %v938_v59 = vadd.f32 %v937_v58, %v865_v53 }
 0x632   :  { %v3554_v60 = vpop.f32.mrf.mxu1 }
 0x633   :  { %v941_v61 = vadd.f32 %v4132_v19, %v938_v59 }
 0x635   :  { %3806 = vtanh.f32 %v941_v61  ;;  %v3280_v20 = vmul.f32 -1.442695, %v941_v61 }
 0x638   :  { %v1037_v62 = vpop.f32.mrf.mxu1  ;;  %v1109_v63 = vpop.f32.mrf.mxu0 }
 0x639   :  { %v1110_v6 = vadd.f32 %v1109_v63, %v1037_v62 }
 0x63a   :  { %v3565_v10 = vpop.f32.mrf.mxu1  ;;  %v3572_v15 = vpop.f32.mrf.mxu0 }
 0x63b   :  { %v1113_v16 = vadd.f32 %v4138_v25, %v1110_v6 }
 0x63d   :  { %3808 = vtanh.f32 %v1113_v16  ;;  %v3284_v21 = vmul.f32 -1.442695, %v1113_v16 }
 0x63e   :  { %3810 = vpow2.f32 %v3280_v20 }
 0x63f   :  { %3812 = vpow2.f32 %v3284_v21 }
 0x640   :  { %v1221_v46 = vpop.f32.mrf.mxu0 }
 0x642   :  { %v3807_v17 = vpop.eup %3806  ;;  %v3583_v47 = vpop.f32.mrf.mxu0 }
 0x643   :  { %951 = vrot.lane.b32.xlu0 %v3807_v17, %s3918_s21 }
 0x64a   :  { %v3809_v18 = vpop.eup %3808 }
 0x64b   :  { %1123 = vrot.lane.b32.xlu1 %v3809_v18, %s3918_s21  ;;  %v3811_v22 = vpop.eup %3810 }
 0x64c   :  { %v945_v23 = vadd.f32 1.0, %v3811_v22  ;;  %v3813_v24 = vpop.eup %3812 }
 0x64d   :  { %v1117_v26 = vadd.f32 1.0, %v3813_v24 }
 0x64e   :  { %3814 = vrcp.f32 %v945_v23 }
 0x64f   :  { %3816 = vrcp.f32 %v1117_v26 }
 0x65b   :  { %v3815_v27 = vpop.eup %3814 }
 0x65c   :  { %v3817_v30 = vpop.eup %3816  ;;  %v949_v33 = vmul.f32 %v3815_v27, %v4212_v42 }
 0x65d   :  { %v1121_v36 = vmul.f32 %v3817_v30, %v4216_v45 }
 0x6b5   :  { %v952_v28 = vpop.permute.xlu0 %951 }
 0x6b6   :  { %v954_v29 = vmul.f32 %v3815_v27, %v952_v28 }
 0x6b8   :  { %956 = vrot.lane.b32.xlu0 %v954_v29, %s3919_s22 }
 0x6bd   :  { %v1124_v31 = vpop.permute.xlu1 %1123 }
 0x6be   :  { %v1126_v32 = vmul.f32 %v3817_v30, %v1124_v31 }
 0x6c0   :  { %1128 = vrot.lane.b32.xlu1 %v1126_v32, %s3919_s22  ;;  %v3293_v32 = vld [vmem:[%s4717_s0 + $0x8] sm:$0x3] }
 0x72a   :  { %v957_v34 = vpop.permute.xlu0 %956 }
 0x72b   :  { %v4274_v35 = vadd.f32 %v957_v34, %v949_v33 }
 0x72d   :  { %3818 = vtanh.f32 %v4274_v35 }
 0x732   :  { %v1129_v37 = vpop.permute.xlu1 %1128 }
 0x733   :  { %v4278_v38 = vadd.f32 %v1129_v37, %v1121_v36 }
 0x735   :  { %3820 = vtanh.f32 %v4278_v38 }
 0x73a   :  { %v3819_v40 = vpop.eup %3818 }
 0x73b   :  { %962 = vrot.lane.b32.xlu0 %v3819_v40, %s3920_s2 }
 0x742   :  { %v3821_v41 = vpop.eup %3820 }
 0x743   :  { %1134 = vrot.lane.b32.xlu1 %v3821_v41, %s3920_s2 }
 0x7ad   :  { %v963_v42 = vpop.permute.xlu0 %962 }
 0x7ae   :  { %v965_v43 = vmul.f32 %v3815_v27, %v963_v42  ;;  %v3297_v42 = vld [vmem:[%s4717_s0 + $0x6] sm:$0x3] }
 0x7b0   :  { %1139 = vrot.lane.b32.xlu0 %v965_v43, %s3918_s21 }
 0x7b5   :  { %v1135_v44 = vpop.permute.xlu1 %1134 }
 0x7b6   :  { %v1137_v45 = vmul.f32 %v3817_v30, %v1135_v44 }
 0x7b8   :  { %1145 = vrot.lane.b32.xlu1 %v1137_v45, %s3918_s21 }
 0x822   :  { %v1140_v48 = vpop.permute.xlu0 %1139 }
 0x823   :  { %1143 = vst.msk [vmem:[#allocation2 + $0x4] sm:$0x3] %vm430_vm3, %v1140_v48  ;;  %3589 = vmatmul.mubr.msk.f32.vlgmr.msra.gmra.mxu1 %vm142_vm0, %v1140_v48 }
 0x824   :  { %3592 = vmatpush3.msra.mxu1 %v4045_v7  ;;  %3599 = vmatprep.mubr.msk.f32.mxu1 %vm3917_vm1, %v3916_v0 }
 0x825   :  { %3593 = vmatprep.subr.mxu1 %v3916_v0 }
 0x826   :  { %3594 = vmatpush3.msra.mxu1 %v4059_v9 }
 0x827   :  { %3595 = vmatprep.subr.mxu1 %v3916_v0 }
 0x828   :  { %3596 = vmatpush3.msra.mxu1 %v4072_v11 }
 0x829   :  { %3597 = vmatprep.subr.mxu1 %v3916_v0 }
 0x82a   :  { %3598 = vmatpush3.msra.mxu1 %v4086_v13  ;;  %v1146_v50 = vpop.permute.xlu1 %1145 }
 0x82b   :  { %1149 = vst.msk [vmem:[#allocation3 + $0xa] sm:$0x3] %vm430_vm3, %v1146_v50  ;;  %3600 = vmatmul.mubr.msk.f32.vlgmr.msra.gmra.mxu1 %vm68_vm2, %v3289_v49  ;;  %3607 = vmatmul.mubr.msk.f32.vlgmr.msra.gmra.mxu0 %vm142_vm0, %v1146_v50 }
 0x82c   :  { %3610 = vmatpush3.msra.mxu0 %v4008_v1  ;;  %3620 = vmatprep.subr.mxu1 %v3916_v0 }
 0x82d   :  { %3611 = vmatprep.subr.mxu0 %v3916_v0  ;;  %3621 = vmatpush3.msra.mxu1 %v4013_v2 }
 0x82e   :  { %3612 = vmatpush3.msra.mxu0 %v4018_v3  ;;  %3617 = vmatprep.mubr.msk.f32.mxu0 %vm3917_vm1, %v3916_v0 }
 0x82f   :  { %3613 = vmatprep.subr.mxu0 %v3916_v0  ;;  %3622 = vmatprep.subr.mxu1 %v3916_v0 }
 0x830   :  { %3614 = vmatpush3.msra.mxu0 %v4032_v5  ;;  %3623 = vmatpush3.msra.mxu1 %v4025_v4 }
 0x831   :  { %3615 = vmatprep.subr.mxu0 %v3916_v0  ;;  %3624 = vmatprep.mubr.msk.f32.mxu1 %vm3917_vm1, %v3916_v0 }
 0x832   :  { %3616 = vmatpush3.msra.mxu0 %v4050_v8  ;;  %3627 = vmatprep.subr.mxu1 %v3916_v0 }
 0x833   :  { %3638 = vmatprep.subr.mxu0 %v3916_v0  ;;  %3618 = vmatmul.mubr.msk.f32.vlgmr.msra.gmra.mxu0 %vm68_vm2, %v3293_v32 }
 0x834   :  { %3639 = vmatpush3.msra.mxu0 %v4077_v12  ;;  %3642 = vmatprep.mubr.msk.f32.mxu0 %vm3917_vm1, %v3916_v0 }
 0x835   :  { %3640 = vmatprep.subr.mxu0 %v3916_v0 }
 0x836   :  { %3641 = vmatpush3.msra.mxu0 %v4093_v14 }
 0x837   :  { %3645 = vmatprep.subr.mxu0 %v3916_v0 }
 0x8e3   :  { %v1293_v51 = vpop.f32.mrf.mxu1 }
 0x8e4   :  { %v1294_v52 = vadd.f32 %v1293_v51, %v1221_v46 }
 0x8e5   :  { %v3590_v53 = vpop.f32.mrf.mxu1 }
 0x8e6   :  { %v1297_v54 = vadd.f32 %v4132_v19, %v1294_v52 }
 0x8e8   :  { %3822 = vtanh.f32 %v1297_v54  ;;  %v3288_v63 = vmul.f32 -1.442695, %v1297_v54 }
 0x8eb   :  { %v1393_v55 = vpop.f32.mrf.mxu1  ;;  %v1465_v56 = vpop.f32.mrf.mxu0 }
 0x8ec   :  { %v1466_v57 = vadd.f32 %v1465_v56, %v1393_v55 }
 0x8ed   :  { %v3601_v58 = vpop.f32.mrf.mxu1  ;;  %v3608_v59 = vpop.f32.mrf.mxu0 }
 0x8ee   :  { %v1469_v60 = vadd.f32 %v4138_v25, %v1466_v57 }
 0x8f0   :  { %3824 = vtanh.f32 %v1469_v60  ;;  %v3292_v6 = vmul.f32 -1.442695, %v1469_v60 }
 0x8f1   :  { %3826 = vpow2.f32 %v3288_v63 }
 0x8f2   :  { %3828 = vpow2.f32 %v3292_v6 }
 0x8f3   :  { %v1576_v39 = vpop.f32.mrf.mxu0 }
 0x8f5   :  { %v3823_v61 = vpop.eup %3822  ;;  %v3619_v40 = vpop.f32.mrf.mxu0 }
 0x8f6   :  { %1307 = vrot.lane.b32.xlu0 %v3823_v61, %s3918_s21 }
 0x8fd   :  { %v3825_v62 = vpop.eup %3824 }
 0x8fe   :  { %1479 = vrot.lane.b32.xlu1 %v3825_v62, %s3918_s21  ;;  %v3827_v10 = vpop.eup %3826 }
 0x8ff   :  { %v1301_v15 = vadd.f32 1.0, %v3827_v10  ;;  %v3829_v16 = vpop.eup %3828 }
 0x900   :  { %v1473_v17 = vadd.f32 1.0, %v3829_v16 }
 0x901   :  { %3830 = vrcp.f32 %v1301_v15 }
 0x902   :  { %3832 = vrcp.f32 %v1473_v17  ;;  %v3301_v17 = vld [vmem:[%s4717_s0 + $0xa] sm:$0x3] }
 0x90e   :  { %v3831_v18 = vpop.eup %3830 }
 0x90f   :  { %v3833_v22 = vpop.eup %3832  ;;  %v1305_v26 = vmul.f32 %v3831_v18, %v4274_v35 }
 0x910   :  { %v1477_v29 = vmul.f32 %v3833_v22, %v4278_v38 }
 0x968   :  { %v1308_v20 = vpop.permute.xlu0 %1307 }
 0x969   :  { %v1310_v21 = vmul.f32 %v3831_v18, %v1308_v20 }
 0x96b   :  { %1312 = vrot.lane.b32.xlu0 %v1310_v21, %s3919_s22 }
 0x970   :  { %v1480_v23 = vpop.permute.xlu1 %1479 }
 0x971   :  { %v1482_v24 = vmul.f32 %v3833_v22, %v1480_v23 }
 0x973   :  { %1484 = vrot.lane.b32.xlu1 %v1482_v24, %s3919_s22 }
 0x9dd   :  { %v1313_v27 = vpop.permute.xlu0 %1312 }
 0x9de   :  { %v4336_v28 = vadd.f32 %v1313_v27, %v1305_v26 }
 0x9e0   :  { %3834 = vtanh.f32 %v4336_v28 }
 0x9e5   :  { %v1485_v30 = vpop.permute.xlu1 %1484 }
 0x9e6   :  { %v4340_v31 = vadd.f32 %v1485_v30, %v1477_v29  ;;  %v4469_v29 = vld [vmem:[%s4714_s5] sm:$0xff] }
 0x9e7   :  { %v4478_v30 = vld [vmem:[%s4713_s6] sm:$0xff] }
 0x9e8   :  { %3836 = vtanh.f32 %v4340_v31 }
 0x9ed   :  { %v3835_v33 = vpop.eup %3834 }
 0x9ee   :  { %1318 = vrot.lane.b32.xlu0 %v3835_v33, %s3920_s2 }
 0x9f5   :  { %v3837_v34 = vpop.eup %3836 }
 0x9f6   :  { %1490 = vrot.lane.b32.xlu1 %v3837_v34, %s3920_s2 }
 0xa60   :  { %v1319_v35 = vpop.permute.xlu0 %1318 }
 0xa61   :  { %v1321_v36 = vmul.f32 %v3831_v18, %v1319_v35 }
 0xa63   :  { %1495 = vrot.lane.b32.xlu0 %v1321_v36, %s3918_s21 }
 0xa68   :  { %v1491_v37 = vpop.permute.xlu1 %1490 }
 0xa69   :  { %v1493_v38 = vmul.f32 %v3833_v22, %v1491_v37 }
 0xa6b   :  { %1501 = vrot.lane.b32.xlu1 %v1493_v38, %s3918_s21 }
 0xad5   :  { %v1496_v41 = vpop.permute.xlu0 %1495 }
 0xad6   :  { %1499 = vst.msk [vmem:[#allocation2 + $0x6] sm:$0x3] %vm430_vm3, %v1496_v41  ;;  %3625 = vmatmul.mubr.msk.f32.vlgmr.msra.gmra.mxu1 %vm142_vm0, %v1496_v41 }
 0xad7   :  { %3628 = vmatpush3.msra.mxu1 %v4045_v7  ;;  %3635 = vmatprep.mubr.msk.f32.mxu1 %vm3917_vm1, %v3916_v0 }
 0xad8   :  { %3629 = vmatprep.subr.mxu1 %v3916_v0 }
 0xad9   :  { %3630 = vmatpush3.msra.mxu1 %v4059_v9 }
 0xada   :  { %3631 = vmatprep.subr.mxu1 %v3916_v0 }
 0xadb   :  { %3632 = vmatpush3.msra.mxu1 %v4072_v11 }
 0xadc   :  { %3633 = vmatprep.subr.mxu1 %v3916_v0 }
 0xadd   :  { %3634 = vmatpush3.msra.mxu1 %v4086_v13  ;;  %v1502_v43 = vpop.permute.xlu1 %1501 }
 0xade   :  { %1505 = vst.msk [vmem:[#allocation3 + $0x8] sm:$0x3] %vm430_vm3, %v1502_v43  ;;  %3636 = vmatmul.mubr.msk.f32.vlgmr.msra.gmra.mxu1 %vm68_vm2, %v3297_v42  ;;  %3643 = vmatmul.mubr.msk.f32.vlgmr.msra.gmra.mxu0 %vm142_vm0, %v1502_v43 }
 0xadf   :  { %3646 = vmatpush3.msra.mxu0 %v4008_v1  ;;  %3656 = vmatprep.subr.mxu1 %v3916_v0 }
 0xae0   :  { %3647 = vmatprep.subr.mxu0 %v3916_v0  ;;  %3657 = vmatpush3.msra.mxu1 %v4013_v2 }
 0xae1   :  { %3648 = vmatpush3.msra.mxu0 %v4018_v3  ;;  %3653 = vmatprep.mubr.msk.f32.mxu0 %vm3917_vm1, %v3916_v0 }
 0xae2   :  { %3649 = vmatprep.subr.mxu0 %v3916_v0  ;;  %3658 = vmatprep.subr.mxu1 %v3916_v0 }
 0xae3   :  { %3650 = vmatpush3.msra.mxu0 %v4032_v5  ;;  %3659 = vmatpush3.msra.mxu1 %v4025_v4 }
 0xae4   :  { %3651 = vmatprep.subr.mxu0 %v3916_v0  ;;  %3660 = vmatprep.mubr.msk.f32.mxu1 %vm3917_vm1, %v3916_v0 }
 0xae5   :  { %3652 = vmatpush3.msra.mxu0 %v4050_v8  ;;  %3663 = vmatprep.subr.mxu1 %v3916_v0 }
 0xae6   :  { %3674 = vmatprep.subr.mxu0 %v3916_v0  ;;  %3654 = vmatmul.mubr.msk.f32.vlgmr.msra.gmra.mxu0 %vm68_vm2, %v3301_v17  ;;  %v3313_v17 = vld [vmem:[%s4717_s0 + $0x2] sm:$0x3] }
 0xae7   :  { %3675 = vmatpush3.msra.mxu0 %v4077_v12  ;;  %3678 = vmatprep.mubr.msk.f32.mxu0 %vm3917_vm1, %v3916_v0 }
 0xae8   :  { %3676 = vmatprep.subr.mxu0 %v3916_v0 }
 0xae9   :  { %3677 = vmatpush3.msra.mxu0 %v4093_v14  ;;  %v3305_v14 = vld [vmem:[%s4717_s0 + $0x4] sm:$0x3] }
 0xaea   :  { %3681 = vmatprep.subr.mxu0 %v3916_v0 }
 0xb96   :  { %v1648_v1 = vpop.f32.mrf.mxu1 }
 0xb97   :  { %v1649_v2 = vadd.f32 %v1648_v1, %v1576_v39 }
 0xb98   :  { %v3626_v3 = vpop.f32.mrf.mxu1 }
 0xb99   :  { %v1652_v44 = vadd.f32 %v4132_v19, %v1649_v2 }
 0xb9b   :  { %3838 = vtanh.f32 %v1652_v44  ;;  %v3296_v50 = vmul.f32 -1.442695, %v1652_v44 }
 0xb9e   :  { %v1747_v5 = vpop.f32.mrf.mxu1  ;;  %v1819_v45 = vpop.f32.mrf.mxu0 }
 0xb9f   :  { %v1820_v4 = vadd.f32 %v1819_v45, %v1747_v5 }
 0xba0   :  { %v3637_v46 = vpop.f32.mrf.mxu1  ;;  %v3644_v47 = vpop.f32.mrf.mxu0 }
 0xba1   :  { %v1823_v48 = vadd.f32 %v4138_v25, %v1820_v4 }
 0xba3   :  { %3840 = vtanh.f32 %v1823_v48  ;;  %v3300_v51 = vmul.f32 -1.442695, %v1823_v48 }
 0xba4   :  { %3842 = vpow2.f32 %v3296_v50 }
 0xba5   :  { %3844 = vpow2.f32 %v3300_v51 }
 0xba6   :  { %v1930_v24 = vpop.f32.mrf.mxu0 }
 0xba8   :  { %v3839_v49 = vpop.eup %3838  ;;  %v3655_v26 = vpop.f32.mrf.mxu0 }
 0xba9   :  { %1662 = vrot.lane.b32.xlu0 %v3839_v49, %s3918_s21 }
 0xbb0   :  { %v3841_v8 = vpop.eup %3840 }
 0xbb1   :  { %1833 = vrot.lane.b32.xlu1 %v3841_v8, %s3918_s21  ;;  %v3843_v52 = vpop.eup %3842 }
 0xbb2   :  { %v1656_v53 = vadd.f32 1.0, %v3843_v52  ;;  %v3845_v54 = vpop.eup %3844 }
 0xbb3   :  { %v1827_v55 = vadd.f32 1.0, %v3845_v54 }
 0xbb4   :  { %3846 = vrcp.f32 %v1656_v53  ;;  %v3309_v53 = vld [vmem:[%s4717_s0 + $0xc] sm:$0x3] }
 0xbb5   :  { %3848 = vrcp.f32 %v1827_v55  ;;  %v4504_v55 = vld [vmem:[%s4718_s8 + $0x8] sm:$0xff] }
 0xbc1   :  { %v3847_v56 = vpop.eup %3846 }
 0xbc2   :  { %v3849_v59 = vpop.eup %3848  ;;  %v1660_v62 = vmul.f32 %v3847_v56, %v4336_v28  ;;  %v4463_v28 = vld [vmem:[%s4713_s6 + $0x8] sm:$0xff] }
 0xbc3   :  { %v1831_v10 = vmul.f32 %v3849_v59, %v4340_v31 }
 0xc1b   :  { %v1663_v57 = vpop.permute.xlu0 %1662 }
 0xc1c   :  { %v1665_v58 = vmul.f32 %v3847_v56, %v1663_v57 }
 0xc1e   :  { %1667 = vrot.lane.b32.xlu0 %v1665_v58, %s3919_s22 }
 0xc23   :  { %v1834_v60 = vpop.permute.xlu1 %1833 }
 0xc24   :  { %v1836_v61 = vmul.f32 %v3849_v59, %v1834_v60 }
 0xc26   :  { %1838 = vrot.lane.b32.xlu1 %v1836_v61, %s3919_s22 }
 0xc90   :  { %v1668_v63 = vpop.permute.xlu0 %1667 }
 0xc91   :  { %v4398_v6 = vadd.f32 %v1668_v63, %v1660_v62 }
 0xc93   :  { %3850 = vtanh.f32 %v4398_v6 }
 0xc98   :  { %v1839_v15 = vpop.permute.xlu1 %1838 }
 0xc99   :  { %v4402_v16 = vadd.f32 %v1839_v15, %v1831_v10  ;;  %v4526_v10 = vld [vmem:[%s4716_s9 + $0x18] sm:$0xff]  ;;  %v4535_v15 = vld [vmem:[%s4716_s9 + $0x10] sm:$0xff] }
 0xc9b   :  { %3852 = vtanh.f32 %v4402_v16 }
 0xca0   :  { %v3851_v18 = vpop.eup %3850 }
 0xca1   :  { %1673 = vrot.lane.b32.xlu0 %v3851_v18, %s3920_s2  ;;  %v4552_v18 = vld [vmem:[%s4716_s9] sm:$0xff] }
 0xca8   :  { %v3853_v20 = vpop.eup %3852 }
 0xca9   :  { %1844 = vrot.lane.b32.xlu1 %v3853_v20, %s3920_s2 }
 0xd13   :  { %v1674_v21 = vpop.permute.xlu0 %1673 }
 0xd14   :  { %v1676_v22 = vmul.f32 %v3847_v56, %v1674_v21  ;;  %v4514_v56 = vld [vmem:[%s4718_s8] sm:$0xff] }
 0xd16   :  { %1849 = vrot.lane.b32.xlu0 %v1676_v22, %s3918_s21 }
 0xd1b   :  { %v1845_v23 = vpop.permute.xlu1 %1844 }
 0xd1c   :  { %v1847_v12 = vmul.f32 %v3849_v59, %v1845_v23 }
 0xd1e   :  { %1855 = vrot.lane.b32.xlu1 %v1847_v12, %s3918_s21  ;;  %v4578_v12 = vld [vmem:[%s4720_s7] ss:$0 sm:$0xff] }
 0xd88   :  { %v1850_v27 = vpop.permute.xlu0 %1849 }
 0xd89   :  { %1853 = vst.msk [vmem:[#allocation2 + $0x8] sm:$0x3] %vm430_vm3, %v1850_v27  ;;  %3661 = vmatmul.mubr.msk.f32.vlgmr.msra.gmra.mxu1 %vm142_vm0, %v1850_v27 }
 0xd8a   :  { %3664 = vmatpush3.msra.mxu1 %v4045_v7  ;;  %3671 = vmatprep.mubr.msk.f32.mxu1 %vm3917_vm1, %v3916_v0 }
 0xd8b   :  { %3665 = vmatprep.subr.mxu1 %v3916_v0 }
 0xd8c   :  { %3666 = vmatpush3.msra.mxu1 %v4059_v9  ;;  %v4439_v9 = vld [vmem:[%s4713_s6 + $0x18] sm:$0xff] }
 0xd8d   :  { %3667 = vmatprep.subr.mxu1 %v3916_v0 }
 0xd8e   :  { %3668 = vmatpush3.msra.mxu1 %v4072_v11  ;;  %v4447_v11 = vld [vmem:[%s4714_s5 + $0x8] sm:$0xff] }
 0xd8f   :  { %3669 = vmatprep.subr.mxu1 %v3916_v0 }
 0xd90   :  { %3670 = vmatpush3.msra.mxu1 %v4086_v13  ;;  %v1856_v7 = vpop.permute.xlu1 %1855  ;;  %v4453_v13 = vld [vmem:[%s4713_s6 + $0x10] sm:$0xff] }
 0xd91   :  { %1859 = vst.msk [vmem:[#allocation3 + $0x6] sm:$0x3] %vm430_vm3, %v1856_v7  ;;  %3672 = vmatmul.mubr.msk.f32.vlgmr.msra.gmra.mxu1 %vm68_vm2, %v3305_v14  ;;  %3679 = vmatmul.mubr.msk.f32.vlgmr.msra.gmra.mxu0 %vm142_vm0, %v1856_v7 }
 0xd92   :  { %3682 = vmatpush3.msra.mxu0 %v4439_v9  ;;  %3692 = vmatprep.subr.mxu1 %v3916_v0 }
 0xd93   :  { %3683 = vmatprep.subr.mxu0 %v3916_v0  ;;  %3693 = vmatpush3.msra.mxu1 %v4447_v11 }
 0xd94   :  { %3684 = vmatpush3.msra.mxu0 %v4453_v13  ;;  %3689 = vmatprep.mubr.msk.f32.mxu0 %vm3917_vm1, %v3916_v0 }
 0xd95   :  { %3685 = vmatprep.subr.mxu0 %v3916_v0  ;;  %3694 = vmatprep.subr.mxu1 %v3916_v0 }
 0xd96   :  { %3686 = vmatpush3.msra.mxu0 %v4463_v28  ;;  %3695 = vmatpush3.msra.mxu1 %v4469_v29 }
 0xd97   :  { %3687 = vmatprep.subr.mxu0 %v3916_v0  ;;  %3696 = vmatprep.mubr.msk.f32.mxu1 %vm3917_vm1, %v3916_v0 }
 0xd98   :  { %3688 = vmatpush3.msra.mxu0 %v4478_v30  ;;  %3699 = vmatprep.subr.mxu1 %v3916_v0 }
 0xd99   :  { %3710 = vmatprep.subr.mxu0 %v3916_v0  ;;  %3690 = vmatmul.mubr.msk.f32.vlgmr.msra.gmra.mxu0 %vm68_vm2, %v3309_v53  ;;  %v2922_v53 = vld [vmem:[#allocation2 + $0x2] sm:$0x3] }
 0xd9a   :  { %3711 = vmatpush3.msra.mxu0 %v4504_v55  ;;  %3714 = vmatprep.mubr.msk.f32.mxu0 %vm3917_vm1, %v3916_v0 }
 0xd9b   :  { %3712 = vmatprep.subr.mxu0 %v3916_v0 }
 0xd9c   :  { %3713 = vmatpush3.msra.mxu0 %v4514_v56 }
 0xd9d   :  { %3717 = vmatprep.subr.mxu0 %v3916_v0 }
 0xe49   :  { %v2002_v31 = vpop.f32.mrf.mxu1 }
 0xe4a   :  { %v2003_v32 = vadd.f32 %v2002_v31, %v1930_v24 }
 0xe4b   :  { %v3662_v33 = vpop.f32.mrf.mxu1 }
 0xe4c   :  { %v2006_v34 = vadd.f32 %v4132_v19, %v2003_v32 }
 0xe4e   :  { %3854 = vtanh.f32 %v2006_v34  ;;  %v3304_v43 = vmul.f32 -1.442695, %v2006_v34 }
 0xe51   :  { %v2101_v35 = vpop.f32.mrf.mxu1  ;;  %v2173_v36 = vpop.f32.mrf.mxu0 }
 0xe52   :  { %v2174_v37 = vadd.f32 %v2173_v36, %v2101_v35 }
 0xe53   :  { %v3673_v38 = vpop.f32.mrf.mxu1  ;;  %v3680_v39 = vpop.f32.mrf.mxu0 }
 0xe54   :  { %v2177_v40 = vadd.f32 %v4138_v25, %v2174_v37 }
 0xe56   :  { %3856 = vtanh.f32 %v2177_v40  ;;  %v3308_v1 = vmul.f32 -1.442695, %v2177_v40 }
 0xe57   :  { %3858 = vpow2.f32 %v3304_v43 }
 0xe58   :  { %3860 = vpow2.f32 %v3308_v1 }
 0xe59   :  { %v2284_v62 = vpop.f32.mrf.mxu0 }
 0xe5b   :  { %v3855_v41 = vpop.eup %3854  ;;  %v3691_v63 = vpop.f32.mrf.mxu0 }
 0xe5c   :  { %2016 = vrot.lane.b32.xlu0 %v3855_v41, %s3918_s21 }
 0xe63   :  { %v3857_v42 = vpop.eup %3856 }
 0xe64   :  { %2187 = vrot.lane.b32.xlu1 %v3857_v42, %s3918_s21  ;;  %v3859_v19 = vpop.eup %3858 }
 0xe65   :  { %v2010_v2 = vadd.f32 1.0, %v3859_v19  ;;  %v3861_v3 = vpop.eup %3860 }
 0xe66   :  { %v2181_v44 = vadd.f32 1.0, %v3861_v3 }
 0xe67   :  { %3862 = vrcp.f32 %v2010_v2 }
 0xe68   :  { %3864 = vrcp.f32 %v2181_v44 }
 0xe74   :  { %v3863_v5 = vpop.eup %3862 }
 0xe75   :  { %v3865_v4 = vpop.eup %3864  ;;  %v2014_v48 = vmul.f32 %v3863_v5, %v4398_v6 }
 0xe76   :  { %v2185_v50 = vmul.f32 %v3865_v4, %v4402_v16  ;;  %v4542_v16 = vld [vmem:[%s4716_s9 + $0x8] sm:$0xff] }
 0xece   :  { %v2017_v45 = vpop.permute.xlu0 %2016 }
 0xecf   :  { %v2019_v25 = vmul.f32 %v3863_v5, %v2017_v45  ;;  %v3317_v45 = vld [vmem:[%s4717_s0 + $0xe] sm:$0x3] }
 0xed1   :  { %2021 = vrot.lane.b32.xlu0 %v2019_v25, %s3919_s22 }
 0xed6   :  { %v2188_v46 = vpop.permute.xlu1 %2187 }
 0xed7   :  { %v2190_v47 = vmul.f32 %v3865_v4, %v2188_v46 }
 0xed9   :  { %2192 = vrot.lane.b32.xlu1 %v2190_v47, %s3919_s22 }
 0xf43   :  { %v2022_v49 = vpop.permute.xlu0 %2021 }
 0xf44   :  { %v4490_v8 = vadd.f32 %v2022_v49, %v2014_v48  ;;  %v3921_v48 = vmov 1983009808  }
 0xf45   :  { %v2952_v49 = vunpack.c.l.s4 %v3921_v48 }
 0xf46   :  { %3866 = vtanh.f32 %v4490_v8 }
 0xf4b   :  { %v2193_v51 = vpop.permute.xlu1 %2192 }
 0xf4c   :  { %v4494_v52 = vadd.f32 %v2193_v51, %v2185_v50  ;;  %v2924_v50 = vld [vmem:[#allocation2 + $0x6] sm:$0x3]  ;;  %v2953_v51 = vunpack.c.0.s8 %v2952_v49 }
 0xf4e   :  { %3868 = vtanh.f32 %v4494_v52 }
 0xf53   :  { %v3867_v54 = vpop.eup %3866 }
 0xf54   :  { %2027 = vrot.lane.b32.xlu0 %v3867_v54, %s3920_s2  ;;  %v2923_v54 = vld [vmem:[#allocation2 + $0x4] sm:$0x3] }
 0xf5b   :  { %v3869_v57 = vpop.eup %3868 }
 0xf5c   :  { %2198 = vrot.lane.b32.xlu1 %v3869_v57, %s3920_s2  ;;  %v3071_v57 = vcombine.low %v2923_v54, %v2924_v50  ;;  %v2933_v54 = vld [vmem:[#allocation3 + $0x8] sm:$0x3] }
 0xfc6   :  { %v2028_v58 = vpop.permute.xlu0 %2027 }
 0xfc7   :  { %v2030_v59 = vmul.f32 %v3863_v5, %v2028_v58 }
 0xfc9   :  { %2203 = vrot.lane.b32.xlu0 %v2030_v59, %s3918_s21 }
 0xfce   :  { %v2199_v60 = vpop.permute.xlu1 %2198 }
 0xfcf   :  { %v2201_v61 = vmul.f32 %v3865_v4, %v2199_v60 }
 0xfd1   :  { %2209 = vrot.lane.b32.xlu1 %v2201_v61, %s3918_s21  ;;  %v2739_v61 = vld [vmem:[%s4717_s0] sm:$0x3] }
0x103b   :  { %v2204_v6 = vpop.permute.xlu0 %2203 }
0x103c   :  { %2207 = vst.msk [vmem:[#allocation2 + $0xa] sm:$0x3] %vm430_vm3, %v2204_v6  ;;  %3697 = vmatmul.mubr.msk.f32.vlgmr.msra.gmra.mxu1 %vm142_vm0, %v2204_v6 }
0x103d   :  { %3700 = vmatpush3.msra.mxu1 %v4526_v10  ;;  %3707 = vmatprep.mubr.msk.f32.mxu1 %vm3917_vm1, %v3916_v0 }
0x103e   :  { %3701 = vmatprep.subr.mxu1 %v3916_v0 }
0x103f   :  { %3702 = vmatpush3.msra.mxu1 %v4535_v15 }
0x1040   :  { %3703 = vmatprep.subr.mxu1 %v3916_v0 }
0x1041   :  { %3704 = vmatpush3.msra.mxu1 %v4542_v16 }
0x1042   :  { %3705 = vmatprep.subr.mxu1 %v3916_v0 }
0x1043   :  { %3706 = vmatpush3.msra.mxu1 %v4552_v18  ;;  %v2210_v20 = vpop.permute.xlu1 %2209 }
0x1044   :  { %2213 = vst.msk [vmem:[#allocation3 + $0x4] sm:$0x3] %vm430_vm3, %v2210_v20  ;;  %3708 = vmatmul.mubr.msk.f32.vlgmr.msra.gmra.mxu1 %vm68_vm2, %v3313_v17  ;;  %3715 = vmatmul.mubr.msk.f32.vlgmr.msra.gmra.mxu0 %vm142_vm0, %v2210_v20 }
0x1045   :  { %3718 = vmatpush3.msra.mxu0 %v4439_v9  ;;  %3728 = vmatprep.subr.mxu1 %v3916_v0 }
0x1046   :  { %3719 = vmatprep.subr.mxu0 %v3916_v0  ;;  %3729 = vmatpush3.msra.mxu1 %v4447_v11  ;;  %v4584_v11 = vld [vmem:[%s4721_s10] ss:$0 sm:$0xff] }
0x1047   :  { %3720 = vmatpush3.msra.mxu0 %v4453_v13  ;;  %3730 = vmatprep.subr.mxu1 %v3916_v0 }
0x1048   :  { %3721 = vmatprep.subr.mxu0 %v3916_v0  ;;  %3731 = vmatpush3.msra.mxu1 %v4469_v29 }
0x1049   :  { %3722 = vmatpush3.msra.mxu0 %v4463_v28  ;;  %3725 = vmatprep.mubr.msk.f32.mxu0 %vm3917_vm1, %v3916_v0 }
0x104a   :  { %3723 = vmatprep.subr.mxu0 %v3916_v0  ;;  %3732 = vmatprep.mubr.msk.f32.mxu1 %vm3917_vm1, %v3916_v0 }
0x104b   :  { %3724 = vmatpush3.msra.mxu0 %v4478_v30  ;;  %3735 = vmatprep.subr.mxu1 %v3916_v0 }
0x104c   :  { %3746 = vmatprep.subr.mxu0 %v3916_v0  ;;  %3726 = vmatmul.mubr.msk.f32.vlgmr.msra.gmra.mxu0 %vm68_vm2, %v3317_v45 }
0x104d   :  { %3747 = vmatpush3.msra.mxu0 %v4504_v55  ;;  %3750 = vmatprep.mubr.msk.f32.mxu0 %vm3917_vm1, %v3916_v0 }
0x104e   :  { %3748 = vmatprep.subr.mxu0 %v3916_v0 }
0x104f   :  { %3749 = vmatpush3.msra.mxu0 %v4514_v56  ;;  %v2921_v56 = vld [vmem:[#allocation2] sm:$0x3] }
0x1050   :  { %v3070_v59 = vcombine.low %v2921_v56, %v2922_v53 }
0x10fc   :  { %v2356_v21 = vpop.f32.mrf.mxu1 }
0x10fd   :  { %v2357_v22 = vadd.f32 %v2356_v21, %v2284_v62 }
0x10fe   :  { %v3698_v23 = vpop.f32.mrf.mxu1 }
0x10ff   :  { %v2360_v24 = vadd.f32 %v4578_v12, %v2357_v22 }
0x1101   :  { %3870 = vtanh.f32 %v2360_v24  ;;  %v3312_v30 = vmul.f32 -1.442695, %v2360_v24 }
0x1104   :  { %v2455_v26 = vpop.f32.mrf.mxu1  ;;  %v2527_v27 = vpop.f32.mrf.mxu0 }
0x1105   :  { %v2528_v14 = vadd.f32 %v2527_v27, %v2455_v26 }
0x1106   :  { %v3709_v7 = vpop.f32.mrf.mxu1  ;;  %v3716_v9 = vpop.f32.mrf.mxu0 }
0x1107   :  { %v2531_v13 = vadd.f32 %v4584_v11, %v2528_v14 }
0x1109   :  { %3872 = vtanh.f32 %v2531_v13  ;;  %v3316_v31 = vmul.f32 -1.442695, %v2531_v13 }
0x110a   :  { %3874 = vpow2.f32 %v3312_v30 }
0x110b   :  { %3876 = vpow2.f32 %v3316_v31 }
0x110e   :  { %v3871_v28 = vpop.eup %3870 }
0x110f   :  { %2370 = vrot.lane.b32.xlu0 %v3871_v28, %s3918_s21 }
0x1116   :  { %v3873_v29 = vpop.eup %3872 }
0x1117   :  { %2541 = vrot.lane.b32.xlu1 %v3873_v29, %s3918_s21  ;;  %v3875_v32 = vpop.eup %3874 }
0x1118   :  { %v2364_v33 = vadd.f32 1.0, %v3875_v32  ;;  %v3877_v34 = vpop.eup %3876 }
0x1119   :  { %v2535_v35 = vadd.f32 1.0, %v3877_v34 }
0x111a   :  { %3878 = vrcp.f32 %v2364_v33 }
0x111b   :  { %3880 = vrcp.f32 %v2535_v35 }
0x1127   :  { %v3879_v36 = vpop.eup %3878 }
0x1128   :  { %v3881_v39 = vpop.eup %3880  ;;  %v2368_v42 = vmul.f32 %v3879_v36, %v4490_v8  ;;  %v2954_v8 = vlaneseq }
0x1129   :  { %v2539_v19 = vmul.f32 %v3881_v39, %v4494_v52 }
0x112a   :  { %v2955_v52 = vshrl.u32 %v2954_v8, 7 }
0x112c   :  { %v4617_v58 = vsub.s32 %v2953_v51, %v2955_v52 }
0x112e   :  { %v3085_v60 = vrot.slane %v3071_v57, %v4617_v58  ;;  %v3078_v62 = vrot.slane %v3070_v59, %v4617_v58  ;;  %v2931_v57 = vld [vmem:[#allocation3 + $0x4] sm:$0x3] }
0x1130   :  { %v3086_v6 = vcombine.low %v3078_v62, %v3085_v60  ;;  %v2934_v60 = vld [vmem:[#allocation3 + $0xa] sm:$0x3]  ;;  %v2932_v62 = vld [vmem:[#allocation3 + $0x6] sm:$0x3] }
0x1181   :  { %v2371_v37 = vpop.permute.xlu0 %2370 }
0x1182   :  { %v2373_v38 = vmul.f32 %v3879_v36, %v2371_v37 }
0x1184   :  { %2375 = vrot.lane.b32.xlu0 %v2373_v38, %s3919_s22 }
0x1189   :  { %v2542_v40 = vpop.permute.xlu1 %2541 }
0x118a   :  { %v2544_v41 = vmul.f32 %v3881_v39, %v2542_v40 }
0x118c   :  { %2546 = vrot.lane.b32.xlu1 %v2544_v41, %s3919_s22 }
0x11f6   :  { %v2376_v43 = vpop.permute.xlu0 %2375 }
0x11f7   :  { %v4592_v1 = vadd.f32 %v2376_v43, %v2368_v42  ;;  %v2938_v43 = vld [vmem:[%s4724_s11 + $0x8] sm:$0xff] }
0x11f9   :  { %3882 = vtanh.f32 %v4592_v1 }
0x11fe   :  { %v2547_v2 = vpop.permute.xlu1 %2546 }
0x11ff   :  { %v4596_v3 = vadd.f32 %v2547_v2, %v2539_v19  ;;  %v2937_v2 = vld [vmem:[%s4724_s11] sm:$0xff]  ;;  %s3922_s11 = smov 16  }
0x1201   :  { %3884 = vtanh.f32 %v4596_v3 }
0x1206   :  { %v3883_v44 = vpop.eup %3882 }
0x1207   :  { %2381 = vrot.lane.b32.xlu0 %v3883_v44, %s3920_s2  ;;  %v2939_v44 = vld [vmem:[%s4725_s12] sm:$0xff] }
0x120e   :  { %v3885_v5 = vpop.eup %3884 }
0x120f   :  { %2552 = vrot.lane.b32.xlu1 %v3885_v5, %s3920_s2 }
0x1279   :  { %v2382_v25 = vpop.permute.xlu0 %2381 }
0x127a   :  { %v2384_v4 = vmul.f32 %v3879_v36, %v2382_v25  ;;  %v3245_v25 = vld [vmem:[#allocation3 + $0xe] sm:$0x3] }
0x127c   :  { %2557 = vrot.lane.b32.xlu0 %v2384_v4, %s3918_s21 }
0x1281   :  { %v2553_v46 = vpop.permute.xlu1 %2552 }
0x1282   :  { %v2555_v47 = vmul.f32 %v3881_v39, %v2553_v46  ;;  %v2926_v46 = vld [vmem:[#allocation2 + $0xa] sm:$0x3] }
0x1284   :  { %2563 = vrot.lane.b32.xlu1 %v2555_v47, %s3918_s21  ;;  %v2925_v47 = vld [vmem:[#allocation2 + $0x8] sm:$0x3] }
0x1285   :  { %v3087_v48 = vcombine.low %v2925_v47, %v2926_v46 }
0x1287   :  { %v3095_v52 = vrot.slane %v3087_v48, %v4617_v58 }
0x12ee   :  { %v2558_v55 = vpop.permute.xlu0 %2557 }
0x12ef   :  { %2561 = vst.msk [vmem:[#allocation2 + $0xc] sm:$0x3] %vm430_vm3, %v2558_v55  ;;  %3733 = vmatmul.mubr.msk.f32.vlgmr.msra.gmra.mxu1 %vm142_vm0, %v2558_v55 }
0x12f0   :  { %3736 = vmatpush3.msra.mxu1 %v4526_v10  ;;  %3743 = vmatprep.mubr.msk.f32.mxu1 %vm3917_vm1, %v3916_v0  ;;  %v2638_v10 = vpop.f32.mrf.mxu0 }
0x12f1   :  { %3737 = vmatprep.subr.mxu1 %v3916_v0 }
0x12f2   :  { %3738 = vmatpush3.msra.mxu1 %v4535_v15  ;;  %v3727_v15 = vpop.f32.mrf.mxu0 }
0x12f3   :  { %3739 = vmatprep.subr.mxu1 %v3916_v0 }
0x12f4   :  { %3740 = vmatpush3.msra.mxu1 %v4542_v16 }
0x12f5   :  { %3741 = vmatprep.subr.mxu1 %v3916_v0 }
0x12f6   :  { %3742 = vmatpush3.msra.mxu1 %v4552_v18  ;;  %v2564_v63 = vpop.permute.xlu1 %2563  ;;  %v2927_v8 = vld [vmem:[#allocation2 + $0xc] sm:$0x3] }
0x12f7   :  { %2567 = vst.msk [vmem:[#allocation3 + $0x2] sm:$0x3] %vm430_vm3, %v2564_v63  ;;  %3744 = vmatmul.mubr.msk.f32.vlgmr.msra.gmra.mxu1 %vm68_vm2, %v2739_v61  ;;  %3751 = vmatmul.mubr.msk.f32.vlgmr.msra.gmra.mxu0 %vm142_vm0, %v2564_v63  ;;  %v2935_v61 = vld [vmem:[#allocation3 + $0xc] sm:$0x3]  ;;  %v2966_v63 = vcombine.low %v2933_v54, %v2934_v60 }
0x12f8   :  { %3764 = vmatprep.mubr.msk.f32.mxu1 %vm142_vm0, %v3086_v6  ;;  %3760 = vmatprep.subr.mxu1 %v2938_v43  ;;  %v2950_v6 = vcombine.low %v2931_v57, %v2932_v62 }
0x12f9   :  { %3761 = vmatpush3.msra.mxu1 %v2938_v43 }
0x12fa   :  { %3762 = vmatprep.subr.mxu1 %v2937_v2 }
0x12fb   :  { %3763 = vmatpush3.msra.mxu1 %v2937_v2 }
0x13af   :  { %v2710_v16 = vpop.f32.mrf.mxu1 }
0x13b0   :  { %v2711_v17 = vadd.f32 %v2710_v16, %v2638_v10  ;;  %v2936_v10 = vld [vmem:[#allocation3 + $0xe] sm:$0x3]  ;;  %v2930_v16 = vld [vmem:[#allocation3 + $0x2] sm:$0x3] }
0x13b1   :  { %v3734_v20 = vpop.f32.mrf.mxu1 }
0x13b2   :  { %v2714_v21 = vadd.f32 %v4578_v12, %v2711_v17  ;;  %v2967_v17 = vcombine.low %v2935_v61, %v2936_v10 }
0x13b4   :  { %3886 = vtanh.f32 %v2714_v21  ;;  %v3320_v7 = vmul.f32 -1.442695, %v2714_v21  ;;  %v2974_v21 = vrot.slane %v2966_v63, %v4617_v58 }
0x13b7   :  { %v2809_v0 = vpop.f32.mrf.mxu1  ;;  %v2881_v18 = vpop.f32.mrf.mxu0 }
0x13b8   :  { %v2882_v22 = vadd.f32 %v2881_v18, %v2809_v0  ;;  %v2964_v18 = vrot.slane %v2950_v6, %v4617_v58 }
0x13b9   :  { %v3745_v23 = vpop.f32.mrf.mxu1  ;;  %v3752_v24 = vpop.f32.mrf.mxu0 }
0x13ba   :  { %v2885_v26 = vadd.f32 %v4584_v11, %v2882_v22  ;;  %v2981_v22 = vrot.slane %v2967_v17, %v4617_v58 }
0x13bc   :  { %3888 = vtanh.f32 %v2885_v26  ;;  %v3323_v9 = vmul.f32 -1.442695, %v2885_v26  ;;  %v2982_v24 = vcombine.low %v2974_v21, %v2981_v22 }
0x13bd   :  { %3890 = vpow2.f32 %v3320_v7 }
0x13be   :  { %3892 = vpow2.f32 %v3323_v9 }
0x13c1   :  { %v3887_v27 = vpop.eup %3886 }
0x13c2   :  { %2724 = vrot.lane.b32.xlu1 %v3887_v27, %s3918_s21 }
0x13c9   :  { %v3889_v14 = vpop.eup %3888 }
0x13ca   :  { %2895 = vrot.lane.b32.xlu0 %v3889_v14, %s3918_s21  ;;  %v3891_v12 = vpop.eup %3890  ;;  %v3328_v14 = vld [vmem:[%s4727_s13] ss:$0 sm:$0xff] }
0x13cb   :  { %v2718_v13 = vadd.f32 1.0, %v3891_v12  ;;  %v3893_v28 = vpop.eup %3892 }
0x13cc   :  { %v2889_v29 = vadd.f32 1.0, %v3893_v28 }
0x13cd   :  { %3894 = vrcp.f32 %v2718_v13 }
0x13ce   :  { %3896 = vrcp.f32 %v2889_v29 }
0x13da   :  { %v3895_v30 = vpop.eup %3894 }
0x13db   :  { %v3897_v32 = vpop.eup %3896  ;;  %v2722_v35 = vmul.f32 %v3895_v30, %v4592_v1 }
0x13dc   :  { %v2893_v38 = vmul.f32 %v3897_v32, %v4596_v3  ;;  %v2940_v3 = vld [vmem:[%s4725_s12 + $0x8] sm:$0xff] }
0x13dd   :  { %3753 = vmatprep.subr.mxu0 %v2940_v3 }
0x13de   :  { %3754 = vmatpush3.msra.mxu0 %v2940_v3 }
0x13df   :  { %3755 = vmatprep.subr.mxu0 %v2939_v44 }
0x13e0   :  { %3756 = vmatpush3.msra.mxu0 %v2939_v44 }
0x1434   :  { %v2725_v31 = vpop.permute.xlu1 %2724 }
0x1435   :  { %v2727_v11 = vmul.f32 %v3895_v30, %v2725_v31 }
0x1437   :  { %2729 = vrot.lane.b32.xlu1 %v2727_v11, %s3919_s22 }
0x143c   :  { %v2896_v33 = vpop.permute.xlu0 %2895 }
0x143d   :  { %v2898_v34 = vmul.f32 %v3897_v32, %v2896_v33 }
0x143f   :  { %2900 = vrot.lane.b32.xlu0 %v2898_v34, %s3919_s22 }
0x14a9   :  { %v2730_v36 = vpop.permute.xlu1 %2729 }
0x14aa   :  { %v2732_v37 = vadd.f32 %v2730_v36, %v2722_v35 }
0x14ac   :  { %3898 = vtanh.f32 %v2732_v37 }
0x14b1   :  { %v2901_v39 = vpop.permute.xlu0 %2900 }
0x14b2   :  { %v2903_v40 = vadd.f32 %v2901_v39, %v2893_v38 }
0x14b4   :  { %3900 = vtanh.f32 %v2903_v40 }
0x14b9   :  { %v3899_v41 = vpop.eup %3898 }
0x14ba   :  { %2735 = vrot.lane.b32.xlu1 %v3899_v41, %s3920_s2 }
0x14c1   :  { %v3901_v42 = vpop.eup %3900 }
0x14c2   :  { %2906 = vrot.lane.b32.xlu0 %v3901_v42, %s3920_s2 }
0x152c   :  { %v2736_v19 = vpop.permute.xlu1 %2735 }
0x152d   :  { %v2738_v1 = vmul.f32 %v3895_v30, %v2736_v19 }
0x152f   :  { %2911 = vrot.lane.b32.xlu1 %v2738_v1, %s3918_s21 }
0x1534   :  { %v2907_v5 = vpop.permute.xlu0 %2906 }
0x1535   :  { %v2909_v45 = vmul.f32 %v3897_v32, %v2907_v5 }
0x1537   :  { %2917 = vrot.lane.b32.xlu0 %v2909_v45, %s3918_s21 }
0x153b   :  { %3247 = vrot.lane.b32.xlu0 %v3245_v25, %s3922_s11 }
0x15a1   :  { %v2912_v4 = vpop.permute.xlu1 %2911 }
0x15a2   :  { %2915 = vst.msk [vmem:[#allocation2 + $0xe] sm:$0x3] %vm430_vm3, %v2912_v4 }
0x15a9   :  { %v2918_v49 = vpop.permute.xlu0 %2917  ;;  %v2928_v50 = vld [vmem:[#allocation2 + $0xe] sm:$0x3] }
0x15aa   :  { %2920 = vst.msk [vmem:[#allocation3] sm:$0x3] %vm430_vm3, %v2918_v49  ;;  %v3088_v51 = vcombine.low %v2927_v8, %v2928_v50 }
0x15ac   :  { %v3102_v53 = vrot.slane %v3088_v51, %v4617_v58 }
0x15ad   :  { %v3248_v55 = vpop.permute.xlu0 %3247 }
0x15ae   :  { %v3250_v56 = vsel %vm142_vm0, %v2912_v4, %v3248_v55  ;;  %v3103_v59 = vcombine.low %v3095_v52, %v3102_v53 }
0x15af   :  { %3251 = vst.msk [vmem:[%s4726_s15] sm:$0x3] %vm3236_vm4, %v3250_v56 }
0x15b0   :  { %3765 = vmatmul.mubr.msk.f32.vlgmr.msra.gmra.mxu1 %vm142_vm0, %v3103_v59 }
0x15b1   :  { %v2929_v15 = vld [vmem:[#allocation3] sm:$0x3] }
0x15b2   :  { %v2949_v20 = vcombine.low %v2929_v15, %v2930_v16 }
0x15b4   :  { %v2957_v0 = vrot.slane %v2949_v20, %v4617_v58 }
0x15b6   :  { %v2965_v23 = vcombine.low %v2957_v0, %v2964_v18 }
0x15b8   :  { %3757 = vmatprep.mubr.msk.f32.mxu0 %vm142_vm0, %v2965_v23 }
0x15b9   :  { %3758 = vmatmul.mubr.msk.f32.vlgmr.msra.gmra.mxu0 %vm142_vm0, %v2982_v24 }
0x1670   :  { %v3766_v26 = vpop.f32.mrf.mxu1 }
0x1672   :  { %v3174_v9 = vpop.f32.mrf.mxu1 }
0x1679   :  { %v3759_v27 = vpop.f32.mrf.mxu0 }
0x167a   :  { %v3180_v7 = vadd.f32 %v3766_v26, %v3759_v27 }
0x167b   :  { %v3053_v12 = vpop.f32.mrf.mxu0 }
0x167c   :  { %v3191_v13 = vadd.f32 %v3328_v14, %v3180_v7  ;;  %v3175_v28 = vadd.f32 %v3174_v9, %v3053_v12 }
0x167e   :  { %v3211_v29 = vcombine.high %v3191_v13, %v3191_v13  ;;  %v3218_v30 = vrot.slane %v3191_v13, %v4617_v58  ;;  %v3190_v31 = vadd.f32 %v3328_v14, %v3175_v28 }
0x1680   :  { %v3225_v11 = vrot.slane %v3211_v29, %v4617_v58  ;;  %v3226_v32 = vcombine.high %v3218_v30, %v3218_v30  ;;  %3241 = vst.msk [vmem:[%s4728_s14 + $0x8] sm:$0x3] %vm3236_vm4, %v3218_v30  ;;  %v3194_v33 = vcombine.high %v3190_v31, %v3190_v31  ;;  %v3201_v34 = vrot.slane %v3190_v31, %v4617_v58 }
0x1682   :  { %v3227_v35 = vcombine.high %v3225_v11, %v3225_v11  ;;  %3242 = vst.msk [vmem:[%s4728_s14 + $0xa] sm:$0x3] %vm3236_vm4, %v3226_v32  ;;  %3243 = vst.msk [vmem:[%s4728_s14 + $0xc] sm:$0x3] %vm3236_vm4, %v3225_v11  ;;  %v3208_v36 = vrot.slane %v3194_v33, %v4617_v58  ;;  %v3209_v37 = vcombine.high %v3201_v34, %v3201_v34 }
0x1683   :  { %3237 = vst.msk [vmem:[%s4728_s14] sm:$0x3] %vm3236_vm4, %v3201_v34 }
0x1684   :  { %3244 = vst.msk [vmem:[%s4728_s14 + $0xe] sm:$0x3] %vm3236_vm4, %v3227_v35  ;;  %v3210_v38 = vcombine.high %v3208_v36, %v3208_v36  ;;  %3238 = vst.msk [vmem:[%s4728_s14 + $0x2] sm:$0x3] %vm3236_vm4, %v3209_v37 }
0x1685   :  { %3239 = vst.msk [vmem:[%s4728_s14 + $0x4] sm:$0x3] %vm3236_vm4, %v3208_v36 }
0x1686   :  { %3240 = vst.msk [vmem:[%s4728_s14 + $0x6] sm:$0x3] %vm3236_vm4, %v3210_v38 }

</bundles_post_ra>
